<compile_context>
chip_gen: v6e
topology: v6e:2x2x1
jax: 0.10.0
libtpu: 0.0.40
codegen_flags: <defaults>
</compile_context>

<pallas_src>
import functools

import jax
import jax.numpy as jnp
from jax import lax
from jax.experimental import pallas as pl
from jax.experimental.pallas import tpu as pltpu


# -----------------------------------------------------------------------------
# Kernel 1: fused VALID conv(5x5, stride 1) + bias + ReLU + 2x2/stride-2 maxpool
# One grid step per batch element; an in-kernel fori_loop walks the Hp pooled
# output rows.  For pooled row hp the kernel:
#   1) accumulates the 25 tap matmuls for the two conv rows (2hp, 2hp+1) in
#      registers (band of L2 = W + Wout flat rows; the few wrapped columns of
#      row 2hp are junk and never read),
#   2) stores the band once to a small VMEM scratch,
#   3) pools via four stride-2 slices + jnp.maximum,
#   4) applies bias + ReLU and stores the pooled row.
# -----------------------------------------------------------------------------
def _conv_relu_pool_kernel(x_ref, w_ref, b_ref, o_ref, band_ref, *,
                           W, KH, KW, Hp, Wp, L2):
    def body(hp, carry):
        r0 = 2 * hp * W                     # flat row of conv output row 2*hp

        # --- 25 shifted, contiguous matmuls accumulated in registers ---
        acc = jnp.dot(x_ref[0, pl.ds(r0, L2), :], w_ref[0],
                      preferred_element_type=jnp.float32)
        for t in range(1, KH * KW):
            kh, kw = divmod(t, KW)
            acc = acc + jnp.dot(x_ref[0, pl.ds(r0 + kh * W + kw, L2), :],
                                w_ref[t],
                                preferred_element_type=jnp.float32)

        # single store of the conv band (pre-bias, pre-ReLU)
        band_ref[...] = acc

        # --- 2x2 / stride-2 max-pool via strided slices (no MXU gather) ---
        a = band_ref[pl.ds(0, Wp, stride=2), :]       # (2hp,   2wp)
        b = band_ref[pl.ds(1, Wp, stride=2), :]       # (2hp,   2wp+1)
        c = band_ref[pl.ds(W, Wp, stride=2), :]       # (2hp+1, 2wp)
        d = band_ref[pl.ds(W + 1, Wp, stride=2), :]   # (2hp+1, 2wp+1)
        pooled = jnp.maximum(jnp.maximum(a, b), jnp.maximum(c, d))

        # bias + ReLU after the max (monotone => same result, Wp rows not L2)
        pooled = jnp.maximum(pooled + b_ref[...], 0.0)

        o_ref[0, pl.ds(hp * Wp, Wp), :] = pooled
        return carry

    lax.fori_loop(0, Hp, body, 0)


def conv_relu_pool(x_nhwc, w_hwio, bias):
    N, H, W, Cin = x_nhwc.shape
    KH, KW, _, Cout = w_hwio.shape
    Hout, Wout = H - KH + 1, W - KW + 1
    Hp, Wp = Hout // 2, Wout // 2               # F.max_pool2d floor behavior
    L2 = W + Wout                               # flat rows per 2-conv-row band

    x_flat = x_nhwc.reshape(N, H * W, Cin)      # glue: row-major spatial flatten
    w_flat = w_hwio.reshape(KH * KW, Cin, Cout)

    kernel = functools.partial(_conv_relu_pool_kernel,
                               W=W, KH=KH, KW=KW, Hp=Hp, Wp=Wp, L2=L2)

    out = pl.pallas_call(
        kernel,
        out_shape=jax.ShapeDtypeStruct((N, Hp * Wp, Cout), jnp.float32),
        grid=(N,),
        in_specs=[
            pl.BlockSpec((1, H * W, Cin), lambda n: (n, 0, 0)),
            pl.BlockSpec((KH * KW, Cin, Cout), lambda n: (0, 0, 0)),
            pl.BlockSpec((1, Cout), lambda n: (0, 0)),
        ],
        out_specs=pl.BlockSpec((1, Hp * Wp, Cout), lambda n: (n, 0, 0)),
        scratch_shapes=[pltpu.VMEM((L2, Cout), jnp.float32)],
        compiler_params=pltpu.CompilerParams(
            dimension_semantics=("parallel",),          # batch across cores (v7x)
            vmem_limit_bytes=32 * 1024 * 1024),
    )(x_flat, w_flat, bias.reshape(1, Cout))

    return out.reshape(N, Hp, Wp, Cout)


# -----------------------------------------------------------------------------
# Kernel 2: fused fc1 + ReLU + fc2 + softmax(dim=1)
# The fc1 reduction dimension F is tiled: grid=(F//tk,), w1 streamed in
# (tk, Dh) blocks and accumulated into a VMEM scratch; fc2 + softmax run on
# the last step.  w1 never has to be fully resident and its HBM->VMEM DMA
# overlaps the MXU work of the previous block.
# -----------------------------------------------------------------------------
def _mlp_softmax_kernel(x_ref, w1_ref, b1_ref, w2_ref, b2_ref, o_ref, h_ref):
    k = pl.program_id(0)

    @pl.when(k == 0)
    def _():
        h_ref[...] = jnp.zeros_like(h_ref)

    h_ref[...] += jnp.dot(x_ref[...], w1_ref[...],
                          preferred_element_type=jnp.float32)

    @pl.when(k == pl.num_programs(0) - 1)
    def _():
        h = jnp.maximum(h_ref[...] + b1_ref[...], 0.0)            # ReLU(fc1)
        logits = jnp.dot(h, w2_ref[...],
                         preferred_element_type=jnp.float32) + b2_ref[...]
        z = logits - jnp.max(logits, axis=-1, keepdims=True)      # softmax(dim=1)
        e = jnp.exp(z)
        o_ref[...] = e / jnp.sum(e, axis=-1, keepdims=True)


def mlp_softmax(feat, w1, b1, w2, b2, *, tk_max=1024):
    N, F = feat.shape
    Dh = w1.shape[1]
    C = w2.shape[1]

    tk = min(F, tk_max)
    while F % tk:
        tk //= 2

    return pl.pallas_call(
        _mlp_softmax_kernel,
        out_shape=jax.ShapeDtypeStruct((N, C), jnp.float32),
        grid=(F // tk,),
        in_specs=[
            pl.BlockSpec((N, tk), lambda k: (0, k)),
            pl.BlockSpec((tk, Dh), lambda k: (k, 0)),
            pl.BlockSpec((1, Dh), lambda k: (0, 0)),
            pl.BlockSpec((Dh, C), lambda k: (0, 0)),
            pl.BlockSpec((1, C), lambda k: (0, 0)),
        ],
        out_specs=pl.BlockSpec((N, C), lambda k: (0, 0)),
        scratch_shapes=[pltpu.VMEM((N, Dh), jnp.float32)],
        compiler_params=pltpu.CompilerParams(
            dimension_semantics=("arbitrary",),          # reduction axis
            vmem_limit_bytes=32 * 1024 * 1024),
    )(feat, w1, b1.reshape(1, Dh), w2, b2.reshape(1, C))


# -----------------------------------------------------------------------------
# Parameters (deterministic, synthetic) and the full forward pass
# -----------------------------------------------------------------------------
def init_params(key, spatial):
    ks = jax.random.split(key, 10)

    def conv_w(k, cin, cout):
        fan_in = 5 * 5 * cin
        return jax.random.normal(k, (5, 5, cin, cout), jnp.float32) / (fan_in ** 0.5)

    def small_bias(k, c):
        return 0.01 * jax.random.normal(k, (c,), jnp.float32)

    # Replicate the module's __init__ "dry run" (self._to_linear) with shape math.
    s = spatial
    for _ in range(3):
        s = (s - 4) // 2            # 5x5 VALID conv then 2x2/2 max-pool
    to_linear = 128 * s * s

    return {
        "cw1": conv_w(ks[0], 3, 32),    "cb1": small_bias(ks[1], 32),
        "cw2": conv_w(ks[2], 32, 64),   "cb2": small_bias(ks[3], 64),
        "cw3": conv_w(ks[4], 64, 128),  "cb3": small_bias(ks[5], 128),
        "fw1": jax.random.normal(ks[6], (to_linear, 512), jnp.float32)
               / (to_linear ** 0.5),
        "fb1": 0.01 * jax.random.normal(ks[7], (512,), jnp.float32),
        "fw2": jax.random.normal(ks[8], (512, 2), jnp.float32) / (512 ** 0.5),
        "fb2": 0.01 * jax.random.normal(ks[9], (2,), jnp.float32),
    }


def net_forward(params, x_nchw):
    x = jnp.transpose(x_nchw, (0, 2, 3, 1))                  # NCHW -> NHWC
    x = conv_relu_pool(x, params["cw1"], params["cb1"])
    x = conv_relu_pool(x, params["cw2"], params["cb2"])
    x = conv_relu_pool(x, params["cw3"], params["cb3"])
    n = x.shape[0]
    feat = jnp.transpose(x, (0, 3, 1, 2)).reshape(n, -1)     # torch .view order
    return mlp_softmax(feat, params["fw1"], params["fb1"],
                       params["fw2"], params["fb2"])


# Pure-JAX reference used only to validate the Pallas pipeline.
def reference_forward(params, x_nchw):
    x = jnp.transpose(x_nchw, (0, 2, 3, 1))
    for wk, bk in (("cw1", "cb1"), ("cw2", "cb2"), ("cw3", "cb3")):
        x = jax.lax.conv_general_dilated(
            x, params[wk], window_strides=(1, 1), padding="VALID",
            dimension_numbers=("NHWC", "HWIO", "NHWC"))
        x = jnp.maximum(x + params[bk], 0.0)
        x = jax.lax.reduce_window(x, -jnp.inf, jax.lax.max,
                                  (1, 2, 2, 1), (1, 2, 2, 1), "VALID")
    n = x.shape[0]
    feat = jnp.transpose(x, (0, 3, 1, 2)).reshape(n, -1)
    h = jnp.maximum(feat @ params["fw1"] + params["fb1"], 0.0)
    logits = h @ params["fw2"] + params["fb2"]
    return jax.nn.softmax(logits, axis=1)


if __name__ == "__main__":
    key = jax.random.PRNGKey(0)
    k_x, k_p = jax.random.split(key)

    N, C_IN, S = 2, 3, 64                      # small analogue of (N, 3, 500, 500)
    x_nchw = jax.random.normal(k_x, (N, C_IN, S, S), dtype=jnp.float32)
    params = init_params(k_p, spatial=S)

    out = net_forward(params, x_nchw)
    out = jax.block_until_ready(out)

    ref = jax.block_until_ready(reference_forward(params, x_nchw))

    assert out.shape == (N, 2)
    assert bool(jnp.all(jnp.isfinite(out)))
    assert float(jnp.max(jnp.abs(jnp.sum(out, axis=1) - 1.0))) < 1e-4
    max_err = float(jnp.max(jnp.abs(out - ref)))
    assert max_err < 2e-3, f"mismatch vs reference: {max_err}"

    print("KERNEL_OK")
</pallas_src>

<mosaic_0001>
module attributes {stable_mosaic.version = 11 : i64} {
  func.func @_conv_relu_pool_kernel(%arg0: i32, %arg1: memref<1x4096x3xf32, #tpu.memory_space<vmem>>, %arg2: memref<25x3x32xf32, #tpu.memory_space<vmem>>, %arg3: memref<1x32xf32, #tpu.memory_space<vmem>>, %arg4: memref<1x900x32xf32, #tpu.memory_space<vmem>>, %arg5: memref<124x32xf32, #tpu.memory_space<vmem>>) attributes {dimension_semantics = [#tpu.dimension_semantics<parallel>], iteration_bounds = array<i64: 2>, scalar_prefetch = 0 : i64, scratch_operands = 1 : i64, tpu.core_type = #tpu.core_type<tc>, window_params = [{transform_indices = @transform_0, window_bounds = array<i64: 1, 4096, 3>}, {pipeline_mode = #tpu.pipeline_mode<synchronous>, transform_indices = @transform_1, window_bounds = array<i64: 25, 3, 32>}, {pipeline_mode = #tpu.pipeline_mode<synchronous>, transform_indices = @transform_2, window_bounds = array<i64: 1, 32>}, {transform_indices = @transform_3, window_bounds = array<i64: 1, 900, 32>}]} {
    %c0_i32 = arith.constant 0 : i32
    %c30_i32 = arith.constant 30 : i32
    %0 = arith.addi %c0_i32, %c30_i32 : i32
    %c1_i32 = arith.constant 1 : i32
    scf.for %arg6 = %c0_i32 to %0 step %c1_i32  : i32 {
      %c2_i32 = arith.constant 2 : i32
      %1 = arith.muli %c2_i32, %arg6 : i32
      %c64_i32 = arith.constant 64 : i32
      %2 = arith.muli %1, %c64_i32 : i32
      %c0 = arith.constant 0 : index
      %3 = arith.index_cast %2 : i32 to index
      %c0_1 = arith.constant 0 : index
      %4 = vector.load %arg1[%c0, %3, %c0_1] : memref<1x4096x3xf32, #tpu.memory_space<vmem>>, vector<1x124x3xf32>
      %5 = vector.shape_cast %4 : vector<1x124x3xf32> to vector<124x3xf32>
      %c0_2 = arith.constant 0 : index
      %c0_3 = arith.constant 0 : index
      %c0_4 = arith.constant 0 : index
      %6 = vector.load %arg2[%c0_2, %c0_3, %c0_4] : memref<25x3x32xf32, #tpu.memory_space<vmem>>, vector<1x3x32xf32>
      %7 = vector.shape_cast %6 : vector<1x3x32xf32> to vector<3x32xf32>
      %cst = arith.constant dense<0.000000e+00> : vector<124x32xf32>
      %8 = tpu.matmul %5, %7, %cst {dimension_numbers = #tpu.dot_dimension_numbers<[1], [0], [0], [1], [0, 0, 1, 1], [], []>} : vector<124x3xf32>, vector<3x32xf32>, vector<124x32xf32> -> vector<124x32xf32>
      %c0_i32_5 = arith.constant 0 : i32
      %9 = arith.addi %2, %c0_i32_5 : i32
      %c1_i32_6 = arith.constant 1 : i32
      %10 = arith.addi %9, %c1_i32_6 : i32
      %c0_7 = arith.constant 0 : index
      %11 = arith.index_cast %10 : i32 to index
      %c0_8 = arith.constant 0 : index
      %12 = vector.load %arg1[%c0_7, %11, %c0_8] : memref<1x4096x3xf32, #tpu.memory_space<vmem>>, vector<1x124x3xf32>
      %13 = vector.shape_cast %12 : vector<1x124x3xf32> to vector<124x3xf32>
      %c1 = arith.constant 1 : index
      %c0_9 = arith.constant 0 : index
      %c0_10 = arith.constant 0 : index
      %14 = vector.load %arg2[%c1, %c0_9, %c0_10] : memref<25x3x32xf32, #tpu.memory_space<vmem>>, vector<1x3x32xf32>
      %15 = vector.shape_cast %14 : vector<1x3x32xf32> to vector<3x32xf32>
      %cst_11 = arith.constant dense<0.000000e+00> : vector<124x32xf32>
      %16 = tpu.matmul %13, %15, %cst_11 {dimension_numbers = #tpu.dot_dimension_numbers<[1], [0], [0], [1], [0, 0, 1, 1], [], []>} : vector<124x3xf32>, vector<3x32xf32>, vector<124x32xf32> -> vector<124x32xf32>
      %17 = arith.addf %8, %16 : vector<124x32xf32>
      %c0_i32_12 = arith.constant 0 : i32
      %18 = arith.addi %2, %c0_i32_12 : i32
      %c2_i32_13 = arith.constant 2 : i32
      %19 = arith.addi %18, %c2_i32_13 : i32
      %c0_14 = arith.constant 0 : index
      %20 = arith.index_cast %19 : i32 to index
      %c0_15 = arith.constant 0 : index
      %21 = vector.load %arg1[%c0_14, %20, %c0_15] : memref<1x4096x3xf32, #tpu.memory_space<vmem>>, vector<1x124x3xf32>
      %22 = vector.shape_cast %21 : vector<1x124x3xf32> to vector<124x3xf32>
      %c2 = arith.constant 2 : index
      %c0_16 = arith.constant 0 : index
      %c0_17 = arith.constant 0 : index
      %23 = vector.load %arg2[%c2, %c0_16, %c0_17] : memref<25x3x32xf32, #tpu.memory_space<vmem>>, vector<1x3x32xf32>
      %24 = vector.shape_cast %23 : vector<1x3x32xf32> to vector<3x32xf32>
      %cst_18 = arith.constant dense<0.000000e+00> : vector<124x32xf32>
      %25 = tpu.matmul %22, %24, %cst_18 {dimension_numbers = #tpu.dot_dimension_numbers<[1], [0], [0], [1], [0, 0, 1, 1], [], []>} : vector<124x3xf32>, vector<3x32xf32>, vector<124x32xf32> -> vector<124x32xf32>
      %26 = arith.addf %17, %25 : vector<124x32xf32>
      %c0_i32_19 = arith.constant 0 : i32
      %27 = arith.addi %2, %c0_i32_19 : i32
      %c3_i32 = arith.constant 3 : i32
      %28 = arith.addi %27, %c3_i32 : i32
      %c0_20 = arith.constant 0 : index
      %29 = arith.index_cast %28 : i32 to index
      %c0_21 = arith.constant 0 : index
      %30 = vector.load %arg1[%c0_20, %29, %c0_21] : memref<1x4096x3xf32, #tpu.memory_space<vmem>>, vector<1x124x3xf32>
      %31 = vector.shape_cast %30 : vector<1x124x3xf32> to vector<124x3xf32>
      %c3 = arith.constant 3 : index
      %c0_22 = arith.constant 0 : index
      %c0_23 = arith.constant 0 : index
      %32 = vector.load %arg2[%c3, %c0_22, %c0_23] : memref<25x3x32xf32, #tpu.memory_space<vmem>>, vector<1x3x32xf32>
      %33 = vector.shape_cast %32 : vector<1x3x32xf32> to vector<3x32xf32>
      %cst_24 = arith.constant dense<0.000000e+00> : vector<124x32xf32>
      %34 = tpu.matmul %31, %33, %cst_24 {dimension_numbers = #tpu.dot_dimension_numbers<[1], [0], [0], [1], [0, 0, 1, 1], [], []>} : vector<124x3xf32>, vector<3x32xf32>, vector<124x32xf32> -> vector<124x32xf32>
      %35 = arith.addf %26, %34 : vector<124x32xf32>
      %c0_i32_25 = arith.constant 0 : i32
      %36 = arith.addi %2, %c0_i32_25 : i32
      %c4_i32 = arith.constant 4 : i32
      %37 = arith.addi %36, %c4_i32 : i32
      %c0_26 = arith.constant 0 : index
      %38 = arith.index_cast %37 : i32 to index
      %c0_27 = arith.constant 0 : index
      %39 = vector.load %arg1[%c0_26, %38, %c0_27] : memref<1x4096x3xf32, #tpu.memory_space<vmem>>, vector<1x124x3xf32>
      %40 = vector.shape_cast %39 : vector<1x124x3xf32> to vector<124x3xf32>
      %c4 = arith.constant 4 : index
      %c0_28 = arith.constant 0 : index
      %c0_29 = arith.constant 0 : index
      %41 = vector.load %arg2[%c4, %c0_28, %c0_29] : memref<25x3x32xf32, #tpu.memory_space<vmem>>, vector<1x3x32xf32>
      %42 = vector.shape_cast %41 : vector<1x3x32xf32> to vector<3x32xf32>
      %cst_30 = arith.constant dense<0.000000e+00> : vector<124x32xf32>
      %43 = tpu.matmul %40, %42, %cst_30 {dimension_numbers = #tpu.dot_dimension_numbers<[1], [0], [0], [1], [0, 0, 1, 1], [], []>} : vector<124x3xf32>, vector<3x32xf32>, vector<124x32xf32> -> vector<124x32xf32>
      %44 = arith.addf %35, %43 : vector<124x32xf32>
      %c64_i32_31 = arith.constant 64 : i32
      %45 = arith.addi %2, %c64_i32_31 : i32
      %c0_i32_32 = arith.constant 0 : i32
      %46 = arith.addi %45, %c0_i32_32 : i32
      %c0_33 = arith.constant 0 : index
      %47 = arith.index_cast %46 : i32 to index
      %c0_34 = arith.constant 0 : index
      %48 = vector.load %arg1[%c0_33, %47, %c0_34] : memref<1x4096x3xf32, #tpu.memory_space<vmem>>, vector<1x124x3xf32>
      %49 = vector.shape_cast %48 : vector<1x124x3xf32> to vector<124x3xf32>
      %c5 = arith.constant 5 : index
      %c0_35 = arith.constant 0 : index
      %c0_36 = arith.constant 0 : index
      %50 = vector.load %arg2[%c5, %c0_35, %c0_36] : memref<25x3x32xf32, #tpu.memory_space<vmem>>, vector<1x3x32xf32>
      %51 = vector.shape_cast %50 : vector<1x3x32xf32> to vector<3x32xf32>
      %cst_37 = arith.constant dense<0.000000e+00> : vector<124x32xf32>
      %52 = tpu.matmul %49, %51, %cst_37 {dimension_numbers = #tpu.dot_dimension_numbers<[1], [0], [0], [1], [0, 0, 1, 1], [], []>} : vector<124x3xf32>, vector<3x32xf32>, vector<124x32xf32> -> vector<124x32xf32>
      %53 = arith.addf %44, %52 : vector<124x32xf32>
      %c64_i32_38 = arith.constant 64 : i32
      %54 = arith.addi %2, %c64_i32_38 : i32
      %c1_i32_39 = arith.constant 1 : i32
      %55 = arith.addi %54, %c1_i32_39 : i32
      %c0_40 = arith.constant 0 : index
      %56 = arith.index_cast %55 : i32 to index
      %c0_41 = arith.constant 0 : index
      %57 = vector.load %arg1[%c0_40, %56, %c0_41] : memref<1x4096x3xf32, #tpu.memory_space<vmem>>, vector<1x124x3xf32>
      %58 = vector.shape_cast %57 : vector<1x124x3xf32> to vector<124x3xf32>
      %c6 = arith.constant 6 : index
      %c0_42 = arith.constant 0 : index
      %c0_43 = arith.constant 0 : index
      %59 = vector.load %arg2[%c6, %c0_42, %c0_43] : memref<25x3x32xf32, #tpu.memory_space<vmem>>, vector<1x3x32xf32>
      %60 = vector.shape_cast %59 : vector<1x3x32xf32> to vector<3x32xf32>
      %cst_44 = arith.constant dense<0.000000e+00> : vector<124x32xf32>
      %61 = tpu.matmul %58, %60, %cst_44 {dimension_numbers = #tpu.dot_dimension_numbers<[1], [0], [0], [1], [0, 0, 1, 1], [], []>} : vector<124x3xf32>, vector<3x32xf32>, vector<124x32xf32> -> vector<124x32xf32>
      %62 = arith.addf %53, %61 : vector<124x32xf32>
      %c64_i32_45 = arith.constant 64 : i32
      %63 = arith.addi %2, %c64_i32_45 : i32
      %c2_i32_46 = arith.constant 2 : i32
      %64 = arith.addi %63, %c2_i32_46 : i32
      %c0_47 = arith.constant 0 : index
      %65 = arith.index_cast %64 : i32 to index
      %c0_48 = arith.constant 0 : index
      %66 = vector.load %arg1[%c0_47, %65, %c0_48] : memref<1x4096x3xf32, #tpu.memory_space<vmem>>, vector<1x124x3xf32>
      %67 = vector.shape_cast %66 : vector<1x124x3xf32> to vector<124x3xf32>
      %c7 = arith.constant 7 : index
      %c0_49 = arith.constant 0 : index
      %c0_50 = arith.constant 0 : index
      %68 = vector.load %arg2[%c7, %c0_49, %c0_50] : memref<25x3x32xf32, #tpu.memory_space<vmem>>, vector<1x3x32xf32>
      %69 = vector.shape_cast %68 : vector<1x3x32xf32> to vector<3x32xf32>
      %cst_51 = arith.constant dense<0.000000e+00> : vector<124x32xf32>
      %70 = tpu.matmul %67, %69, %cst_51 {dimension_numbers = #tpu.dot_dimension_numbers<[1], [0], [0], [1], [0, 0, 1, 1], [], []>} : vector<124x3xf32>, vector<3x32xf32>, vector<124x32xf32> -> vector<124x32xf32>
      %71 = arith.addf %62, %70 : vector<124x32xf32>
      %c64_i32_52 = arith.constant 64 : i32
      %72 = arith.addi %2, %c64_i32_52 : i32
      %c3_i32_53 = arith.constant 3 : i32
      %73 = arith.addi %72, %c3_i32_53 : i32
      %c0_54 = arith.constant 0 : index
      %74 = arith.index_cast %73 : i32 to index
      %c0_55 = arith.constant 0 : index
      %75 = vector.load %arg1[%c0_54, %74, %c0_55] : memref<1x4096x3xf32, #tpu.memory_space<vmem>>, vector<1x124x3xf32>
      %76 = vector.shape_cast %75 : vector<1x124x3xf32> to vector<124x3xf32>
      %c8 = arith.constant 8 : index
      %c0_56 = arith.constant 0 : index
      %c0_57 = arith.constant 0 : index
      %77 = vector.load %arg2[%c8, %c0_56, %c0_57] : memref<25x3x32xf32, #tpu.memory_space<vmem>>, vector<1x3x32xf32>
      %78 = vector.shape_cast %77 : vector<1x3x32xf32> to vector<3x32xf32>
      %cst_58 = arith.constant dense<0.000000e+00> : vector<124x32xf32>
      %79 = tpu.matmul %76, %78, %cst_58 {dimension_numbers = #tpu.dot_dimension_numbers<[1], [0], [0], [1], [0, 0, 1, 1], [], []>} : vector<124x3xf32>, vector<3x32xf32>, vector<124x32xf32> -> vector<124x32xf32>
      %80 = arith.addf %71, %79 : vector<124x32xf32>
      %c64_i32_59 = arith.constant 64 : i32
      %81 = arith.addi %2, %c64_i32_59 : i32
      %c4_i32_60 = arith.constant 4 : i32
      %82 = arith.addi %81, %c4_i32_60 : i32
      %c0_61 = arith.constant 0 : index
      %83 = arith.index_cast %82 : i32 to index
      %c0_62 = arith.constant 0 : index
      %84 = vector.load %arg1[%c0_61, %83, %c0_62] : memref<1x4096x3xf32, #tpu.memory_space<vmem>>, vector<1x124x3xf32>
      %85 = vector.shape_cast %84 : vector<1x124x3xf32> to vector<124x3xf32>
      %c9 = arith.constant 9 : index
      %c0_63 = arith.constant 0 : index
      %c0_64 = arith.constant 0 : index
      %86 = vector.load %arg2[%c9, %c0_63, %c0_64] : memref<25x3x32xf32, #tpu.memory_space<vmem>>, vector<1x3x32xf32>
      %87 = vector.shape_cast %86 : vector<1x3x32xf32> to vector<3x32xf32>
      %cst_65 = arith.constant dense<0.000000e+00> : vector<124x32xf32>
      %88 = tpu.matmul %85, %87, %cst_65 {dimension_numbers = #tpu.dot_dimension_numbers<[1], [0], [0], [1], [0, 0, 1, 1], [], []>} : vector<124x3xf32>, vector<3x32xf32>, vector<124x32xf32> -> vector<124x32xf32>
      %89 = arith.addf %80, %88 : vector<124x32xf32>
      %c128_i32 = arith.constant 128 : i32
      %90 = arith.addi %2, %c128_i32 : i32
      %c0_i32_66 = arith.constant 0 : i32
      %91 = arith.addi %90, %c0_i32_66 : i32
      %c0_67 = arith.constant 0 : index
      %92 = arith.index_cast %91 : i32 to index
      %c0_68 = arith.constant 0 : index
      %93 = vector.load %arg1[%c0_67, %92, %c0_68] : memref<1x4096x3xf32, #tpu.memory_space<vmem>>, vector<1x124x3xf32>
      %94 = vector.shape_cast %93 : vector<1x124x3xf32> to vector<124x3xf32>
      %c10 = arith.constant 10 : index
      %c0_69 = arith.constant 0 : index
      %c0_70 = arith.constant 0 : index
      %95 = vector.load %arg2[%c10, %c0_69, %c0_70] : memref<25x3x32xf32, #tpu.memory_space<vmem>>, vector<1x3x32xf32>
      %96 = vector.shape_cast %95 : vector<1x3x32xf32> to vector<3x32xf32>
      %cst_71 = arith.constant dense<0.000000e+00> : vector<124x32xf32>
      %97 = tpu.matmul %94, %96, %cst_71 {dimension_numbers = #tpu.dot_dimension_numbers<[1], [0], [0], [1], [0, 0, 1, 1], [], []>} : vector<124x3xf32>, vector<3x32xf32>, vector<124x32xf32> -> vector<124x32xf32>
      %98 = arith.addf %89, %97 : vector<124x32xf32>
      %c128_i32_72 = arith.constant 128 : i32
      %99 = arith.addi %2, %c128_i32_72 : i32
      %c1_i32_73 = arith.constant 1 : i32
      %100 = arith.addi %99, %c1_i32_73 : i32
      %c0_74 = arith.constant 0 : index
      %101 = arith.index_cast %100 : i32 to index
      %c0_75 = arith.constant 0 : index
      %102 = vector.load %arg1[%c0_74, %101, %c0_75] : memref<1x4096x3xf32, #tpu.memory_space<vmem>>, vector<1x124x3xf32>
      %103 = vector.shape_cast %102 : vector<1x124x3xf32> to vector<124x3xf32>
      %c11 = arith.constant 11 : index
      %c0_76 = arith.constant 0 : index
      %c0_77 = arith.constant 0 : index
      %104 = vector.load %arg2[%c11, %c0_76, %c0_77] : memref<25x3x32xf32, #tpu.memory_space<vmem>>, vector<1x3x32xf32>
      %105 = vector.shape_cast %104 : vector<1x3x32xf32> to vector<3x32xf32>
      %cst_78 = arith.constant dense<0.000000e+00> : vector<124x32xf32>
      %106 = tpu.matmul %103, %105, %cst_78 {dimension_numbers = #tpu.dot_dimension_numbers<[1], [0], [0], [1], [0, 0, 1, 1], [], []>} : vector<124x3xf32>, vector<3x32xf32>, vector<124x32xf32> -> vector<124x32xf32>
      %107 = arith.addf %98, %106 : vector<124x32xf32>
      %c128_i32_79 = arith.constant 128 : i32
      %108 = arith.addi %2, %c128_i32_79 : i32
      %c2_i32_80 = arith.constant 2 : i32
      %109 = arith.addi %108, %c2_i32_80 : i32
      %c0_81 = arith.constant 0 : index
      %110 = arith.index_cast %109 : i32 to index
      %c0_82 = arith.constant 0 : index
      %111 = vector.load %arg1[%c0_81, %110, %c0_82] : memref<1x4096x3xf32, #tpu.memory_space<vmem>>, vector<1x124x3xf32>
      %112 = vector.shape_cast %111 : vector<1x124x3xf32> to vector<124x3xf32>
      %c12 = arith.constant 12 : index
      %c0_83 = arith.constant 0 : index
      %c0_84 = arith.constant 0 : index
      %113 = vector.load %arg2[%c12, %c0_83, %c0_84] : memref<25x3x32xf32, #tpu.memory_space<vmem>>, vector<1x3x32xf32>
      %114 = vector.shape_cast %113 : vector<1x3x32xf32> to vector<3x32xf32>
      %cst_85 = arith.constant dense<0.000000e+00> : vector<124x32xf32>
      %115 = tpu.matmul %112, %114, %cst_85 {dimension_numbers = #tpu.dot_dimension_numbers<[1], [0], [0], [1], [0, 0, 1, 1], [], []>} : vector<124x3xf32>, vector<3x32xf32>, vector<124x32xf32> -> vector<124x32xf32>
      %116 = arith.addf %107, %115 : vector<124x32xf32>
      %c128_i32_86 = arith.constant 128 : i32
      %117 = arith.addi %2, %c128_i32_86 : i32
      %c3_i32_87 = arith.constant 3 : i32
      %118 = arith.addi %117, %c3_i32_87 : i32
      %c0_88 = arith.constant 0 : index
      %119 = arith.index_cast %118 : i32 to index
      %c0_89 = arith.constant 0 : index
      %120 = vector.load %arg1[%c0_88, %119, %c0_89] : memref<1x4096x3xf32, #tpu.memory_space<vmem>>, vector<1x124x3xf32>
      %121 = vector.shape_cast %120 : vector<1x124x3xf32> to vector<124x3xf32>
      %c13 = arith.constant 13 : index
      %c0_90 = arith.constant 0 : index
      %c0_91 = arith.constant 0 : index
      %122 = vector.load %arg2[%c13, %c0_90, %c0_91] : memref<25x3x32xf32, #tpu.memory_space<vmem>>, vector<1x3x32xf32>
      %123 = vector.shape_cast %122 : vector<1x3x32xf32> to vector<3x32xf32>
      %cst_92 = arith.constant dense<0.000000e+00> : vector<124x32xf32>
      %124 = tpu.matmul %121, %123, %cst_92 {dimension_numbers = #tpu.dot_dimension_numbers<[1], [0], [0], [1], [0, 0, 1, 1], [], []>} : vector<124x3xf32>, vector<3x32xf32>, vector<124x32xf32> -> vector<124x32xf32>
      %125 = arith.addf %116, %124 : vector<124x32xf32>
      %c128_i32_93 = arith.constant 128 : i32
      %126 = arith.addi %2, %c128_i32_93 : i32
      %c4_i32_94 = arith.constant 4 : i32
      %127 = arith.addi %126, %c4_i32_94 : i32
      %c0_95 = arith.constant 0 : index
      %128 = arith.index_cast %127 : i32 to index
      %c0_96 = arith.constant 0 : index
      %129 = vector.load %arg1[%c0_95, %128, %c0_96] : memref<1x4096x3xf32, #tpu.memory_space<vmem>>, vector<1x124x3xf32>
      %130 = vector.shape_cast %129 : vector<1x124x3xf32> to vector<124x3xf32>
      %c14 = arith.constant 14 : index
      %c0_97 = arith.constant 0 : index
      %c0_98 = arith.constant 0 : index
      %131 = vector.load %arg2[%c14, %c0_97, %c0_98] : memref<25x3x32xf32, #tpu.memory_space<vmem>>, vector<1x3x32xf32>
      %132 = vector.shape_cast %131 : vector<1x3x32xf32> to vector<3x32xf32>
      %cst_99 = arith.constant dense<0.000000e+00> : vector<124x32xf32>
      %133 = tpu.matmul %130, %132, %cst_99 {dimension_numbers = #tpu.dot_dimension_numbers<[1], [0], [0], [1], [0, 0, 1, 1], [], []>} : vector<124x3xf32>, vector<3x32xf32>, vector<124x32xf32> -> vector<124x32xf32>
      %134 = arith.addf %125, %133 : vector<124x32xf32>
      %c192_i32 = arith.constant 192 : i32
      %135 = arith.addi %2, %c192_i32 : i32
      %c0_i32_100 = arith.constant 0 : i32
      %136 = arith.addi %135, %c0_i32_100 : i32
      %c0_101 = arith.constant 0 : index
      %137 = arith.index_cast %136 : i32 to index
      %c0_102 = arith.constant 0 : index
      %138 = vector.load %arg1[%c0_101, %137, %c0_102] : memref<1x4096x3xf32, #tpu.memory_space<vmem>>, vector<1x124x3xf32>
      %139 = vector.shape_cast %138 : vector<1x124x3xf32> to vector<124x3xf32>
      %c15 = arith.constant 15 : index
      %c0_103 = arith.constant 0 : index
      %c0_104 = arith.constant 0 : index
      %140 = vector.load %arg2[%c15, %c0_103, %c0_104] : memref<25x3x32xf32, #tpu.memory_space<vmem>>, vector<1x3x32xf32>
      %141 = vector.shape_cast %140 : vector<1x3x32xf32> to vector<3x32xf32>
      %cst_105 = arith.constant dense<0.000000e+00> : vector<124x32xf32>
      %142 = tpu.matmul %139, %141, %cst_105 {dimension_numbers = #tpu.dot_dimension_numbers<[1], [0], [0], [1], [0, 0, 1, 1], [], []>} : vector<124x3xf32>, vector<3x32xf32>, vector<124x32xf32> -> vector<124x32xf32>
      %143 = arith.addf %134, %142 : vector<124x32xf32>
      %c192_i32_106 = arith.constant 192 : i32
      %144 = arith.addi %2, %c192_i32_106 : i32
      %c1_i32_107 = arith.constant 1 : i32
      %145 = arith.addi %144, %c1_i32_107 : i32
      %c0_108 = arith.constant 0 : index
      %146 = arith.index_cast %145 : i32 to index
      %c0_109 = arith.constant 0 : index
      %147 = vector.load %arg1[%c0_108, %146, %c0_109] : memref<1x4096x3xf32, #tpu.memory_space<vmem>>, vector<1x124x3xf32>
      %148 = vector.shape_cast %147 : vector<1x124x3xf32> to vector<124x3xf32>
      %c16 = arith.constant 16 : index
      %c0_110 = arith.constant 0 : index
      %c0_111 = arith.constant 0 : index
      %149 = vector.load %arg2[%c16, %c0_110, %c0_111] : memref<25x3x32xf32, #tpu.memory_space<vmem>>, vector<1x3x32xf32>
      %150 = vector.shape_cast %149 : vector<1x3x32xf32> to vector<3x32xf32>
      %cst_112 = arith.constant dense<0.000000e+00> : vector<124x32xf32>
      %151 = tpu.matmul %148, %150, %cst_112 {dimension_numbers = #tpu.dot_dimension_numbers<[1], [0], [0], [1], [0, 0, 1, 1], [], []>} : vector<124x3xf32>, vector<3x32xf32>, vector<124x32xf32> -> vector<124x32xf32>
      %152 = arith.addf %143, %151 : vector<124x32xf32>
      %c192_i32_113 = arith.constant 192 : i32
      %153 = arith.addi %2, %c192_i32_113 : i32
      %c2_i32_114 = arith.constant 2 : i32
      %154 = arith.addi %153, %c2_i32_114 : i32
      %c0_115 = arith.constant 0 : index
      %155 = arith.index_cast %154 : i32 to index
      %c0_116 = arith.constant 0 : index
      %156 = vector.load %arg1[%c0_115, %155, %c0_116] : memref<1x4096x3xf32, #tpu.memory_space<vmem>>, vector<1x124x3xf32>
      %157 = vector.shape_cast %156 : vector<1x124x3xf32> to vector<124x3xf32>
      %c17 = arith.constant 17 : index
      %c0_117 = arith.constant 0 : index
      %c0_118 = arith.constant 0 : index
      %158 = vector.load %arg2[%c17, %c0_117, %c0_118] : memref<25x3x32xf32, #tpu.memory_space<vmem>>, vector<1x3x32xf32>
      %159 = vector.shape_cast %158 : vector<1x3x32xf32> to vector<3x32xf32>
      %cst_119 = arith.constant dense<0.000000e+00> : vector<124x32xf32>
      %160 = tpu.matmul %157, %159, %cst_119 {dimension_numbers = #tpu.dot_dimension_numbers<[1], [0], [0], [1], [0, 0, 1, 1], [], []>} : vector<124x3xf32>, vector<3x32xf32>, vector<124x32xf32> -> vector<124x32xf32>
      %161 = arith.addf %152, %160 : vector<124x32xf32>
      %c192_i32_120 = arith.constant 192 : i32
      %162 = arith.addi %2, %c192_i32_120 : i32
      %c3_i32_121 = arith.constant 3 : i32
      %163 = arith.addi %162, %c3_i32_121 : i32
      %c0_122 = arith.constant 0 : index
      %164 = arith.index_cast %163 : i32 to index
      %c0_123 = arith.constant 0 : index
      %165 = vector.load %arg1[%c0_122, %164, %c0_123] : memref<1x4096x3xf32, #tpu.memory_space<vmem>>, vector<1x124x3xf32>
      %166 = vector.shape_cast %165 : vector<1x124x3xf32> to vector<124x3xf32>
      %c18 = arith.constant 18 : index
      %c0_124 = arith.constant 0 : index
      %c0_125 = arith.constant 0 : index
      %167 = vector.load %arg2[%c18, %c0_124, %c0_125] : memref<25x3x32xf32, #tpu.memory_space<vmem>>, vector<1x3x32xf32>
      %168 = vector.shape_cast %167 : vector<1x3x32xf32> to vector<3x32xf32>
      %cst_126 = arith.constant dense<0.000000e+00> : vector<124x32xf32>
      %169 = tpu.matmul %166, %168, %cst_126 {dimension_numbers = #tpu.dot_dimension_numbers<[1], [0], [0], [1], [0, 0, 1, 1], [], []>} : vector<124x3xf32>, vector<3x32xf32>, vector<124x32xf32> -> vector<124x32xf32>
      %170 = arith.addf %161, %169 : vector<124x32xf32>
      %c192_i32_127 = arith.constant 192 : i32
      %171 = arith.addi %2, %c192_i32_127 : i32
      %c4_i32_128 = arith.constant 4 : i32
      %172 = arith.addi %171, %c4_i32_128 : i32
      %c0_129 = arith.constant 0 : index
      %173 = arith.index_cast %172 : i32 to index
      %c0_130 = arith.constant 0 : index
      %174 = vector.load %arg1[%c0_129, %173, %c0_130] : memref<1x4096x3xf32, #tpu.memory_space<vmem>>, vector<1x124x3xf32>
      %175 = vector.shape_cast %174 : vector<1x124x3xf32> to vector<124x3xf32>
      %c19 = arith.constant 19 : index
      %c0_131 = arith.constant 0 : index
      %c0_132 = arith.constant 0 : index
      %176 = vector.load %arg2[%c19, %c0_131, %c0_132] : memref<25x3x32xf32, #tpu.memory_space<vmem>>, vector<1x3x32xf32>
      %177 = vector.shape_cast %176 : vector<1x3x32xf32> to vector<3x32xf32>
      %cst_133 = arith.constant dense<0.000000e+00> : vector<124x32xf32>
      %178 = tpu.matmul %175, %177, %cst_133 {dimension_numbers = #tpu.dot_dimension_numbers<[1], [0], [0], [1], [0, 0, 1, 1], [], []>} : vector<124x3xf32>, vector<3x32xf32>, vector<124x32xf32> -> vector<124x32xf32>
      %179 = arith.addf %170, %178 : vector<124x32xf32>
      %c256_i32 = arith.constant 256 : i32
      %180 = arith.addi %2, %c256_i32 : i32
      %c0_i32_134 = arith.constant 0 : i32
      %181 = arith.addi %180, %c0_i32_134 : i32
      %c0_135 = arith.constant 0 : index
      %182 = arith.index_cast %181 : i32 to index
      %c0_136 = arith.constant 0 : index
      %183 = vector.load %arg1[%c0_135, %182, %c0_136] : memref<1x4096x3xf32, #tpu.memory_space<vmem>>, vector<1x124x3xf32>
      %184 = vector.shape_cast %183 : vector<1x124x3xf32> to vector<124x3xf32>
      %c20 = arith.constant 20 : index
      %c0_137 = arith.constant 0 : index
      %c0_138 = arith.constant 0 : index
      %185 = vector.load %arg2[%c20, %c0_137, %c0_138] : memref<25x3x32xf32, #tpu.memory_space<vmem>>, vector<1x3x32xf32>
      %186 = vector.shape_cast %185 : vector<1x3x32xf32> to vector<3x32xf32>
      %cst_139 = arith.constant dense<0.000000e+00> : vector<124x32xf32>
      %187 = tpu.matmul %184, %186, %cst_139 {dimension_numbers = #tpu.dot_dimension_numbers<[1], [0], [0], [1], [0, 0, 1, 1], [], []>} : vector<124x3xf32>, vector<3x32xf32>, vector<124x32xf32> -> vector<124x32xf32>
      %188 = arith.addf %179, %187 : vector<124x32xf32>
      %c256_i32_140 = arith.constant 256 : i32
      %189 = arith.addi %2, %c256_i32_140 : i32
      %c1_i32_141 = arith.constant 1 : i32
      %190 = arith.addi %189, %c1_i32_141 : i32
      %c0_142 = arith.constant 0 : index
      %191 = arith.index_cast %190 : i32 to index
      %c0_143 = arith.constant 0 : index
      %192 = vector.load %arg1[%c0_142, %191, %c0_143] : memref<1x4096x3xf32, #tpu.memory_space<vmem>>, vector<1x124x3xf32>
      %193 = vector.shape_cast %192 : vector<1x124x3xf32> to vector<124x3xf32>
      %c21 = arith.constant 21 : index
      %c0_144 = arith.constant 0 : index
      %c0_145 = arith.constant 0 : index
      %194 = vector.load %arg2[%c21, %c0_144, %c0_145] : memref<25x3x32xf32, #tpu.memory_space<vmem>>, vector<1x3x32xf32>
      %195 = vector.shape_cast %194 : vector<1x3x32xf32> to vector<3x32xf32>
      %cst_146 = arith.constant dense<0.000000e+00> : vector<124x32xf32>
      %196 = tpu.matmul %193, %195, %cst_146 {dimension_numbers = #tpu.dot_dimension_numbers<[1], [0], [0], [1], [0, 0, 1, 1], [], []>} : vector<124x3xf32>, vector<3x32xf32>, vector<124x32xf32> -> vector<124x32xf32>
      %197 = arith.addf %188, %196 : vector<124x32xf32>
      %c256_i32_147 = arith.constant 256 : i32
      %198 = arith.addi %2, %c256_i32_147 : i32
      %c2_i32_148 = arith.constant 2 : i32
      %199 = arith.addi %198, %c2_i32_148 : i32
      %c0_149 = arith.constant 0 : index
      %200 = arith.index_cast %199 : i32 to index
      %c0_150 = arith.constant 0 : index
      %201 = vector.load %arg1[%c0_149, %200, %c0_150] : memref<1x4096x3xf32, #tpu.memory_space<vmem>>, vector<1x124x3xf32>
      %202 = vector.shape_cast %201 : vector<1x124x3xf32> to vector<124x3xf32>
      %c22 = arith.constant 22 : index
      %c0_151 = arith.constant 0 : index
      %c0_152 = arith.constant 0 : index
      %203 = vector.load %arg2[%c22, %c0_151, %c0_152] : memref<25x3x32xf32, #tpu.memory_space<vmem>>, vector<1x3x32xf32>
      %204 = vector.shape_cast %203 : vector<1x3x32xf32> to vector<3x32xf32>
      %cst_153 = arith.constant dense<0.000000e+00> : vector<124x32xf32>
      %205 = tpu.matmul %202, %204, %cst_153 {dimension_numbers = #tpu.dot_dimension_numbers<[1], [0], [0], [1], [0, 0, 1, 1], [], []>} : vector<124x3xf32>, vector<3x32xf32>, vector<124x32xf32> -> vector<124x32xf32>
      %206 = arith.addf %197, %205 : vector<124x32xf32>
      %c256_i32_154 = arith.constant 256 : i32
      %207 = arith.addi %2, %c256_i32_154 : i32
      %c3_i32_155 = arith.constant 3 : i32
      %208 = arith.addi %207, %c3_i32_155 : i32
      %c0_156 = arith.constant 0 : index
      %209 = arith.index_cast %208 : i32 to index
      %c0_157 = arith.constant 0 : index
      %210 = vector.load %arg1[%c0_156, %209, %c0_157] : memref<1x4096x3xf32, #tpu.memory_space<vmem>>, vector<1x124x3xf32>
      %211 = vector.shape_cast %210 : vector<1x124x3xf32> to vector<124x3xf32>
      %c23 = arith.constant 23 : index
      %c0_158 = arith.constant 0 : index
      %c0_159 = arith.constant 0 : index
      %212 = vector.load %arg2[%c23, %c0_158, %c0_159] : memref<25x3x32xf32, #tpu.memory_space<vmem>>, vector<1x3x32xf32>
      %213 = vector.shape_cast %212 : vector<1x3x32xf32> to vector<3x32xf32>
      %cst_160 = arith.constant dense<0.000000e+00> : vector<124x32xf32>
      %214 = tpu.matmul %211, %213, %cst_160 {dimension_numbers = #tpu.dot_dimension_numbers<[1], [0], [0], [1], [0, 0, 1, 1], [], []>} : vector<124x3xf32>, vector<3x32xf32>, vector<124x32xf32> -> vector<124x32xf32>
      %215 = arith.addf %206, %214 : vector<124x32xf32>
      %c256_i32_161 = arith.constant 256 : i32
      %216 = arith.addi %2, %c256_i32_161 : i32
      %c4_i32_162 = arith.constant 4 : i32
      %217 = arith.addi %216, %c4_i32_162 : i32
      %c0_163 = arith.constant 0 : index
      %218 = arith.index_cast %217 : i32 to index
      %c0_164 = arith.constant 0 : index
      %219 = vector.load %arg1[%c0_163, %218, %c0_164] : memref<1x4096x3xf32, #tpu.memory_space<vmem>>, vector<1x124x3xf32>
      %220 = vector.shape_cast %219 : vector<1x124x3xf32> to vector<124x3xf32>
      %c24 = arith.constant 24 : index
      %c0_165 = arith.constant 0 : index
      %c0_166 = arith.constant 0 : index
      %221 = vector.load %arg2[%c24, %c0_165, %c0_166] : memref<25x3x32xf32, #tpu.memory_space<vmem>>, vector<1x3x32xf32>
      %222 = vector.shape_cast %221 : vector<1x3x32xf32> to vector<3x32xf32>
      %cst_167 = arith.constant dense<0.000000e+00> : vector<124x32xf32>
      %223 = tpu.matmul %220, %222, %cst_167 {dimension_numbers = #tpu.dot_dimension_numbers<[1], [0], [0], [1], [0, 0, 1, 1], [], []>} : vector<124x3xf32>, vector<3x32xf32>, vector<124x32xf32> -> vector<124x32xf32>
      %224 = arith.addf %215, %223 : vector<124x32xf32>
      %c0_168 = arith.constant 0 : index
      %c0_169 = arith.constant 0 : index
      %225 = vector.load %arg5[%c0_168, %c0_169] : memref<124x32xf32, #tpu.memory_space<vmem>>, vector<124x32xf32>
      tpu.vector_store %arg5[%c0_168, %c0_169], %224 {strides = array<i32>} : memref<124x32xf32, #tpu.memory_space<vmem>>, vector<124x32xf32>,
      %c0_170 = arith.constant 0 : index
      %c0_171 = arith.constant 0 : index
      %226 = tpu.strided_load %arg5[%c0_170, %c0_171] {strides = array<i32: 2, 1>} : memref<124x32xf32, #tpu.memory_space<vmem>>, vector<30x32xf32>
      %c1_172 = arith.constant 1 : index
      %c0_173 = arith.constant 0 : index
      %227 = tpu.strided_load %arg5[%c1_172, %c0_173] {strides = array<i32: 2, 1>} : memref<124x32xf32, #tpu.memory_space<vmem>>, vector<30x32xf32>
      %c64 = arith.constant 64 : index
      %c0_174 = arith.constant 0 : index
      %228 = tpu.strided_load %arg5[%c64, %c0_174] {strides = array<i32: 2, 1>} : memref<124x32xf32, #tpu.memory_space<vmem>>, vector<30x32xf32>
      %c65 = arith.constant 65 : index
      %c0_175 = arith.constant 0 : index
      %229 = tpu.strided_load %arg5[%c65, %c0_175] {strides = array<i32: 2, 1>} : memref<124x32xf32, #tpu.memory_space<vmem>>, vector<30x32xf32>
      %230 = arith.maximumf %226, %227 : vector<30x32xf32>
      %231 = arith.maximumf %228, %229 : vector<30x32xf32>
      %232 = arith.maximumf %230, %231 : vector<30x32xf32>
      %c0_176 = arith.constant 0 : index
      %c0_177 = arith.constant 0 : index
      %233 = vector.load %arg3[%c0_176, %c0_177] : memref<1x32xf32, #tpu.memory_space<vmem>>, vector<1x32xf32>
      %234 = vector.broadcast %233 : vector<1x32xf32> to vector<30x32xf32>
      %235 = arith.addf %232, %234 : vector<30x32xf32>
      %cst_178 = arith.constant 0.000000e+00 : f32
      %236 = vector.broadcast %cst_178 : f32 to vector<30x32xf32>
      %237 = arith.maximumf %235, %236 : vector<30x32xf32>
      %c30_i32_179 = arith.constant 30 : i32
      %238 = arith.muli %arg6, %c30_i32_179 : i32
      %c0_180 = arith.constant 0 : index
      %239 = arith.index_cast %238 : i32 to index
      %c0_181 = arith.constant 0 : index
      %240 = vector.load %arg4[%c0_180, %239, %c0_181] : memref<1x900x32xf32, #tpu.memory_space<vmem>>, vector<1x30x32xf32>
      %241 = vector.shape_cast %240 : vector<1x30x32xf32> to vector<30x32xf32>
      %242 = vector.shape_cast %237 : vector<30x32xf32> to vector<1x30x32xf32>
      tpu.vector_store %arg4[%c0_180, %239, %c0_181], %242 {strides = array<i32>} : memref<1x900x32xf32, #tpu.memory_space<vmem>>, vector<1x30x32xf32>,
    }
    %c30_i32_0 = arith.constant 30 : i32
    return
  }
  func.func @transform_0(%arg0: i32) -> (i32, i32, i32) {
    %c0_i32 = arith.constant 0 : i32
    %c0_i32_0 = arith.constant 0 : i32
    %c0_i32_1 = arith.constant 0 : i32
    return %arg0, %c0_i32, %c0_i32_0 : i32, i32, i32
  }
  func.func @transform_1(%arg0: i32) -> (i32, i32, i32) {
    %c0_i32 = arith.constant 0 : i32
    %c0_i32_0 = arith.constant 0 : i32
    %c0_i32_1 = arith.constant 0 : i32
    %c0_i32_2 = arith.constant 0 : i32
    return %c0_i32, %c0_i32_0, %c0_i32_1 : i32, i32, i32
  }
  func.func @transform_2(%arg0: i32) -> (i32, i32) {
    %c0_i32 = arith.constant 0 : i32
    %c0_i32_0 = arith.constant 0 : i32
    %c0_i32_1 = arith.constant 0 : i32
    return %c0_i32, %c0_i32_0 : i32, i32
  }
  func.func @transform_3(%arg0: i32) -> (i32, i32, i32) {
    %c0_i32 = arith.constant 0 : i32
    %c0_i32_0 = arith.constant 0 : i32
    %c0_i32_1 = arith.constant 0 : i32
    return %arg0, %c0_i32, %c0_i32_0 : i32, i32, i32
  }
}

</mosaic_0001>

<bundles_post_ra>
// kernel: tpu_custom_call.1
= control target key start
LH: loop header
LB: loop body
LE: loop exit
PB: predicated region body
PF: predicated region fallthrough
CT: control target
= control target key end

     0   :  { %s8165_s12 = smov 0   ;;  %s10113_s0 = inlined_call_operand.vmem [shape: f32[2,4096,3], index: 0, kind: input, shape index: {}]   ;;  %s10114_s1 = inlined_call_operand.vmem [shape: f32[25,3,32], index: 1, kind: input, shape index: {}]   ;;  %s10115_s2 = inlined_call_operand.vmem [shape: f32[1,32], index: 2, kind: input, shape index: {}]   ;;  %s10116_s3 = inlined_call_operand.vmem [shape: f32[2,900,32], index: 3, kind: output, shape index: {}]  }
   0x1 LB: > { %s6165_s13 = sadd.s32 4294967295, %s8139_s12   ;;  %p6169_p0 = scmp.ge.s32.totalorder %s8139_s12, 1  ;;  %s8139_s12 = sphi %s8165_s12, %s13_s12  }
   0x2   : > { %p137_p1 = scmp.lt.s32.totalorder %s8139_s12, 3 }
   0x4   : > { %p138_p2 = pnand %p6169_p0, %p137_p1 }
   0x5   : > { %p161_p3 = scmp.lt.s32.totalorder (!%p138_p2), %s6165_s13, 1  ;;  %s8183_s22 = smov (!%p138_p2), 0  }
   0x6   : > { %141 = sbr.rel (%p138_p2) target bundleno = 632 (0x278), region = 32 }
   0xb   : > { %s10164_s13 = smov (!%p161_p3, %s6165_s13), 1 }
   0xc   : > { %s7034_s14 = sshll.u32 %s10164_s13, 12  ;;  %s8112_s15 = smul.u32 904, %s10164_s13 }
   0xd   : > { %s8176_s18 = scalar_lea.vmem %s10113_s0, %s7034_s14 }
   0xe   : > { %s8181_s21 = scalar_lea.vmem %s10116_s3, %s8112_s15 }
   0xf LB: >> { %v6191_v0 = vld [vmem:[%s10114_s1 + $0x4] sm:$0x7]  ;;  %vm265_vm0 = vcmask 1042432   ;;  %v195_v1 = vld [vmem:[%s10114_s1] sm:$0x7]  ;;  %s6173_s29 = sshll.u32 %s8143_s22, 7  ;;  %s8143_s22 = sphi %s8183_s22, %s176_s22  }
  0x10   : >> { %8110 = vmatprep.subr.msk.mxu1 %vm265_vm0, %v6191_v0  ;;  %7460 = vmatprep.subr.msk.mxu0 %vm265_vm0, %v6191_v0  ;;  %v6243_v2 = vld [vmem:[%s10114_s1 + $0x8] sm:$0x7]  ;;  %vm216_vm1 = vcmask 23552   ;;  %s8203_s30 = scalar_lea.vmem %s8176_s18, %s6173_s29  ;;  %v6278_v9 = vld [vmem:[%s10114_s1 + $0xc] sm:$0x7]  ;;  %vm5946_vm2 = vcmask 261120  }
  0x11   : >> { %8111 = vmatpush3.msk.msra.mxu1 %vm265_vm0, %v6191_v0  ;;  %7461 = vmatpush3.msk.msra.mxu0 %vm265_vm0, %v6191_v0  ;;  %v6175_v3 = vld [vmem:[%s8203_s30 + $0x1] sm:$0xff]  ;;  %v6176_v5 = vld [vmem:[%s8203_s30 + $0x9] sm:$0xff]  ;;  %v6177_v7 = vld [vmem:[%s8203_s30 + $0x11] sm:$0xff]  ;;  %vm5962_vm3 = vcmask 257024   ;;  %s6022_s5 = smul.u32 30, %s8143_s22  ;;  %vm6027_vm4 = vcmask 259072  }
  0x12   : >> { %7486 = vmatprep.subr.msk.mxu1 %vm265_vm0, %v195_v1  ;;  %7512 = vmatprep.subr.msk.mxu0 %vm265_vm0, %v6243_v2  ;;  %v8209_v4 = vld [vmem:[%s8203_s30 + $0x41] sm:$0xff]  ;;  %v8216_v6 = vld [vmem:[%s8203_s30 + $0x49] sm:$0xff]  ;;  %v8220_v8 = vld [vmem:[%s8203_s30 + $0x51] sm:$0xff]  ;;  %s176_s22 = sadd.s32 1, %s8143_s22  }
  0x13   : >> { %7462 = vmatprep.mubr.msk.f32.mxu0 %vm216_vm1, %v6175_v3  ;;  %7474 = vmatprep.mubr.msk.f32.mxu1 %vm216_vm1, %v8209_v4  ;;  %v6313_v10 = vld [vmem:[%s10114_s1 + $0x10] sm:$0x7]  ;;  %v6178_v11 = vld [vmem:[%s8203_s30 + $0x19] sm:$0xff]  ;;  %v6179_v13 = vld [vmem:[%s8203_s30 + $0x21] sm:$0xff]  ;;  %s6023_s6 = scalar_lea.vmem %s8181_s21, %s6022_s5  ;;  %p173_p4 = scmp.ge.s32.totalorder %s176_s22, 30  }
  0x14   : >> { %7463 = vmatmul.mubr.msk.f32.vlgmr.msra.gmra.mxu0 %vm216_vm1, %v6176_v5  ;;  %7475 = vmatmul.mubr.msk.f32.vlgmr.msra.gmra.mxu1 %vm216_vm1, %v8216_v6  ;;  %v8235_v12 = vld [vmem:[%s8203_s30 + $0x59] sm:$0xff]  ;;  %v8242_v14 = vld [vmem:[%s8203_s30 + $0x61] sm:$0xff]  ;;  %v6180_v15 = vld [vmem:[%s8203_s30 + $0x29] sm:$0xff] }
  0x15   : >> { %7487 = vmatpush3.msk.msra.mxu1 %vm265_vm0, %v195_v1  ;;  %7513 = vmatpush3.msk.msra.mxu0 %vm265_vm0, %v6243_v2  ;;  %v8254_v16 = vld [vmem:[%s8203_s30 + $0x69] sm:$0xff]  ;;  %v6181_v17 = vld [vmem:[%s8203_s30 + $0x31] sm:$0xff]  ;;  %v6182_v19 = vld [vmem:[%s8203_s30 + $0x39] sm:$0xff] }
  0x16   : >> { %7465 = vmatprep.mubr.msk.f32.mxu0 %vm216_vm1, %v6177_v7  ;;  %7477 = vmatprep.mubr.msk.f32.mxu1 %vm216_vm1, %v8220_v8  ;;  %v8258_v18 = vld [vmem:[%s8203_s30 + $0x71] sm:$0xff]  ;;  %v6190_v20 = vld [vmem:[%s8203_s30 + $0x79] sm:$0xf]  ;;  %v179_v21 = vld [vmem:[%s8203_s30] sm:$0xff] }
  0x17   : >> { %7538 = vmatprep.subr.msk.mxu1 %vm265_vm0, %v6278_v9  ;;  %7564 = vmatprep.subr.msk.mxu0 %vm265_vm0, %v6313_v10  ;;  %v6227_v22 = vld [vmem:[%s8203_s30 + $0x2] sm:$0xff]  ;;  %v6228_v24 = vld [vmem:[%s8203_s30 + $0xa] sm:$0xff]  ;;  %v6229_v26 = vld [vmem:[%s8203_s30 + $0x12] sm:$0xff] }
  0x18   : >> { %7466 = vmatmul.mubr.msk.f32.gmra.mxu0 %vm216_vm1, %v6178_v11  ;;  %7478 = vmatmul.mubr.msk.f32.gmra.mxu1 %vm216_vm1, %v8235_v12  ;;  %v180_v23 = vld [vmem:[%s8203_s30 + $0x8] sm:$0xff]  ;;  %v181_v25 = vld [vmem:[%s8203_s30 + $0x10] sm:$0xff]  ;;  %v8288_v28 = vld [vmem:[%s10114_s1 + $0x18] sm:$0x7] }
  0x19   : >> { %7468 = vmatprep.mubr.msk.f32.mxu0 %vm216_vm1, %v6179_v13  ;;  %7480 = vmatprep.mubr.msk.f32.mxu1 %vm216_vm1, %v8242_v14  ;;  %v8283_v27 = vld [vmem:[%s10114_s1 + $0x14] sm:$0x7]  ;;  %v182_v29 = vld [vmem:[%s8203_s30 + $0x18] sm:$0xff]  ;;  %v183_v31 = vld [vmem:[%s8203_s30 + $0x20] sm:$0xff] }
  0x1a   : >> { %v6230_v30 = vld [vmem:[%s8203_s30 + $0x1a] sm:$0xff]  ;;  %v6231_v32 = vld [vmem:[%s8203_s30 + $0x22] sm:$0xff]  ;;  %v6232_v34 = vld [vmem:[%s8203_s30 + $0x2a] sm:$0xff] }
  0x1b   : >> { %v184_v33 = vld [vmem:[%s8203_s30 + $0x28] sm:$0xff]  ;;  %v185_v35 = vld [vmem:[%s8203_s30 + $0x30] sm:$0xff]  ;;  %v186_v37 = vld [vmem:[%s8203_s30 + $0x38] sm:$0xff] }
  0x1c   : >> { %7469 = vmatmul.mubr.msk.f32.gmra.mxu0 %vm216_vm1, %v6180_v15  ;;  %7481 = vmatmul.mubr.msk.f32.gmra.mxu1 %vm216_vm1, %v8254_v16  ;;  %v6233_v36 = vld [vmem:[%s8203_s30 + $0x32] sm:$0xff]  ;;  %v6234_v38 = vld [vmem:[%s8203_s30 + $0x3a] sm:$0xff]  ;;  %v8320_v40 = vld [vmem:[%s8203_s30 + $0x42] sm:$0xff] }
  0x1d   : >> { %7471 = vmatprep.mubr.msk.f32.mxu0 %vm216_vm1, %v6181_v17  ;;  %7483 = vmatprep.mubr.msk.f32.mxu1 %vm216_vm1, %v8258_v18  ;;  %v8317_v39 = vld [vmem:[%s8203_s30 + $0x40] sm:$0xff]  ;;  %v8329_v41 = vld [vmem:[%s8203_s30 + $0x48] sm:$0xff]  ;;  %v8335_v43 = vld [vmem:[%s8203_s30 + $0x50] sm:$0xff] }
  0x1e   : >> { %v8332_v42 = vld [vmem:[%s8203_s30 + $0x4a] sm:$0xff]  ;;  %v8338_v44 = vld [vmem:[%s8203_s30 + $0x52] sm:$0xff]  ;;  %v8352_v46 = vld [vmem:[%s8203_s30 + $0x5a] sm:$0xff] }
  0x1f   : >> { %v8349_v45 = vld [vmem:[%s8203_s30 + $0x58] sm:$0xff]  ;;  %v8355_v47 = vld [vmem:[%s8203_s30 + $0x60] sm:$0xff]  ;;  %v8369_v49 = vld [vmem:[%s8203_s30 + $0x68] sm:$0xff] }
  0x20   : >> { %7472 = vmatmul.mubr.msk.f32.gmra.mxu0 %vm216_vm1, %v6182_v19  ;;  %7484 = vmatmul.mubr.msk.f32.gmra.mxu1 %vm216_vm1, %v6190_v20  ;;  %v8358_v48 = vld [vmem:[%s8203_s30 + $0x62] sm:$0xff]  ;;  %v8372_v50 = vld [vmem:[%s8203_s30 + $0x6a] sm:$0xff]  ;;  %v8378_v52 = vld [vmem:[%s8203_s30 + $0x72] sm:$0xff] }
  0x21   : >> { %7488 = vmatprep.mubr.msk.f32.mxu1 %vm216_vm1, %v179_v21  ;;  %7514 = vmatprep.mubr.msk.f32.mxu0 %vm216_vm1, %v6227_v22  ;;  %v8375_v51 = vld [vmem:[%s8203_s30 + $0x70] sm:$0xff]  ;;  %v194_v53 = vld [vmem:[%s8203_s30 + $0x78] sm:$0xf]  ;;  %v6262_v55 = vld [vmem:[%s8203_s30 + $0x3] sm:$0xff] }
  0x22   : >> { %v6242_v54 = vld [vmem:[%s8203_s30 + $0x7a] sm:$0xf]  ;;  %v6297_v56 = vld [vmem:[%s8203_s30 + $0x4] sm:$0xff]  ;;  %v6298_v58 = vld [vmem:[%s8203_s30 + $0xc] sm:$0xff] }
  0x23   : >> { %v6263_v57 = vld [vmem:[%s8203_s30 + $0xb] sm:$0xff]  ;;  %v6264_v59 = vld [vmem:[%s8203_s30 + $0x13] sm:$0xff]  ;;  %v8405_v61 = vld [vmem:[%s10114_s1 + $0x1c] sm:$0x7] }
  0x24   : >> { %7489 = vmatmul.mubr.msk.f32.vlgmr.msra.gmra.mxu1 %vm216_vm1, %v180_v23  ;;  %7515 = vmatmul.mubr.msk.f32.vlgmr.msra.gmra.mxu0 %vm216_vm1, %v6228_v24  ;;  %v6299_v60 = vld [vmem:[%s8203_s30 + $0x14] sm:$0xff]  ;;  %v8410_v62 = vld [vmem:[%s10114_s1 + $0x20] sm:$0x7]  ;;  %v6266_v1 = vld [vmem:[%s8203_s30 + $0x23] sm:$0xff] }
  0x25   : >> { %7539 = vmatpush3.msk.msra.mxu1 %vm265_vm0, %v6278_v9  ;;  %7565 = vmatpush3.msk.msra.mxu0 %vm265_vm0, %v6313_v10  ;;  %v6265_v63 = vld [vmem:[%s8203_s30 + $0x1b] sm:$0xff]  ;;  %v6301_v2 = vld [vmem:[%s8203_s30 + $0x24] sm:$0xff]  ;;  %v6302_v5 = vld [vmem:[%s8203_s30 + $0x2c] sm:$0xff] }
  0x26   : >> { %7491 = vmatprep.mubr.msk.f32.mxu1 %vm216_vm1, %v181_v25  ;;  %7517 = vmatprep.mubr.msk.f32.mxu0 %vm216_vm1, %v6229_v26  ;;  %v6300_v0 = vld [vmem:[%s8203_s30 + $0x1c] sm:$0xff]  ;;  %v6267_v3 = vld [vmem:[%s8203_s30 + $0x2b] sm:$0xff]  ;;  %v6268_v7 = vld [vmem:[%s8203_s30 + $0x33] sm:$0xff] }
  0x27   : >> { %7590 = vmatprep.subr.msk.mxu1 %vm265_vm0, %v8283_v27  ;;  %7616 = vmatprep.subr.msk.mxu0 %vm265_vm0, %v8288_v28  ;;  %v6303_v9 = vld [vmem:[%s8203_s30 + $0x34] sm:$0xff]  ;;  %v6304_v11 = vld [vmem:[%s8203_s30 + $0x3c] sm:$0xff]  ;;  %v8444_v15 = vld [vmem:[%s8203_s30 + $0x44] sm:$0xff] }
  0x28   : >> { %7492 = vmatmul.mubr.msk.f32.gmra.mxu1 %vm216_vm1, %v182_v29  ;;  %7518 = vmatmul.mubr.msk.f32.gmra.mxu0 %vm216_vm1, %v6230_v30  ;;  %v6269_v10 = vld [vmem:[%s8203_s30 + $0x3b] sm:$0xff]  ;;  %v8441_v13 = vld [vmem:[%s8203_s30 + $0x43] sm:$0xff]  ;;  %v8453_v17 = vld [vmem:[%s8203_s30 + $0x4b] sm:$0xff] }
  0x29   : >> { %7494 = vmatprep.mubr.msk.f32.mxu1 %vm216_vm1, %v183_v31  ;;  %7520 = vmatprep.mubr.msk.f32.mxu0 %vm216_vm1, %v6231_v32  ;;  %v8456_v19 = vld [vmem:[%s8203_s30 + $0x4c] sm:$0xff]  ;;  %v8462_v21 = vld [vmem:[%s8203_s30 + $0x54] sm:$0xff]  ;;  %v8476_v23 = vld [vmem:[%s8203_s30 + $0x5c] sm:$0xff] }
  0x2a   : >> { %v8459_v20 = vld [vmem:[%s8203_s30 + $0x53] sm:$0xff]  ;;  %v8473_v22 = vld [vmem:[%s8203_s30 + $0x5b] sm:$0xff]  ;;  %v8479_v24 = vld [vmem:[%s8203_s30 + $0x63] sm:$0xff] }
  0x2b   : >> { %v8482_v25 = vld [vmem:[%s8203_s30 + $0x64] sm:$0xff]  ;;  %v8502_v29 = vld [vmem:[%s8203_s30 + $0x74] sm:$0xff]  ;;  %v6312_v31 = vld [vmem:[%s8203_s30 + $0x7c] sm:$0xf] }
  0x2c   : >> { %7495 = vmatmul.mubr.msk.f32.gmra.mxu1 %vm216_vm1, %v184_v33  ;;  %7521 = vmatmul.mubr.msk.f32.gmra.mxu0 %vm216_vm1, %v6232_v34  ;;  %v8493_v26 = vld [vmem:[%s8203_s30 + $0x6b] sm:$0xff]  ;;  %v6277_v30 = vld [vmem:[%s8203_s30 + $0x7b] sm:$0xf]  ;;  %v6488_v32 = vld [vmem:[%s10114_s1 + $0x24] sm:$0x7] }
  0x2d   : >> { %7497 = vmatprep.mubr.msk.f32.mxu1 %vm216_vm1, %v185_v35  ;;  %7523 = vmatprep.mubr.msk.f32.mxu0 %vm216_vm1, %v6233_v36  ;;  %v6523_v33 = vld [vmem:[%s10114_s1 + $0x28] sm:$0x7]  ;;  %v8580_v34 = vld [vmem:[%s8203_s30 + $0x91] sm:$0xff]  ;;  %v8594_v36 = vld [vmem:[%s8203_s30 + $0x99] sm:$0xff] }
  0x2e   : >> { %v8591_v35 = vld [vmem:[%s8203_s30 + $0x98] sm:$0xff] }
  0x30   : >> { %7498 = vmatmul.mubr.msk.f32.gmra.mxu1 %vm216_vm1, %v186_v37  ;;  %7524 = vmatmul.mubr.msk.f32.gmra.mxu0 %vm216_vm1, %v6234_v38  ;;  %v8597_v37 = vld [vmem:[%s8203_s30 + $0xa0] sm:$0xff] }
  0x31   : >> { %7500 = vmatprep.mubr.msk.f32.mxu1 %vm216_vm1, %v8317_v39  ;;  %7526 = vmatprep.mubr.msk.f32.mxu0 %vm216_vm1, %v8320_v40  ;;  %v8600_v38 = vld [vmem:[%s8203_s30 + $0xa1] sm:$0xff] }
  0x34   : >> { %7501 = vmatmul.mubr.msk.f32.gmra.mxu1 %vm216_vm1, %v8329_v41  ;;  %7527 = vmatmul.mubr.msk.f32.gmra.mxu0 %vm216_vm1, %v8332_v42 }
  0x35   : >> { %7503 = vmatprep.mubr.msk.f32.mxu1 %vm216_vm1, %v8335_v43  ;;  %7529 = vmatprep.mubr.msk.f32.mxu0 %vm216_vm1, %v8338_v44 }
  0x38   : >> { %7504 = vmatmul.mubr.msk.f32.gmra.mxu1 %vm216_vm1, %v8349_v45  ;;  %7530 = vmatmul.mubr.msk.f32.gmra.mxu0 %vm216_vm1, %v8352_v46 }
  0x39   : >> { %7506 = vmatprep.mubr.msk.f32.mxu1 %vm216_vm1, %v8355_v47  ;;  %7532 = vmatprep.mubr.msk.f32.mxu0 %vm216_vm1, %v8358_v48 }
  0x3c   : >> { %7507 = vmatmul.mubr.msk.f32.gmra.mxu1 %vm216_vm1, %v8369_v49  ;;  %7533 = vmatmul.mubr.msk.f32.gmra.mxu0 %vm216_vm1, %v8372_v50 }
  0x3d   : >> { %7509 = vmatprep.mubr.msk.f32.mxu1 %vm216_vm1, %v8375_v51  ;;  %7535 = vmatprep.mubr.msk.f32.mxu0 %vm216_vm1, %v8378_v52 }
  0x40   : >> { %7510 = vmatmul.mubr.msk.f32.gmra.mxu1 %vm216_vm1, %v194_v53  ;;  %7536 = vmatmul.mubr.msk.f32.gmra.mxu0 %vm216_vm1, %v6242_v54  ;;  %v6593_v53 = vld [vmem:[%s10114_s1 + $0x30] sm:$0x7]  ;;  %v8696_v54 = vld [vmem:[%s8203_s30 + $0x93] sm:$0xff] }
  0x41   : >> { %7540 = vmatprep.mubr.msk.f32.mxu1 %vm216_vm1, %v6262_v55  ;;  %7566 = vmatprep.mubr.msk.f32.mxu0 %vm216_vm1, %v6297_v56  ;;  %v8707_v55 = vld [vmem:[%s8203_s30 + $0x9a] sm:$0xff] }
  0x42   : >> { %v8710_v56 = vld [vmem:[%s8203_s30 + $0x9b] sm:$0xff] }
  0x44   : >> { %7541 = vmatmul.mubr.msk.f32.vlgmr.msra.gmra.mxu1 %vm216_vm1, %v6263_v57  ;;  %7567 = vmatmul.mubr.msk.f32.vlgmr.msra.gmra.mxu0 %vm216_vm1, %v6298_v58  ;;  %v8713_v57 = vld [vmem:[%s8203_s30 + $0xa2] sm:$0xff] }
  0x45   : >> { %7591 = vmatpush3.msk.msra.mxu1 %vm265_vm0, %v8283_v27  ;;  %7617 = vmatpush3.msk.msra.mxu0 %vm265_vm0, %v8288_v28  ;;  %v8496_v27 = vld [vmem:[%s8203_s30 + $0x6c] sm:$0xff]  ;;  %v8716_v58 = vld [vmem:[%s8203_s30 + $0xa3] sm:$0xff] }
  0x46   : >> { %7543 = vmatprep.mubr.msk.f32.mxu1 %vm216_vm1, %v6264_v59  ;;  %7569 = vmatprep.mubr.msk.f32.mxu0 %vm216_vm1, %v6299_v60  ;;  %v8499_v28 = vld [vmem:[%s8203_s30 + $0x73] sm:$0xff]  ;;  %v8727_v59 = vld [vmem:[%s8203_s30 + $0xaa] sm:$0xff] }
  0x47   : >> { %7642 = vmatprep.subr.msk.mxu1 %vm265_vm0, %v8405_v61  ;;  %7668 = vmatprep.subr.msk.mxu0 %vm265_vm0, %v8410_v62  ;;  %v8730_v60 = vld [vmem:[%s8203_s30 + $0xab] sm:$0xff] }
  0x48   : >> { %7544 = vmatmul.mubr.msk.f32.gmra.mxu1 %vm216_vm1, %v6265_v63  ;;  %7570 = vmatmul.mubr.msk.f32.gmra.mxu0 %vm216_vm1, %v6300_v0  ;;  %v6417_v63 = vld [vmem:[%s8203_s30 + $0xba] sm:$0xf] }
  0x49   : >> { %7546 = vmatprep.mubr.msk.f32.mxu1 %vm216_vm1, %v6266_v1  ;;  %7572 = vmatprep.mubr.msk.f32.mxu0 %vm216_vm1, %v6301_v2  ;;  %v6452_v0 = vld [vmem:[%s8203_s30 + $0xbb] sm:$0xf]  ;;  %v6628_v1 = vld [vmem:[%s10114_s1 + $0x34] sm:$0x7]  ;;  %v6663_v2 = vld [vmem:[%s10114_s1 + $0x38] sm:$0x7] }
  0x4c   : >> { %7547 = vmatmul.mubr.msk.f32.gmra.mxu1 %vm216_vm1, %v6267_v3  ;;  %7573 = vmatmul.mubr.msk.f32.gmra.mxu0 %vm216_vm1, %v6302_v5  ;;  %v6479_v3 = vld [vmem:[%s8203_s30 + $0x7c] sm:$0xff] }
  0x4d   : >> { %7549 = vmatprep.mubr.msk.f32.mxu1 %vm216_vm1, %v6268_v7  ;;  %7575 = vmatprep.mubr.msk.f32.mxu0 %vm216_vm1, %v6303_v9  ;;  %v6514_v5 = vld [vmem:[%s8203_s30 + $0xb8] sm:$0xff]  ;;  %v8791_v7 = vld [vmem:[%s8203_s30 + $0x84] sm:$0xff] }
  0x4e   : >> { %v8794_v9 = vld [vmem:[%s8203_s30 + $0xc0] sm:$0xff] }
  0x50   : >> { %7550 = vmatmul.mubr.msk.f32.gmra.mxu1 %vm216_vm1, %v6269_v10  ;;  %7576 = vmatmul.mubr.msk.f32.gmra.mxu0 %vm216_vm1, %v6304_v11  ;;  %v8803_v10 = vld [vmem:[%s8203_s30 + $0x8c] sm:$0xff] }
  0x51   : >> { %7552 = vmatprep.mubr.msk.f32.mxu1 %vm216_vm1, %v8441_v13  ;;  %7578 = vmatprep.mubr.msk.f32.mxu0 %vm216_vm1, %v8444_v15  ;;  %v8806_v11 = vld [vmem:[%s8203_s30 + $0xc8] sm:$0xff] }
  0x54   : >> { %7553 = vmatmul.mubr.msk.f32.gmra.mxu1 %vm216_vm1, %v8453_v17  ;;  %7579 = vmatmul.mubr.msk.f32.gmra.mxu0 %vm216_vm1, %v8456_v19 }
  0x55   : >> { %7555 = vmatprep.mubr.msk.f32.mxu1 %vm216_vm1, %v8459_v20  ;;  %7581 = vmatprep.mubr.msk.f32.mxu0 %vm216_vm1, %v8462_v21 }
  0x58   : >> { %7556 = vmatmul.mubr.msk.f32.gmra.mxu1 %vm216_vm1, %v8473_v22  ;;  %7582 = vmatmul.mubr.msk.f32.gmra.mxu0 %vm216_vm1, %v8476_v23 }
  0x59   : >> { %7558 = vmatprep.mubr.msk.f32.mxu1 %vm216_vm1, %v8479_v24  ;;  %7584 = vmatprep.mubr.msk.f32.mxu0 %vm216_vm1, %v8482_v25 }
  0x5c   : >> { %7559 = vmatmul.mubr.msk.f32.gmra.mxu1 %vm216_vm1, %v8493_v26  ;;  %7585 = vmatmul.mubr.msk.f32.gmra.mxu0 %vm216_vm1, %v8496_v27 }
  0x5d   : >> { %7561 = vmatprep.mubr.msk.f32.mxu1 %vm216_vm1, %v8499_v28  ;;  %7587 = vmatprep.mubr.msk.f32.mxu0 %vm216_vm1, %v8502_v29 }
  0x60   : >> { %7562 = vmatmul.mubr.msk.f32.gmra.mxu1 %vm216_vm1, %v6277_v30  ;;  %7588 = vmatmul.mubr.msk.f32.gmra.mxu0 %vm216_vm1, %v6312_v31  ;;  %v6549_v30 = vld [vmem:[%s8203_s30 + $0xb9] sm:$0xff] }
  0x61   : >> { %7592 = vmatprep.mubr.msk.f32.mxu1 %vm216_vm1, %v8317_v39  ;;  %7618 = vmatprep.mubr.msk.f32.mxu0 %vm216_vm1, %v8209_v4  ;;  %v6339_v4 = vld [vmem:[%s8203_s30 + $0x78] sm:$0xff]  ;;  %v8611_v39 = vld [vmem:[%s8203_s30 + $0xa8] sm:$0xff] }
  0x62   : >> { %v6584_v31 = vld [vmem:[%s8203_s30 + $0xba] sm:$0xff] }
  0x64   : >> { %7593 = vmatmul.mubr.msk.f32.vlgmr.msra.gmra.mxu1 %vm216_vm1, %v8329_v41  ;;  %7619 = vmatmul.mubr.msk.f32.vlgmr.msra.gmra.mxu0 %vm216_vm1, %v8216_v6  ;;  %v6374_v6 = vld [vmem:[%s8203_s30 + $0x79] sm:$0xff]  ;;  %v8614_v41 = vld [vmem:[%s8203_s30 + $0xa9] sm:$0xff] }
  0x65   : >> { %7643 = vmatpush3.msk.msra.mxu1 %vm265_vm0, %v8405_v61  ;;  %7669 = vmatpush3.msk.msra.mxu0 %vm265_vm0, %v8410_v62  ;;  %v8733_v61 = vld [vmem:[%s8203_s30 + $0xb2] sm:$0xff] }
  0x66   : >> { %7595 = vmatprep.mubr.msk.f32.mxu1 %vm216_vm1, %v8335_v43  ;;  %7621 = vmatprep.mubr.msk.f32.mxu0 %vm216_vm1, %v8220_v8  ;;  %v8559_v8 = vld [vmem:[%s8203_s30 + $0x80] sm:$0xff]  ;;  %v8617_v43 = vld [vmem:[%s8203_s30 + $0xb0] sm:$0xff] }
  0x67   : >> { %7694 = vmatprep.subr.msk.mxu1 %vm265_vm0, %v6488_v32  ;;  %7720 = vmatprep.subr.msk.mxu0 %vm265_vm0, %v6523_v33  ;;  %v8736_v62 = vld [vmem:[%s8203_s30 + $0xb3] sm:$0xff] }
  0x68   : >> { %7596 = vmatmul.mubr.msk.f32.gmra.mxu1 %vm216_vm1, %v8349_v45  ;;  %7622 = vmatmul.mubr.msk.f32.gmra.mxu0 %vm216_vm1, %v8235_v12  ;;  %v8562_v12 = vld [vmem:[%s8203_s30 + $0x81] sm:$0xff]  ;;  %v8620_v45 = vld [vmem:[%s8203_s30 + $0xb1] sm:$0xff] }
  0x69   : >> { %7598 = vmatprep.mubr.msk.f32.mxu1 %vm216_vm1, %v8355_v47  ;;  %7624 = vmatprep.mubr.msk.f32.mxu0 %vm216_vm1, %v8242_v14  ;;  %v8571_v14 = vld [vmem:[%s8203_s30 + $0x88] sm:$0xff]  ;;  %v6347_v47 = vld [vmem:[%s8203_s30 + $0xb8] sm:$0xf] }
  0x6c   : >> { %7599 = vmatmul.mubr.msk.f32.gmra.mxu1 %vm216_vm1, %v8369_v49  ;;  %7625 = vmatmul.mubr.msk.f32.gmra.mxu0 %vm216_vm1, %v8254_v16  ;;  %v8574_v16 = vld [vmem:[%s8203_s30 + $0x89] sm:$0xff]  ;;  %v6382_v49 = vld [vmem:[%s8203_s30 + $0xb9] sm:$0xf] }
  0x6d   : >> { %7601 = vmatprep.mubr.msk.f32.mxu1 %vm216_vm1, %v8375_v51  ;;  %7627 = vmatprep.mubr.msk.f32.mxu0 %vm216_vm1, %v8258_v18  ;;  %v8577_v18 = vld [vmem:[%s8203_s30 + $0x90] sm:$0xff]  ;;  %v6558_v51 = vld [vmem:[%s10114_s1 + $0x2c] sm:$0x7] }
  0x70   : >> { %7602 = vmatmul.mubr.msk.f32.gmra.mxu1 %vm216_vm1, %v6339_v4  ;;  %7628 = vmatmul.mubr.msk.f32.gmra.mxu0 %vm216_vm1, %v6374_v6  ;;  %v8925_v4 = vld [vmem:[%s8203_s30 + $0xc9] sm:$0xff] }
  0x71   : >> { %7604 = vmatprep.mubr.msk.f32.mxu1 %vm216_vm1, %v8559_v8  ;;  %7630 = vmatprep.mubr.msk.f32.mxu0 %vm216_vm1, %v8562_v12  ;;  %v8928_v6 = vld [vmem:[%s8203_s30 + $0xca] sm:$0xff] }
  0x74   : >> { %7605 = vmatmul.mubr.msk.f32.gmra.mxu1 %vm216_vm1, %v8571_v14  ;;  %7631 = vmatmul.mubr.msk.f32.gmra.mxu0 %vm216_vm1, %v8574_v16 }
  0x75   : >> { %7607 = vmatprep.mubr.msk.f32.mxu1 %vm216_vm1, %v8577_v18  ;;  %7633 = vmatprep.mubr.msk.f32.mxu0 %vm216_vm1, %v8580_v34 }
  0x78   : >> { %7608 = vmatmul.mubr.msk.f32.gmra.mxu1 %vm216_vm1, %v8591_v35  ;;  %7634 = vmatmul.mubr.msk.f32.gmra.mxu0 %vm216_vm1, %v8594_v36 }
  0x79   : >> { %7610 = vmatprep.mubr.msk.f32.mxu1 %vm216_vm1, %v8597_v37  ;;  %7636 = vmatprep.mubr.msk.f32.mxu0 %vm216_vm1, %v8600_v38 }
  0x7c   : >> { %7611 = vmatmul.mubr.msk.f32.gmra.mxu1 %vm216_vm1, %v8611_v39  ;;  %7637 = vmatmul.mubr.msk.f32.gmra.mxu0 %vm216_vm1, %v8614_v41 }
  0x7d   : >> { %7613 = vmatprep.mubr.msk.f32.mxu1 %vm216_vm1, %v8617_v43  ;;  %7639 = vmatprep.mubr.msk.f32.mxu0 %vm216_vm1, %v8620_v45 }
  0x80   : >> { %7614 = vmatmul.mubr.msk.f32.gmra.mxu1 %vm216_vm1, %v6347_v47  ;;  %7640 = vmatmul.mubr.msk.f32.gmra.mxu0 %vm216_vm1, %v6382_v49 }
  0x81   : >> { %7644 = vmatprep.mubr.msk.f32.mxu1 %vm216_vm1, %v8320_v40  ;;  %7670 = vmatprep.mubr.msk.f32.mxu0 %vm216_vm1, %v8441_v13  ;;  %v6409_v40 = vld [vmem:[%s8203_s30 + $0x7a] sm:$0xff] }
  0x82   : >> { %v8809_v13 = vld [vmem:[%s8203_s30 + $0x94] sm:$0xff] }
  0x84   : >> { %7645 = vmatmul.mubr.msk.f32.vlgmr.msra.gmra.mxu1 %vm216_vm1, %v8332_v42  ;;  %7671 = vmatmul.mubr.msk.f32.vlgmr.msra.gmra.mxu0 %vm216_vm1, %v8453_v17  ;;  %v6444_v42 = vld [vmem:[%s8203_s30 + $0x7b] sm:$0xff] }
  0x85   : >> { %7695 = vmatpush3.msk.msra.mxu1 %vm265_vm0, %v6488_v32  ;;  %7721 = vmatpush3.msk.msra.mxu0 %vm265_vm0, %v6523_v33  ;;  %v8823_v17 = vld [vmem:[%s8203_s30 + $0x9c] sm:$0xff] }
  0x86   : >> { %7647 = vmatprep.mubr.msk.f32.mxu1 %vm216_vm1, %v8338_v44  ;;  %7673 = vmatprep.mubr.msk.f32.mxu0 %vm216_vm1, %v8459_v20  ;;  %v8675_v44 = vld [vmem:[%s8203_s30 + $0x82] sm:$0xff] }
  0x87   : >> { %7746 = vmatprep.subr.msk.mxu1 %vm265_vm0, %v6558_v51  ;;  %7772 = vmatprep.subr.msk.mxu0 %vm265_vm0, %v6593_v53  ;;  %v8829_v20 = vld [vmem:[%s8203_s30 + $0xa4] sm:$0xff] }
  0x88   : >> { %7648 = vmatmul.mubr.msk.f32.gmra.mxu1 %vm216_vm1, %v8352_v46  ;;  %7674 = vmatmul.mubr.msk.f32.gmra.mxu0 %vm216_vm1, %v8473_v22  ;;  %v8678_v46 = vld [vmem:[%s8203_s30 + $0x83] sm:$0xff]  ;;  %v8843_v22 = vld [vmem:[%s8203_s30 + $0xac] sm:$0xff] }
  0x89   : >> { %7650 = vmatprep.mubr.msk.f32.mxu1 %vm216_vm1, %v8358_v48  ;;  %7676 = vmatprep.mubr.msk.f32.mxu0 %vm216_vm1, %v8479_v24  ;;  %v8687_v48 = vld [vmem:[%s8203_s30 + $0x8a] sm:$0xff]  ;;  %v8849_v24 = vld [vmem:[%s8203_s30 + $0xb4] sm:$0xff]  ;;  %v8913_v32 = vld [vmem:[%s8203_s30 + $0xc1] sm:$0xff] }
  0x8a   : >> { %v8916_v33 = vld [vmem:[%s8203_s30 + $0xc2] sm:$0xff] }
  0x8c   : >> { %7651 = vmatmul.mubr.msk.f32.gmra.mxu1 %vm216_vm1, %v8372_v50  ;;  %7677 = vmatmul.mubr.msk.f32.gmra.mxu0 %vm216_vm1, %v8493_v26  ;;  %v8690_v50 = vld [vmem:[%s8203_s30 + $0x8b] sm:$0xff]  ;;  %v6487_v26 = vld [vmem:[%s8203_s30 + $0xbc] sm:$0xf] }
  0x8d   : >> { %7653 = vmatprep.mubr.msk.f32.mxu1 %vm216_vm1, %v8378_v52  ;;  %7679 = vmatprep.mubr.msk.f32.mxu0 %vm216_vm1, %v8499_v28  ;;  %v8693_v52 = vld [vmem:[%s8203_s30 + $0x92] sm:$0xff]  ;;  %v8877_v28 = vld [vmem:[%s10114_s1 + $0x3c] sm:$0x7] }
  0x90   : >> { %7654 = vmatmul.mubr.msk.f32.gmra.mxu1 %vm216_vm1, %v6409_v40  ;;  %7680 = vmatmul.mubr.msk.f32.gmra.mxu0 %vm216_vm1, %v6444_v42 }
  0x91   : >> { %7656 = vmatprep.mubr.msk.f32.mxu1 %vm216_vm1, %v8675_v44  ;;  %7682 = vmatprep.mubr.msk.f32.mxu0 %vm216_vm1, %v8678_v46 }
  0x94   : >> { %7657 = vmatmul.mubr.msk.f32.gmra.mxu1 %vm216_vm1, %v8687_v48  ;;  %7683 = vmatmul.mubr.msk.f32.gmra.mxu0 %vm216_vm1, %v8690_v50 }
  0x95   : >> { %7659 = vmatprep.mubr.msk.f32.mxu1 %vm216_vm1, %v8693_v52  ;;  %7685 = vmatprep.mubr.msk.f32.mxu0 %vm216_vm1, %v8696_v54 }
  0x98   : >> { %7660 = vmatmul.mubr.msk.f32.gmra.mxu1 %vm216_vm1, %v8707_v55  ;;  %7686 = vmatmul.mubr.msk.f32.gmra.mxu0 %vm216_vm1, %v8710_v56 }
  0x99   : >> { %7662 = vmatprep.mubr.msk.f32.mxu1 %vm216_vm1, %v8713_v57  ;;  %7688 = vmatprep.mubr.msk.f32.mxu0 %vm216_vm1, %v8716_v58 }
  0x9c   : >> { %7663 = vmatmul.mubr.msk.f32.gmra.mxu1 %vm216_vm1, %v8727_v59  ;;  %7689 = vmatmul.mubr.msk.f32.gmra.mxu0 %vm216_vm1, %v8730_v60 }
  0x9d   : >> { %7665 = vmatprep.mubr.msk.f32.mxu1 %vm216_vm1, %v8733_v61  ;;  %7691 = vmatprep.mubr.msk.f32.mxu0 %vm216_vm1, %v8736_v62 }
  0xa0   : >> { %7666 = vmatmul.mubr.msk.f32.gmra.mxu1 %vm216_vm1, %v6417_v63  ;;  %7692 = vmatmul.mubr.msk.f32.gmra.mxu0 %vm216_vm1, %v6452_v0 }
  0xa1   : >> { %7696 = vmatprep.mubr.msk.f32.mxu1 %vm216_vm1, %v8444_v15  ;;  %7722 = vmatprep.mubr.msk.f32.mxu0 %vm216_vm1, %v8559_v8  ;;  %v8812_v15 = vld [vmem:[%s8203_s30 + $0xd0] sm:$0xff] }
  0xa2   : >> { %v8931_v8 = vld [vmem:[%s8203_s30 + $0xd1] sm:$0xff] }
  0xa4   : >> { %7697 = vmatmul.mubr.msk.f32.vlgmr.msra.gmra.mxu1 %vm216_vm1, %v8456_v19  ;;  %7723 = vmatmul.mubr.msk.f32.vlgmr.msra.gmra.mxu0 %vm216_vm1, %v8571_v14  ;;  %v8826_v19 = vld [vmem:[%s8203_s30 + $0xd8] sm:$0xff] }
  0xa5   : >> { %7747 = vmatpush3.msk.msra.mxu1 %vm265_vm0, %v6558_v51  ;;  %7773 = vmatpush3.msk.msra.mxu0 %vm265_vm0, %v6593_v53  ;;  %v8979_v51 = vld [vmem:[%s8203_s30 + $0xf1] sm:$0xff] }
  0xa6   : >> { %7699 = vmatprep.mubr.msk.f32.mxu1 %vm216_vm1, %v8462_v21  ;;  %7725 = vmatprep.mubr.msk.f32.mxu0 %vm216_vm1, %v8577_v18  ;;  %v8832_v21 = vld [vmem:[%s8203_s30 + $0xe0] sm:$0xff]  ;;  %v8982_v53 = vld [vmem:[%s8203_s30 + $0xf2] sm:$0xff] }
  0xa7   : >> { %7798 = vmatprep.subr.msk.mxu1 %vm265_vm0, %v6628_v1  ;;  %7824 = vmatprep.subr.msk.mxu0 %vm265_vm0, %v6663_v2  ;;  %v8947_v18 = vld [vmem:[%s8203_s30 + $0xd9] sm:$0xff] }
  0xa8   : >> { %7700 = vmatmul.mubr.msk.f32.gmra.mxu1 %vm216_vm1, %v8476_v23  ;;  %7726 = vmatmul.mubr.msk.f32.gmra.mxu0 %vm216_vm1, %v8591_v35  ;;  %v8846_v23 = vld [vmem:[%s8203_s30 + $0xe8] sm:$0xff] }
  0xa9   : >> { %7702 = vmatprep.mubr.msk.f32.mxu1 %vm216_vm1, %v8482_v25  ;;  %7728 = vmatprep.mubr.msk.f32.mxu0 %vm216_vm1, %v8597_v37  ;;  %v8852_v25 = vld [vmem:[%s8203_s30 + $0xf0] sm:$0xff]  ;;  %v8955_v37 = vld [vmem:[%s8203_s30 + $0xe1] sm:$0xff] }
  0xac   : >> { %7703 = vmatmul.mubr.msk.f32.gmra.mxu1 %vm216_vm1, %v8496_v27  ;;  %7729 = vmatmul.mubr.msk.f32.gmra.mxu0 %vm216_vm1, %v8611_v39  ;;  %v6522_v27 = vld [vmem:[%s8203_s30 + $0xf8] sm:$0xf] }
  0xad   : >> { %7705 = vmatprep.mubr.msk.f32.mxu1 %vm216_vm1, %v8502_v29  ;;  %7731 = vmatprep.mubr.msk.f32.mxu0 %vm216_vm1, %v8617_v43  ;;  %v8882_v29 = vld [vmem:[%s10114_s1 + $0x40] sm:$0x7]  ;;  %v8971_v43 = vld [vmem:[%s8203_s30 + $0xe9] sm:$0xff] }
  0xb0   : >> { %7706 = vmatmul.mubr.msk.f32.gmra.mxu1 %vm216_vm1, %v6479_v3  ;;  %7732 = vmatmul.mubr.msk.f32.gmra.mxu0 %vm216_vm1, %v6514_v5 }
  0xb1   : >> { %7708 = vmatprep.mubr.msk.f32.mxu1 %vm216_vm1, %v8791_v7  ;;  %7734 = vmatprep.mubr.msk.f32.mxu0 %vm216_vm1, %v8794_v9 }
  0xb4   : >> { %7709 = vmatmul.mubr.msk.f32.gmra.mxu1 %vm216_vm1, %v8803_v10  ;;  %7735 = vmatmul.mubr.msk.f32.gmra.mxu0 %vm216_vm1, %v8806_v11 }
  0xb5   : >> { %7711 = vmatprep.mubr.msk.f32.mxu1 %vm216_vm1, %v8809_v13  ;;  %7737 = vmatprep.mubr.msk.f32.mxu0 %vm216_vm1, %v8812_v15 }
  0xb8   : >> { %7712 = vmatmul.mubr.msk.f32.gmra.mxu1 %vm216_vm1, %v8823_v17  ;;  %7738 = vmatmul.mubr.msk.f32.gmra.mxu0 %vm216_vm1, %v8826_v19 }
  0xb9   : >> { %7714 = vmatprep.mubr.msk.f32.mxu1 %vm216_vm1, %v8829_v20  ;;  %7740 = vmatprep.mubr.msk.f32.mxu0 %vm216_vm1, %v8832_v21 }
  0xbc   : >> { %7715 = vmatmul.mubr.msk.f32.gmra.mxu1 %vm216_vm1, %v8843_v22  ;;  %7741 = vmatmul.mubr.msk.f32.gmra.mxu0 %vm216_vm1, %v8846_v23 }
  0xbd   : >> { %7717 = vmatprep.mubr.msk.f32.mxu1 %vm216_vm1, %v8849_v24  ;;  %7743 = vmatprep.mubr.msk.f32.mxu0 %vm216_vm1, %v8852_v25 }
  0xc0   : >> { %7718 = vmatmul.mubr.msk.f32.gmra.mxu1 %vm216_vm1, %v6487_v26  ;;  %7744 = vmatmul.mubr.msk.f32.gmra.mxu0 %vm216_vm1, %v6522_v27 }
  0xc1   : >> { %7748 = vmatprep.mubr.msk.f32.mxu1 %vm216_vm1, %v8562_v12  ;;  %7774 = vmatprep.mubr.msk.f32.mxu0 %vm216_vm1, %v8675_v44  ;;  %v8934_v12 = vld [vmem:[%s8203_s30 + $0xd2] sm:$0xff] }
  0xc2   : >> { %v6557_v44 = vld [vmem:[%s8203_s30 + $0xf9] sm:$0xf] }
  0xc4   : >> { %7749 = vmatmul.mubr.msk.f32.vlgmr.msra.gmra.mxu1 %vm216_vm1, %v8574_v16  ;;  %7775 = vmatmul.mubr.msk.f32.vlgmr.msra.gmra.mxu0 %vm216_vm1, %v8687_v48  ;;  %v6592_v48 = vld [vmem:[%s8203_s30 + $0xfa] sm:$0xf] }
  0xc5   : >> { %7799 = vmatpush3.msk.msra.mxu1 %vm265_vm0, %v6628_v1  ;;  %7825 = vmatpush3.msk.msra.mxu0 %vm265_vm0, %v6663_v2  ;;  %v9015_v2 = vld [vmem:[%s10114_s1 + $0x44] sm:$0x7] }
  0xc6   : >> { %7751 = vmatprep.mubr.msk.f32.mxu1 %vm216_vm1, %v8580_v34  ;;  %7777 = vmatprep.mubr.msk.f32.mxu0 %vm216_vm1, %v8693_v52  ;;  %v8950_v34 = vld [vmem:[%s8203_s30 + $0xda] sm:$0xff] }
  0xc7   : >> { %7850 = vmatprep.subr.msk.mxu1 %vm265_vm0, %v8877_v28  ;;  %7876 = vmatprep.subr.msk.mxu0 %vm265_vm0, %v8882_v29 }
  0xc8   : >> { %7752 = vmatmul.mubr.msk.f32.gmra.mxu1 %vm216_vm1, %v8594_v36  ;;  %7778 = vmatmul.mubr.msk.f32.gmra.mxu0 %vm216_vm1, %v8707_v55 }
  0xc9   : >> { %7754 = vmatprep.mubr.msk.f32.mxu1 %vm216_vm1, %v8600_v38  ;;  %7780 = vmatprep.mubr.msk.f32.mxu0 %vm216_vm1, %v8713_v57  ;;  %v8958_v38 = vld [vmem:[%s8203_s30 + $0xe2] sm:$0xff] }
  0xcc   : >> { %7755 = vmatmul.mubr.msk.f32.gmra.mxu1 %vm216_vm1, %v8614_v41  ;;  %7781 = vmatmul.mubr.msk.f32.gmra.mxu0 %vm216_vm1, %v8727_v59 }
  0xcd   : >> { %7757 = vmatprep.mubr.msk.f32.mxu1 %vm216_vm1, %v8620_v45  ;;  %7783 = vmatprep.mubr.msk.f32.mxu0 %vm216_vm1, %v8733_v61  ;;  %v8974_v45 = vld [vmem:[%s8203_s30 + $0xea] sm:$0xff] }
  0xd0   : >> { %7758 = vmatmul.mubr.msk.f32.gmra.mxu1 %vm216_vm1, %v6549_v30  ;;  %7784 = vmatmul.mubr.msk.f32.gmra.mxu0 %vm216_vm1, %v6584_v31 }
  0xd1   : >> { %7760 = vmatprep.mubr.msk.f32.mxu1 %vm216_vm1, %v8913_v32  ;;  %7786 = vmatprep.mubr.msk.f32.mxu0 %vm216_vm1, %v8916_v33 }
  0xd4   : >> { %v7464_v14 = vpop.f32.mrf.mxu0  ;;  %v8936_v16 = vpop.f32.mrf.mxu1  ;;  %7761 = vmatmul.mubr.msk.f32.gmra.mxu1 %vm216_vm1, %v8925_v4  ;;  %7787 = vmatmul.mubr.msk.f32.gmra.mxu0 %vm216_vm1, %v8928_v6 }
  0xd5   : >> { %7763 = vmatprep.mubr.msk.f32.mxu1 %vm216_vm1, %v8931_v8  ;;  %7789 = vmatprep.mubr.msk.f32.mxu0 %vm216_vm1, %v8934_v12 }
  0xd6   : >> { %v335_v35 = vpop.f32.mrf.mxu0  ;;  %v8952_v36 = vpop.f32.mrf.mxu1 }
  0xd8   : >> { %v7467_v39 = vpop.f32.mrf.mxu0  ;;  %v8960_v41 = vpop.f32.mrf.mxu1  ;;  %7764 = vmatmul.mubr.msk.f32.gmra.mxu1 %vm216_vm1, %v8947_v18  ;;  %7790 = vmatmul.mubr.msk.f32.gmra.mxu0 %vm216_vm1, %v8950_v34 }
  0xd9   : >> { %7766 = vmatprep.mubr.msk.f32.mxu1 %vm216_vm1, %v8955_v37  ;;  %7792 = vmatprep.mubr.msk.f32.mxu0 %vm216_vm1, %v8958_v38 }
  0xda   : >> { %v345_v47 = vpop.f32.mrf.mxu0  ;;  %v8976_v49 = vpop.f32.mrf.mxu1 }
  0xdc   : >> { %v7470_v40 = vpop.f32.mrf.mxu0  ;;  %v8984_v42 = vpop.f32.mrf.mxu1  ;;  %7767 = vmatmul.mubr.msk.f32.gmra.mxu1 %vm216_vm1, %v8971_v43  ;;  %7793 = vmatmul.mubr.msk.f32.gmra.mxu0 %vm216_vm1, %v8974_v45 }
  0xdd   : >> { %7769 = vmatprep.mubr.msk.f32.mxu1 %vm216_vm1, %v8979_v51  ;;  %7795 = vmatprep.mubr.msk.f32.mxu0 %vm216_vm1, %v8982_v53 }
  0xde   : >> { %v355_v52 = vpop.f32.mrf.mxu0  ;;  %v8996_v55 = vpop.f32.mrf.mxu1 }
  0xe0   : >> { %v7473_v57 = vpop.f32.mrf.mxu0  ;;  %v8998_v59 = vpop.f32.mrf.mxu1  ;;  %7770 = vmatmul.mubr.msk.f32.gmra.mxu1 %vm216_vm1, %v6557_v44  ;;  %7796 = vmatmul.mubr.msk.f32.gmra.mxu0 %vm216_vm1, %v6592_v48  ;;  %v9061_v44 = vld [vmem:[%s8203_s30 + $0xc3] sm:$0xff] }
  0xe1   : >> { %7800 = vmatprep.mubr.msk.f32.mxu1 %vm216_vm1, %v8678_v46  ;;  %7826 = vmatprep.mubr.msk.f32.mxu0 %vm216_vm1, %v8791_v7  ;;  %v9020_v46 = vld [vmem:[%s10114_s1 + $0x48] sm:$0x7] }
  0xe2   : >> { %v365_v61 = vpop.f32.mrf.mxu0  ;;  %v9006_v63 = vpop.f32.mrf.mxu1 }
  0xe4   : >> { %v7490_v0 = vpop.f32.mrf.mxu1  ;;  %v7516_v1 = vpop.f32.mrf.mxu0  ;;  %7801 = vmatmul.mubr.msk.f32.vlgmr.msra.gmra.mxu1 %vm216_vm1, %v8690_v50  ;;  %7827 = vmatmul.mubr.msk.f32.vlgmr.msra.gmra.mxu0 %vm216_vm1, %v8803_v10 }
  0xe5   : >> { %v537_v3 = vadd.f32 %v7490_v0, %v7464_v14  ;;  %7851 = vmatpush3.msk.msra.mxu1 %vm265_vm0, %v8877_v28  ;;  %7877 = vmatpush3.msk.msra.mxu0 %vm265_vm0, %v8882_v29 }
  0xe6   : >> { %v531_v50 = vpop.f32.mrf.mxu1  ;;  %v747_v5 = vpop.f32.mrf.mxu0  ;;  %7803 = vmatprep.mubr.msk.f32.mxu1 %vm216_vm1, %v8696_v54  ;;  %7829 = vmatprep.mubr.msk.f32.mxu0 %vm216_vm1, %v8809_v13 }
  0xe7   : >> { %v9030_v7 = vadd.f32 %v7516_v1, %v537_v3  ;;  %v532_v10 = vadd.f32 %v531_v50, %v335_v35  ;;  %7902 = vmatprep.subr.msk.mxu1 %vm265_vm0, %v9015_v2  ;;  %7928 = vmatprep.subr.msk.mxu0 %vm265_vm0, %v9020_v46  ;;  %v6654_v35 = vld [vmem:[%s8203_s30 + $0xbc] sm:$0xff]  ;;  %v9077_v1 = vld [vmem:[%s8203_s30 + $0xcb] sm:$0xff] }
  0xe8   : >> { %v7493_v26 = vpop.f32.mrf.mxu1  ;;  %v7519_v27 = vpop.f32.mrf.mxu0  ;;  %7804 = vmatmul.mubr.msk.f32.gmra.mxu1 %vm216_vm1, %v8710_v56  ;;  %7830 = vmatmul.mubr.msk.f32.gmra.mxu0 %vm216_vm1, %v8823_v17  ;;  %v9080_v3 = vld [vmem:[%s8203_s30 + $0xcc] sm:$0xff] }
  0xe9   : >> { %v9040_v54 = vadd.f32 %v747_v5, %v532_v10  ;;  %v547_v13 = vadd.f32 %v7493_v26, %v7467_v39  ;;  %7806 = vmatprep.mubr.msk.f32.mxu1 %vm216_vm1, %v8716_v58  ;;  %7832 = vmatprep.mubr.msk.f32.mxu0 %vm216_vm1, %v8829_v20  ;;  %v6619_v20 = vld [vmem:[%s8203_s30 + $0xbb] sm:$0xff]  ;;  %v9083_v5 = vld [vmem:[%s8203_s30 + $0xd3] sm:$0xff] }
  0xea   : >> { %v541_v28 = vpop.f32.mrf.mxu1  ;;  %v757_v29 = vpop.f32.mrf.mxu0  ;;  %v9086_v10 = vld [vmem:[%s8203_s30 + $0xd4] sm:$0xff] }
  0xeb   : >> { %v9046_v30 = vadd.f32 %v7519_v27, %v547_v13  ;;  %v542_v56 = vadd.f32 %v541_v28, %v345_v47 }
  0xec   : >> { %v7496_v31 = vpop.f32.mrf.mxu1  ;;  %v7522_v17 = vpop.f32.mrf.mxu0  ;;  %7807 = vmatmul.mubr.msk.f32.gmra.mxu1 %vm216_vm1, %v8730_v60  ;;  %7833 = vmatmul.mubr.msk.f32.gmra.mxu0 %vm216_vm1, %v8843_v22  ;;  %v9064_v60 = vld [vmem:[%s8203_s30 + $0xc4] sm:$0xff] }
  0xed   : >> { %v9052_v14 = vadd.f32 %v757_v29, %v542_v56  ;;  %v557_v58 = vadd.f32 %v7496_v31, %v7470_v40  ;;  %7809 = vmatprep.mubr.msk.f32.mxu1 %vm216_vm1, %v8736_v62  ;;  %7835 = vmatprep.mubr.msk.f32.mxu0 %vm216_vm1, %v8849_v24  ;;  %v9102_v56 = vld [vmem:[%s8203_s30 + $0xdb] sm:$0xff] }
  0xee   : >> { %v551_v39 = vpop.f32.mrf.mxu1  ;;  %v767_v47 = vpop.f32.mrf.mxu0 }
  0xef   : >> { %v9066_v22 = vadd.f32 %v7522_v17, %v557_v58  ;;  %v552_v40 = vadd.f32 %v551_v39, %v355_v52  ;;  %v9108_v58 = vld [vmem:[%s8203_s30 + $0xe3] sm:$0xff] }
  0xf0   : >> { %v7499_v48 = vpop.f32.mrf.mxu1  ;;  %v7525_v62 = vpop.f32.mrf.mxu0  ;;  %7810 = vmatmul.mubr.msk.f32.gmra.mxu1 %vm216_vm1, %v6619_v20  ;;  %7836 = vmatmul.mubr.msk.f32.gmra.mxu0 %vm216_vm1, %v6654_v35  ;;  %v9111_v20 = vld [vmem:[%s8203_s30 + $0xe4] sm:$0xff] }
  0xf1   : >> { %v9070_v24 = vadd.f32 %v767_v47, %v552_v40  ;;  %v567_v0 = vadd.f32 %v7499_v48, %v7473_v57  ;;  %7812 = vmatprep.mubr.msk.f32.mxu1 %vm216_vm1, %v9061_v44  ;;  %7838 = vmatprep.mubr.msk.f32.mxu0 %vm216_vm1, %v9064_v60  ;;  %10119 = vst [vmem:[#allocation3_spill] sm:$0xff] %v9111_v20 }
  0xf2   : >> { %v561_v52 = vpop.f32.mrf.mxu1  ;;  %v777_v50 = vpop.f32.mrf.mxu0 }
  0xf3   : >> { %v9088_v57 = vadd.f32 %v7525_v62, %v567_v0  ;;  %v562_v26 = vadd.f32 %v561_v52, %v365_v61  ;;  %v9105_v61 = vld [vmem:[%s8203_s30 + $0xdc] sm:$0xff]  ;;  %v9128_v62 = vld [vmem:[%s8203_s30 + $0xeb] sm:$0xff] }
  0xf4   : >> { %v7502_v27 = vpop.f32.mrf.mxu1  ;;  %v7528_v13 = vpop.f32.mrf.mxu0  ;;  %7813 = vmatmul.mubr.msk.f32.gmra.mxu1 %vm216_vm1, %v9077_v1  ;;  %7839 = vmatmul.mubr.msk.f32.gmra.mxu0 %vm216_vm1, %v9080_v3 }
  0xf5   : >> { %v9094_v28 = vadd.f32 %v777_v50, %v562_v26  ;;  %v577_v29 = vadd.f32 %v7502_v27, %v8936_v16  ;;  %7815 = vmatprep.mubr.msk.f32.mxu1 %vm216_vm1, %v9083_v5  ;;  %7841 = vmatprep.mubr.msk.f32.mxu0 %vm216_vm1, %v9086_v10  ;;  %v9134_v50 = vld [vmem:[%s8203_s30 + $0xf3] sm:$0xff] }
  0xf6   : >> { %v571_v31 = vpop.f32.mrf.mxu1  ;;  %v787_v17 = vpop.f32.mrf.mxu0  ;;  %v9137_v26 = vld [vmem:[%s8203_s30 + $0xf4] sm:$0xff] }
  0xf7   : >> { %v9113_v16 = vadd.f32 %v7528_v13, %v577_v29  ;;  %v572_v35 = vadd.f32 %v571_v31, %v8952_v36  ;;  %v9131_v36 = vld [vmem:[%s8203_s30 + $0xec] sm:$0xff] }
  0xf8   : >> { %v7505_v39 = vpop.f32.mrf.mxu1  ;;  %v7531_v47 = vpop.f32.mrf.mxu0  ;;  %7816 = vmatmul.mubr.msk.f32.gmra.mxu1 %vm216_vm1, %v9102_v56  ;;  %7842 = vmatmul.mubr.msk.f32.gmra.mxu0 %vm216_vm1, %v9105_v61  ;;  %10120 = vst [vmem:[#allocation4_spill] sm:$0xff] %v9131_v36 }
  0xf9   : >> { %v9120_v40 = vadd.f32 %v787_v17, %v572_v35  ;;  %v587_v48 = vadd.f32 %v7505_v39, %v8960_v41  ;;  %7818 = vmatprep.mubr.msk.f32.mxu1 %vm216_vm1, %v9108_v58  ;;  %7844 = vmatprep.mubr.msk.f32.mxu0 %vm216_vm1, %v9111_v20  ;;  %v6627_v35 = vld [vmem:[%s8203_s30 + $0xfb] sm:$0xf] }
  0xfa   : >> { %v581_v0 = vpop.f32.mrf.mxu1  ;;  %v797_v52 = vpop.f32.mrf.mxu0 }
  0xfb   : >> { %v9139_v27 = vadd.f32 %v7531_v47, %v587_v48  ;;  %v582_v41 = vadd.f32 %v581_v0, %v8976_v49  ;;  %v6662_v49 = vld [vmem:[%s8203_s30 + $0xfc] sm:$0xf] }
  0xfc   : >> { %v7508_v13 = vpop.f32.mrf.mxu1  ;;  %v7534_v29 = vpop.f32.mrf.mxu0  ;;  %7819 = vmatmul.mubr.msk.f32.gmra.mxu1 %vm216_vm1, %v9128_v62  ;;  %7845 = vmatmul.mubr.msk.f32.gmra.mxu0 %vm216_vm1, %v9131_v36 }
  0xfd   : >> { %v9146_v31 = vadd.f32 %v797_v52, %v582_v41  ;;  %v597_v17 = vadd.f32 %v7508_v13, %v8984_v42  ;;  %7821 = vmatprep.mubr.msk.f32.mxu1 %vm216_vm1, %v9134_v50  ;;  %7847 = vmatprep.mubr.msk.f32.mxu0 %vm216_vm1, %v9137_v26 }
  0xfe   : >> { %v591_v39 = vpop.f32.mrf.mxu1  ;;  %v807_v47 = vpop.f32.mrf.mxu0 }
  0xff   : >> { %v9155_v48 = vadd.f32 %v7534_v29, %v597_v17  ;;  %v592_v0 = vadd.f32 %v591_v39, %v8996_v55 }
 0x100   : >> { %v7511_v20 = vpop.f32.mrf.mxu1  ;;  %v7537_v36 = vpop.f32.mrf.mxu0  ;;  %7822 = vmatmul.mubr.msk.f32.gmra.mxu1 %vm216_vm1, %v6627_v35  ;;  %7848 = vmatmul.mubr.msk.f32.gmra.mxu0 %vm216_vm1, %v6662_v49 }
 0x101   : >> { %v9160_v42 = vadd.f32 %v807_v47, %v592_v0  ;;  %v607_v52 = vadd.f32 %v7511_v20, %v8998_v59  ;;  %7852 = vmatprep.mubr.msk.f32.mxu1 %vm216_vm1, %v8794_v9  ;;  %7878 = vmatprep.mubr.msk.f32.mxu0 %vm216_vm1, %v8913_v32  ;;  %v9177_v9 = vld [vmem:[%s10114_s1 + $0x4c] sm:$0x7]  ;;  %v9182_v32 = vld [vmem:[%s10114_s1 + $0x50] sm:$0x7] }
 0x102   : >> { %v601_v41 = vpop.f32.mrf.mxu1  ;;  %v817_v13 = vpop.f32.mrf.mxu0 }
 0x103   : >> { %v9167_v29 = vadd.f32 %v7537_v36, %v607_v52  ;;  %v602_v55 = vadd.f32 %v601_v41, %v9006_v63 }
 0x104   : >> { %v7542_v17 = vpop.f32.mrf.mxu1  ;;  %v7568_v35 = vpop.f32.mrf.mxu0  ;;  %7853 = vmatmul.mubr.msk.f32.vlgmr.msra.gmra.mxu1 %vm216_vm1, %v8806_v11  ;;  %7879 = vmatmul.mubr.msk.f32.vlgmr.msra.gmra.mxu0 %vm216_vm1, %v8925_v4 }
 0x105   : >> { %v9184_v59 = vadd.f32 %v817_v13, %v602_v55  ;;  %v1059_v63 = vadd.f32 %v7542_v17, %v9030_v7  ;;  %7903 = vmatpush3.msk.msra.mxu1 %vm265_vm0, %v9015_v2  ;;  %7929 = vmatpush3.msk.msra.mxu0 %vm265_vm0, %v9020_v46  ;;  %v9248_v55 = vld [vmem:[%s8203_s30 + $0x108] sm:$0xff] }
 0x106   : >> { %v979_v11 = vpop.f32.mrf.mxu1  ;;  %v1211_v4 = vpop.f32.mrf.mxu0  ;;  %7855 = vmatprep.mubr.msk.f32.mxu1 %vm216_vm1, %v8812_v15  ;;  %7881 = vmatprep.mubr.msk.f32.mxu0 %vm216_vm1, %v8931_v8 }
 0x107   : >> { %v9195_v20 = vadd.f32 %v7568_v35, %v1059_v63  ;;  %v1058_v36 = vadd.f32 %v979_v11, %v9040_v54  ;;  %7954 = vmatprep.subr.msk.mxu1 %vm265_vm0, %v9177_v9  ;;  %7980 = vmatprep.subr.msk.mxu0 %vm265_vm0, %v9182_v32  ;;  %v9254_v63 = vld [vmem:[%s8203_s30 + $0x110] sm:$0xff] }
 0x108   : >> { %v7545_v2 = vpop.f32.mrf.mxu1  ;;  %v7571_v46 = vpop.f32.mrf.mxu0  ;;  %7856 = vmatmul.mubr.msk.f32.gmra.mxu1 %vm216_vm1, %v8826_v19  ;;  %7882 = vmatmul.mubr.msk.f32.gmra.mxu0 %vm216_vm1, %v8947_v18  ;;  %v9257_v11 = vld [vmem:[%s8203_s30 + $0x111] sm:$0xff] }
 0x109   : >> { %v9206_v15 = vadd.f32 %v1211_v4, %v1058_v36  ;;  %v1061_v8 = vadd.f32 %v7545_v2, %v9046_v30  ;;  %7858 = vmatprep.mubr.msk.f32.mxu1 %vm216_vm1, %v8832_v21  ;;  %7884 = vmatprep.mubr.msk.f32.mxu0 %vm216_vm1, %v8955_v37  ;;  %v6689_v30 = vld [vmem:[%s8203_s30 + $0xf8] sm:$0xff] }
 0x10a   : >> { %v989_v7 = vpop.f32.mrf.mxu1  ;;  %v1221_v54 = vpop.f32.mrf.mxu0 }
 0x10b   : >> { %v9213_v19 = vadd.f32 %v7571_v46, %v1061_v8  ;;  %v1060_v18 = vadd.f32 %v989_v7, %v9052_v14  ;;  %v6724_v14 = vld [vmem:[%s8203_s30 + $0xf9] sm:$0xff] }
 0x10c   : >> { %v7548_v49 = vpop.f32.mrf.mxu1  ;;  %v7574_v39 = vpop.f32.mrf.mxu0  ;;  %7859 = vmatmul.mubr.msk.f32.gmra.mxu1 %vm216_vm1, %v8846_v23  ;;  %7885 = vmatmul.mubr.msk.f32.gmra.mxu0 %vm216_vm1, %v8971_v43  ;;  %v9230_v23 = vld [vmem:[%s8203_s30 + $0x100] sm:$0xff]  ;;  %v9274_v7 = vld [vmem:[%s8203_s30 + $0x118] sm:$0xff] }
 0x10d   : >> { %v9220_v21 = vadd.f32 %v1221_v54, %v1060_v18  ;;  %v1063_v37 = vadd.f32 %v7548_v49, %v9066_v22  ;;  %7861 = vmatprep.mubr.msk.f32.mxu1 %vm216_vm1, %v8852_v25  ;;  %7887 = vmatprep.mubr.msk.f32.mxu0 %vm216_vm1, %v8979_v51  ;;  %v9233_v43 = vld [vmem:[%s8203_s30 + $0x101] sm:$0xff] }
 0x10e   : >> { %v999_v47 = vpop.f32.mrf.mxu1  ;;  %v1231_v0 = vpop.f32.mrf.mxu0  ;;  %v9280_v49 = vld [vmem:[%s8203_s30 + $0x120] sm:$0xff] }
 0x10f   : >> { %v9235_v52 = vadd.f32 %v7574_v39, %v1063_v37  ;;  %v1062_v22 = vadd.f32 %v999_v47, %v9070_v24  ;;  %v9251_v24 = vld [vmem:[%s8203_s30 + $0x109] sm:$0xff]  ;;  %v9283_v39 = vld [vmem:[%s8203_s30 + $0x121] sm:$0xff] }
 0x110   : >> { %v7551_v25 = vpop.f32.mrf.mxu1  ;;  %v7577_v41 = vpop.f32.mrf.mxu0  ;;  %7862 = vmatmul.mubr.msk.f32.gmra.mxu1 %vm216_vm1, %v6689_v30  ;;  %7888 = vmatmul.mubr.msk.f32.gmra.mxu0 %vm216_vm1, %v6724_v14 }
 0x111   : >> { %v9240_v51 = vadd.f32 %v1231_v0, %v1062_v22  ;;  %v1065_v13 = vadd.f32 %v7551_v25, %v9088_v57  ;;  %7864 = vmatprep.mubr.msk.f32.mxu1 %vm216_vm1, %v9230_v23  ;;  %7890 = vmatprep.mubr.msk.f32.mxu0 %vm216_vm1, %v9233_v43  ;;  %v9300_v22 = vld [vmem:[%s8203_s30 + $0x128] sm:$0xff] }
 0x112   : >> { %v1009_v17 = vpop.f32.mrf.mxu1  ;;  %v1241_v35 = vpop.f32.mrf.mxu0 }
 0x113   : >> { %v9259_v57 = vadd.f32 %v7577_v41, %v1065_v13  ;;  %v1064_v4 = vadd.f32 %v1009_v17, %v9094_v28  ;;  %v9277_v28 = vld [vmem:[%s8203_s30 + $0x119] sm:$0xff]  ;;  %v9306_v13 = vld [vmem:[%s8203_s30 + $0x130] sm:$0xff] }
 0x114   : >> { %v7554_v36 = vpop.f32.mrf.mxu1  ;;  %v7580_v2 = vpop.f32.mrf.mxu0  ;;  %7865 = vmatmul.mubr.msk.f32.gmra.mxu1 %vm216_vm1, %v9248_v55  ;;  %7891 = vmatmul.mubr.msk.f32.gmra.mxu0 %vm216_vm1, %v9251_v24  ;;  %v9309_v17 = vld [vmem:[%s8203_s30 + $0x131] sm:$0xff] }
 0x115   : >> { %v9266_v46 = vadd.f32 %v1241_v35, %v1064_v4  ;;  %v1067_v8 = vadd.f32 %v7554_v36, %v9113_v16  ;;  %7867 = vmatprep.mubr.msk.f32.mxu1 %vm216_vm1, %v9254_v63  ;;  %7893 = vmatprep.mubr.msk.f32.mxu0 %vm216_vm1, %v9257_v11 }
 0x116   : >> { %v1019_v54 = vpop.f32.mrf.mxu1  ;;  %v1251_v18 = vpop.f32.mrf.mxu0 }
 0x117   : >> { %v9285_v16 = vadd.f32 %v7580_v2, %v1067_v8  ;;  %v1066_v37 = vadd.f32 %v1019_v54, %v9120_v40  ;;  %v9303_v40 = vld [vmem:[%s8203_s30 + $0x129] sm:$0xff]  ;;  %v6697_v54 = vld [vmem:[%s8203_s30 + $0x138] sm:$0xf] }
 0x118   : >> { %v7557_v30 = vpop.f32.mrf.mxu1  ;;  %v7583_v14 = vpop.f32.mrf.mxu0  ;;  %7868 = vmatmul.mubr.msk.f32.gmra.mxu1 %vm216_vm1, %v9274_v7  ;;  %7894 = vmatmul.mubr.msk.f32.gmra.mxu0 %vm216_vm1, %v9277_v28 }
 0x119   : >> { %v9292_v47 = vadd.f32 %v1251_v18, %v1066_v37  ;;  %v1069_v0 = vadd.f32 %v7557_v30, %v9139_v27  ;;  %7870 = vmatprep.mubr.msk.f32.mxu1 %vm216_vm1, %v9280_v49  ;;  %7896 = vmatprep.mubr.msk.f32.mxu0 %vm216_vm1, %v9283_v39 }
 0x11a   : >> { %v1029_v25 = vpop.f32.mrf.mxu1  ;;  %v1261_v41 = vpop.f32.mrf.mxu0 }
 0x11b   : >> { %v9311_v35 = vadd.f32 %v7583_v14, %v1069_v0  ;;  %v1068_v27 = vadd.f32 %v1029_v25, %v9146_v31  ;;  %v6732_v31 = vld [vmem:[%s8203_s30 + $0x139] sm:$0xf] }
 0x11c   : >> { %v7560_v4 = vpop.f32.mrf.mxu1  ;;  %v7586_v36 = vpop.f32.mrf.mxu0  ;;  %7871 = vmatmul.mubr.msk.f32.gmra.mxu1 %vm216_vm1, %v9300_v22  ;;  %7897 = vmatmul.mubr.msk.f32.gmra.mxu0 %vm216_vm1, %v9303_v40 }
 0x11d   : >> { %v9318_v2 = vadd.f32 %v1261_v41, %v1068_v27  ;;  %v1071_v8 = vadd.f32 %v7560_v4, %v9155_v48  ;;  %7873 = vmatprep.mubr.msk.f32.mxu1 %vm216_vm1, %v9306_v13  ;;  %7899 = vmatprep.mubr.msk.f32.mxu0 %vm216_vm1, %v9309_v17 }
 0x11e   : >> { %v1039_v18 = vpop.f32.mrf.mxu1  ;;  %v1271_v37 = vpop.f32.mrf.mxu0 }
 0x11f   : >> { %v9327_v30 = vadd.f32 %v7586_v36, %v1071_v8  ;;  %v1070_v14 = vadd.f32 %v1039_v18, %v9160_v42 }
 0x120   : >> { %v7563_v0 = vpop.f32.mrf.mxu1  ;;  %v7589_v25 = vpop.f32.mrf.mxu0  ;;  %7874 = vmatmul.mubr.msk.f32.gmra.mxu1 %vm216_vm1, %v6697_v54  ;;  %7900 = vmatmul.mubr.msk.f32.gmra.mxu0 %vm216_vm1, %v6732_v31 }
 0x121   : >> { %v9332_v48 = vadd.f32 %v1271_v37, %v1070_v14  ;;  %v1073_v41 = vadd.f32 %v7563_v0, %v9167_v29  ;;  %7904 = vmatprep.mubr.msk.f32.mxu1 %vm216_vm1, %v8916_v33  ;;  %7930 = vmatprep.mubr.msk.f32.mxu0 %vm216_vm1, %v9061_v44  ;;  %v9349_v33 = vld [vmem:[%s10114_s1 + $0x54] sm:$0x7]  ;;  %v9354_v44 = vld [vmem:[%s10114_s1 + $0x58] sm:$0x7] }
 0x122   : >> { %v1049_v27 = vpop.f32.mrf.mxu1  ;;  %v1281_v4 = vpop.f32.mrf.mxu0 }
 0x123   : >> { %v9339_v36 = vadd.f32 %v7589_v25, %v1073_v41  ;;  %v1072_v42 = vadd.f32 %v1049_v27, %v9184_v59 }
 0x124   : >> { %v7594_v8 = vpop.f32.mrf.mxu1  ;;  %v7620_v54 = vpop.f32.mrf.mxu0  ;;  %7905 = vmatmul.mubr.msk.f32.vlgmr.msra.gmra.mxu1 %vm216_vm1, %v8928_v6  ;;  %7931 = vmatmul.mubr.msk.f32.vlgmr.msra.gmra.mxu0 %vm216_vm1, %v9077_v1 }
 0x125   : >> { %v9356_v29 = vadd.f32 %v1281_v4, %v1072_v42  ;;  %v1523_v59 = vadd.f32 %v7594_v8, %v9195_v20  ;;  %7955 = vmatpush3.msk.msra.mxu1 %vm265_vm0, %v9177_v9  ;;  %7981 = vmatpush3.msk.msra.mxu0 %vm265_vm0, %v9182_v32  ;;  %v9420_v42 = vld [vmem:[%s8203_s30 + $0x10a] sm:$0xff] }
 0x126   : >> { %v1443_v6 = vpop.f32.mrf.mxu1  ;;  %v1675_v1 = vpop.f32.mrf.mxu0  ;;  %7907 = vmatprep.mubr.msk.f32.mxu1 %vm216_vm1, %v8934_v12  ;;  %7933 = vmatprep.mubr.msk.f32.mxu0 %vm216_vm1, %v9083_v5 }
 0x127   : >> { %v9367_v31 = vadd.f32 %v7620_v54, %v1523_v59  ;;  %v1522_v18 = vadd.f32 %v1443_v6, %v9206_v15  ;;  %8006 = vmatprep.subr.msk.mxu1 %vm265_vm0, %v9349_v33  ;;  %8032 = vmatprep.subr.msk.mxu0 %vm265_vm0, %v9354_v44  ;;  %v9426_v59 = vld [vmem:[%s8203_s30 + $0x112] sm:$0xff] }
 0x128   : >> { %v7597_v9 = vpop.f32.mrf.mxu1  ;;  %v7623_v32 = vpop.f32.mrf.mxu0  ;;  %7908 = vmatmul.mubr.msk.f32.gmra.mxu1 %vm216_vm1, %v8950_v34  ;;  %7934 = vmatmul.mubr.msk.f32.gmra.mxu0 %vm216_vm1, %v9102_v56  ;;  %v9429_v6 = vld [vmem:[%s8203_s30 + $0x113] sm:$0xff] }
 0x129   : >> { %v9378_v12 = vadd.f32 %v1675_v1, %v1522_v18  ;;  %v1525_v5 = vadd.f32 %v7597_v9, %v9213_v19  ;;  %7910 = vmatprep.mubr.msk.f32.mxu1 %vm216_vm1, %v8958_v38  ;;  %7936 = vmatprep.mubr.msk.f32.mxu0 %vm216_vm1, %v9108_v58  ;;  %v6759_v19 = vld [vmem:[%s8203_s30 + $0xfa] sm:$0xff] }
 0x12a   : >> { %v1453_v20 = vpop.f32.mrf.mxu1  ;;  %v1685_v15 = vpop.f32.mrf.mxu0 }
 0x12b   : >> { %v9385_v34 = vadd.f32 %v7623_v32, %v1525_v5  ;;  %v1524_v56 = vadd.f32 %v1453_v20, %v9220_v21  ;;  %v6794_v21 = vld [vmem:[%s8203_s30 + $0xfb] sm:$0xff] }
 0x12c   : >> { %v7600_v37 = vpop.f32.mrf.mxu1  ;;  %v7626_v14 = vpop.f32.mrf.mxu0  ;;  %7911 = vmatmul.mubr.msk.f32.gmra.mxu1 %vm216_vm1, %v8974_v45  ;;  %7937 = vmatmul.mubr.msk.f32.gmra.mxu0 %vm216_vm1, %v9128_v62  ;;  %v9402_v45 = vld [vmem:[%s8203_s30 + $0x102] sm:$0xff]  ;;  %v9446_v20 = vld [vmem:[%s8203_s30 + $0x11a] sm:$0xff] }
 0x12d   : >> { %v9392_v38 = vadd.f32 %v1685_v15, %v1524_v56  ;;  %v1527_v58 = vadd.f32 %v7600_v37, %v9235_v52  ;;  %7913 = vmatprep.mubr.msk.f32.mxu1 %vm216_vm1, %v8982_v53  ;;  %7939 = vmatprep.mubr.msk.f32.mxu0 %vm216_vm1, %v9134_v50  ;;  %v9405_v62 = vld [vmem:[%s8203_s30 + $0x103] sm:$0xff] }
 0x12e   : >> { %v1463_v0 = vpop.f32.mrf.mxu1  ;;  %v1695_v25 = vpop.f32.mrf.mxu0  ;;  %v9452_v37 = vld [vmem:[%s8203_s30 + $0x122] sm:$0xff] }
 0x12f   : >> { %v9407_v41 = vadd.f32 %v7626_v14, %v1527_v58  ;;  %v1526_v52 = vadd.f32 %v1463_v0, %v9240_v51  ;;  %v9423_v51 = vld [vmem:[%s8203_s30 + $0x10b] sm:$0xff]  ;;  %v9455_v14 = vld [vmem:[%s8203_s30 + $0x123] sm:$0xff] }
 0x130   : >> { %v7603_v53 = vpop.f32.mrf.mxu1  ;;  %v7629_v27 = vpop.f32.mrf.mxu0  ;;  %7914 = vmatmul.mubr.msk.f32.gmra.mxu1 %vm216_vm1, %v6759_v19  ;;  %7940 = vmatmul.mubr.msk.f32.gmra.mxu0 %vm216_vm1, %v6794_v21 }
 0x131   : >> { %v9412_v50 = vadd.f32 %v1695_v25, %v1526_v52  ;;  %v1529_v4 = vadd.f32 %v7603_v53, %v9259_v57  ;;  %7916 = vmatprep.mubr.msk.f32.mxu1 %vm216_vm1, %v9402_v45  ;;  %7942 = vmatprep.mubr.msk.f32.mxu0 %vm216_vm1, %v9405_v62  ;;  %v9472_v52 = vld [vmem:[%s8203_s30 + $0x12a] sm:$0xff] }
 0x132   : >> { %v1473_v8 = vpop.f32.mrf.mxu1  ;;  %v1705_v54 = vpop.f32.mrf.mxu0 }
 0x133   : >> { %v9431_v57 = vadd.f32 %v7629_v27, %v1529_v4  ;;  %v1528_v1 = vadd.f32 %v1473_v8, %v9266_v46  ;;  %v9449_v46 = vld [vmem:[%s8203_s30 + $0x11b] sm:$0xff]  ;;  %v9478_v4 = vld [vmem:[%s8203_s30 + $0x132] sm:$0xff] }
 0x134   : >> { %v7606_v18 = vpop.f32.mrf.mxu1  ;;  %v7632_v9 = vpop.f32.mrf.mxu0  ;;  %7917 = vmatmul.mubr.msk.f32.gmra.mxu1 %vm216_vm1, %v9420_v42  ;;  %7943 = vmatmul.mubr.msk.f32.gmra.mxu0 %vm216_vm1, %v9423_v51  ;;  %v9481_v8 = vld [vmem:[%s8203_s30 + $0x133] sm:$0xff] }
 0x135   : >> { %v9438_v32 = vadd.f32 %v1705_v54, %v1528_v1  ;;  %v1531_v5 = vadd.f32 %v7606_v18, %v9285_v16  ;;  %7919 = vmatprep.mubr.msk.f32.mxu1 %vm216_vm1, %v9426_v59  ;;  %7945 = vmatprep.mubr.msk.f32.mxu0 %vm216_vm1, %v9429_v6 }
 0x136   : >> { %v1483_v15 = vpop.f32.mrf.mxu1  ;;  %v1715_v56 = vpop.f32.mrf.mxu0 }
 0x137   : >> { %v9457_v16 = vadd.f32 %v7632_v9, %v1531_v5  ;;  %v1530_v58 = vadd.f32 %v1483_v15, %v9292_v47  ;;  %v9475_v47 = vld [vmem:[%s8203_s30 + $0x12b] sm:$0xff]  ;;  %v6767_v15 = vld [vmem:[%s8203_s30 + $0x13a] sm:$0xf] }
 0x138   : >> { %v7609_v19 = vpop.f32.mrf.mxu1  ;;  %v7635_v21 = vpop.f32.mrf.mxu0  ;;  %7920 = vmatmul.mubr.msk.f32.gmra.mxu1 %vm216_vm1, %v9446_v20  ;;  %7946 = vmatmul.mubr.msk.f32.gmra.mxu0 %vm216_vm1, %v9449_v46 }
 0x139   : >> { %v9464_v0 = vadd.f32 %v1715_v56, %v1530_v58  ;;  %v1533_v25 = vadd.f32 %v7609_v19, %v9311_v35  ;;  %7922 = vmatprep.mubr.msk.f32.mxu1 %vm216_vm1, %v9452_v37  ;;  %7948 = vmatprep.mubr.msk.f32.mxu0 %vm216_vm1, %v9455_v14 }
 0x13a   : >> { %v1493_v53 = vpop.f32.mrf.mxu1  ;;  %v1725_v27 = vpop.f32.mrf.mxu0 }
 0x13b   : >> { %v9483_v54 = vadd.f32 %v7635_v21, %v1533_v25  ;;  %v1532_v35 = vadd.f32 %v1493_v53, %v9318_v2  ;;  %v6802_v2 = vld [vmem:[%s8203_s30 + $0x13b] sm:$0xf] }
 0x13c   : >> { %v7612_v1 = vpop.f32.mrf.mxu1  ;;  %v7638_v18 = vpop.f32.mrf.mxu0  ;;  %7923 = vmatmul.mubr.msk.f32.gmra.mxu1 %vm216_vm1, %v9472_v52  ;;  %7949 = vmatmul.mubr.msk.f32.gmra.mxu0 %vm216_vm1, %v9475_v47 }
 0x13d   : >> { %v9490_v9 = vadd.f32 %v1725_v27, %v1532_v35  ;;  %v1535_v5 = vadd.f32 %v7612_v1, %v9327_v30  ;;  %7925 = vmatprep.mubr.msk.f32.mxu1 %vm216_vm1, %v9478_v4  ;;  %7951 = vmatprep.mubr.msk.f32.mxu0 %vm216_vm1, %v9481_v8 }
 0x13e   : >> { %v1503_v56 = vpop.f32.mrf.mxu1  ;;  %v1735_v58 = vpop.f32.mrf.mxu0 }
 0x13f   : >> { %v9499_v19 = vadd.f32 %v7638_v18, %v1535_v5  ;;  %v1534_v21 = vadd.f32 %v1503_v56, %v9332_v48 }
 0x140   : >> { %v7615_v25 = vpop.f32.mrf.mxu1  ;;  %v7641_v53 = vpop.f32.mrf.mxu0  ;;  %7926 = vmatmul.mubr.msk.f32.gmra.mxu1 %vm216_vm1, %v6767_v15  ;;  %7952 = vmatmul.mubr.msk.f32.gmra.mxu0 %vm216_vm1, %v6802_v2 }
 0x141   : >> { %v9504_v30 = vadd.f32 %v1735_v58, %v1534_v21  ;;  %v1537_v27 = vadd.f32 %v7615_v25, %v9339_v36  ;;  %7956 = vmatprep.mubr.msk.f32.mxu1 %vm216_vm1, %v9064_v60  ;;  %7982 = vmatprep.mubr.msk.f32.mxu0 %vm216_vm1, %v9230_v23  ;;  %v9521_v60 = vld [vmem:[%s10114_s1 + $0x5c] sm:$0x7]  ;;  %v9526_v23 = vld [vmem:[%s10114_s1 + $0x60] sm:$0x7] }
 0x142   : >> { %v1513_v35 = vpop.f32.mrf.mxu1  ;;  %v1745_v1 = vpop.f32.mrf.mxu0 }
 0x143   : >> { %v9511_v18 = vadd.f32 %v7641_v53, %v1537_v27  ;;  %v1536_v48 = vadd.f32 %v1513_v35, %v9356_v29  ;;  %v10122_v53 = vld [vmem:[#allocation4_spill] sm:$0xff]  ;;  %v6829_v27 = vld [vmem:[%s8203_s30 + $0xfc] sm:$0xff] }
 0x144   : >> { %v7646_v5 = vpop.f32.mrf.mxu1  ;;  %v7672_v15 = vpop.f32.mrf.mxu0  ;;  %7957 = vmatmul.mubr.msk.f32.vlgmr.msra.gmra.mxu1 %vm216_vm1, %v9080_v3  ;;  %7983 = vmatmul.mubr.msk.f32.vlgmr.msra.gmra.mxu0 %vm216_vm1, %v9248_v55 }
 0x145   : >> { %v9528_v36 = vadd.f32 %v1745_v1, %v1536_v48  ;;  %v1987_v29 = vadd.f32 %v7646_v5, %v9367_v31  ;;  %8007 = vmatpush3.msk.msra.mxu1 %vm265_vm0, %v9349_v33  ;;  %8033 = vmatpush3.msk.msra.mxu0 %vm265_vm0, %v9354_v44  ;;  %v10121_v31 = vld [vmem:[#allocation3_spill] sm:$0xff] }
 0x146   : >> { %v1907_v3 = vpop.f32.mrf.mxu1  ;;  %v2139_v55 = vpop.f32.mrf.mxu0  ;;  %7959 = vmatprep.mubr.msk.f32.mxu1 %vm216_vm1, %v9086_v10  ;;  %7985 = vmatprep.mubr.msk.f32.mxu0 %vm216_vm1, %v9254_v63  ;;  %v9574_v48 = vld [vmem:[%s8203_s30 + $0x104] sm:$0xff] }
 0x147   : >> { %v9539_v2 = vadd.f32 %v7672_v15, %v1987_v29  ;;  %v1986_v56 = vadd.f32 %v1907_v3, %v9378_v12  ;;  %8058 = vmatprep.subr.msk.mxu1 %vm265_vm0, %v9521_v60  ;;  %8084 = vmatprep.subr.msk.mxu0 %vm265_vm0, %v9526_v23  ;;  %v9589_v3 = vld [vmem:[%s8203_s30 + $0x10c] sm:$0xff] }
 0x148   : >> { %v7649_v33 = vpop.f32.mrf.mxu1  ;;  %v7675_v44 = vpop.f32.mrf.mxu0  ;;  %7960 = vmatmul.mubr.msk.f32.gmra.mxu1 %vm216_vm1, %v9105_v61  ;;  %7986 = vmatmul.mubr.msk.f32.gmra.mxu0 %vm216_vm1, %v9274_v7 }
 0x149   : >> { %v9550_v10 = vadd.f32 %v2139_v55, %v1986_v56  ;;  %v1989_v63 = vadd.f32 %v7649_v33, %v9385_v34  ;;  %7962 = vmatprep.mubr.msk.f32.mxu1 %vm216_vm1, %v10121_v31  ;;  %7988 = vmatprep.mubr.msk.f32.mxu0 %vm216_vm1, %v9280_v49  ;;  %v6866_v55 = vld [vmem:[%s8203_s30 + $0x148] sm:$0xff]  ;;  %v9593_v33 = vld [vmem:[%s8203_s30 + $0x114] sm:$0xff] }
 0x14a   : >> { %v1917_v12 = vpop.f32.mrf.mxu1  ;;  %v2149_v58 = vpop.f32.mrf.mxu0 }
 0x14b   : >> { %v9557_v61 = vadd.f32 %v7675_v44, %v1989_v63  ;;  %v1988_v7 = vadd.f32 %v1917_v12, %v9392_v38  ;;  %v6864_v38 = vld [vmem:[%s8203_s30 + $0x138] sm:$0xff]  ;;  %v6867_v44 = vld [vmem:[%s8203_s30 + $0x150] sm:$0xff] }
 0x14c   : >> { %v7652_v21 = vpop.f32.mrf.mxu1  ;;  %v7678_v25 = vpop.f32.mrf.mxu0  ;;  %7963 = vmatmul.mubr.msk.f32.gmra.mxu1 %vm216_vm1, %v10122_v53  ;;  %7989 = vmatmul.mubr.msk.f32.gmra.mxu0 %vm216_vm1, %v9300_v22  ;;  %v6865_v22 = vld [vmem:[%s8203_s30 + $0x140] sm:$0xff] }
 0x14d   : >> { %v9564_v34 = vadd.f32 %v2149_v58, %v1988_v7  ;;  %v1991_v49 = vadd.f32 %v7652_v21, %v9407_v41  ;;  %7965 = vmatprep.mubr.msk.f32.mxu1 %vm216_vm1, %v9137_v26  ;;  %7991 = vmatprep.mubr.msk.f32.mxu0 %vm216_vm1, %v9306_v13  ;;  %v9609_v21 = vld [vmem:[%s8203_s30 + $0x11c] sm:$0xff] }
 0x14e   : >> { %v1927_v35 = vpop.f32.mrf.mxu1  ;;  %v2159_v1 = vpop.f32.mrf.mxu0 }
 0x14f   : >> { %v9577_v5 = vadd.f32 %v7678_v25, %v1991_v49  ;;  %v1990_v41 = vadd.f32 %v1927_v35, %v9412_v50  ;;  %v9613_v49 = vld [vmem:[%s8203_s30 + $0x124] sm:$0xff] }
 0x150   : >> { %v7655_v15 = vpop.f32.mrf.mxu1  ;;  %v7681_v26 = vpop.f32.mrf.mxu0  ;;  %7966 = vmatmul.mubr.msk.f32.gmra.mxu1 %vm216_vm1, %v6829_v27  ;;  %7992 = vmatmul.mubr.msk.f32.gmra.mxu0 %vm216_vm1, %v6864_v38  ;;  %v6869_v27 = vld [vmem:[%s8203_s30 + $0x160] sm:$0xff] }
 0x151   : >> { %v9582_v13 = vadd.f32 %v2159_v1, %v1990_v41  ;;  %v1993_v29 = vadd.f32 %v7655_v15, %v9431_v57  ;;  %7968 = vmatprep.mubr.msk.f32.mxu1 %vm216_vm1, %v9574_v48  ;;  %7994 = vmatprep.mubr.msk.f32.mxu0 %vm216_vm1, %v6865_v22  ;;  %v9629_v15 = vld [vmem:[%s8203_s30 + $0x12c] sm:$0xff] }
 0x152   : >> { %v1937_v50 = vpop.f32.mrf.mxu1  ;;  %v2169_v56 = vpop.f32.mrf.mxu0 }
 0x153   : >> { %v9596_v63 = vadd.f32 %v7681_v26, %v1993_v29  ;;  %v1992_v57 = vadd.f32 %v1937_v50, %v9438_v32  ;;  %v6868_v32 = vld [vmem:[%s8203_s30 + $0x158] sm:$0xff]  ;;  %v6871_v50 = vld [vmem:[%s8203_s30 + $0x170] sm:$0xff] }
 0x154   : >> { %v7658_v31 = vpop.f32.mrf.mxu1  ;;  %v7684_v12 = vpop.f32.mrf.mxu0  ;;  %7969 = vmatmul.mubr.msk.f32.gmra.mxu1 %vm216_vm1, %v9589_v3  ;;  %7995 = vmatmul.mubr.msk.f32.gmra.mxu0 %vm216_vm1, %v6866_v55  ;;  %v9633_v55 = vld [vmem:[%s8203_s30 + $0x134] sm:$0xff] }
 0x155   : >> { %v9602_v58 = vadd.f32 %v2169_v56, %v1992_v57  ;;  %v1995_v7 = vadd.f32 %v7658_v31, %v9457_v16  ;;  %7971 = vmatprep.mubr.msk.f32.mxu1 %vm216_vm1, %v9593_v33  ;;  %7997 = vmatprep.mubr.msk.f32.mxu0 %vm216_vm1, %v6867_v44 }
 0x156   : >> { %v1947_v25 = vpop.f32.mrf.mxu1  ;;  %v2179_v53 = vpop.f32.mrf.mxu0 }
 0x157   : >> { %v9616_v38 = vadd.f32 %v7684_v12, %v1995_v7  ;;  %v1994_v16 = vadd.f32 %v1947_v25, %v9464_v0  ;;  %v6870_v0 = vld [vmem:[%s8203_s30 + $0x168] sm:$0xff]  ;;  %v6837_v7 = vld [vmem:[%s8203_s30 + $0x13c] sm:$0xf] }
 0x158   : >> { %v7661_v35 = vpop.f32.mrf.mxu1  ;;  %v7687_v1 = vpop.f32.mrf.mxu0  ;;  %7972 = vmatmul.mubr.msk.f32.gmra.mxu1 %vm216_vm1, %v9609_v21  ;;  %7998 = vmatmul.mubr.msk.f32.gmra.mxu0 %vm216_vm1, %v6868_v32  ;;  %v6872_v32 = vld [vmem:[%s8203_s30 + $0x178] sm:$0xf] }
 0x159   : >> { %v9622_v22 = vadd.f32 %v2179_v53, %v1994_v16  ;;  %v1997_v41 = vadd.f32 %v7661_v35, %v9483_v54  ;;  %7974 = vmatprep.mubr.msk.f32.mxu1 %vm216_vm1, %v9613_v49  ;;  %8000 = vmatprep.mubr.msk.f32.mxu0 %vm216_vm1, %v6869_v27 }
 0x15a   : >> { %v1957_v26 = vpop.f32.mrf.mxu1  ;;  %v2189_v29 = vpop.f32.mrf.mxu0 }
 0x15b   : >> { %v9636_v56 = vadd.f32 %v7687_v1, %v1997_v41  ;;  %v1996_v44 = vadd.f32 %v1957_v26, %v9490_v9 }
 0x15c   : >> { %v7664_v54 = vpop.f32.mrf.mxu1  ;;  %v7690_v57 = vpop.f32.mrf.mxu0  ;;  %7975 = vmatmul.mubr.msk.f32.gmra.mxu1 %vm216_vm1, %v9629_v15  ;;  %8001 = vmatmul.mubr.msk.f32.gmra.mxu0 %vm216_vm1, %v6870_v0 }
 0x15d   : >> { %v9642_v31 = vadd.f32 %v2189_v29, %v1996_v44  ;;  %v1999_v12 = vadd.f32 %v7664_v54, %v9499_v19  ;;  %7977 = vmatprep.mubr.msk.f32.mxu1 %vm216_vm1, %v9633_v55  ;;  %8003 = vmatprep.mubr.msk.f32.mxu0 %vm216_vm1, %v6871_v50 }
 0x15e   : >> { %v1967_v25 = vpop.f32.mrf.mxu1  ;;  %v2199_v9 = vpop.f32.mrf.mxu0 }
 0x15f   : >> { %v9650_v53 = vadd.f32 %v7690_v57, %v1999_v12  ;;  %v1998_v27 = vadd.f32 %v1967_v25, %v9504_v30 }
 0x160   : >> { %v7667_v16 = vpop.f32.mrf.mxu1  ;;  %v7693_v35 = vpop.f32.mrf.mxu0  ;;  %7978 = vmatmul.mubr.msk.f32.gmra.mxu1 %vm216_vm1, %v6837_v7  ;;  %8004 = vmatmul.mubr.msk.f32.gmra.mxu0 %vm216_vm1, %v6872_v32  ;;  %v6935_v7 = vld [vmem:[%s8203_s30 + $0x142] sm:$0xff] }
 0x161   : >> { %v9655_v19 = vadd.f32 %v2199_v9, %v1998_v27  ;;  %v2001_v1 = vadd.f32 %v7667_v16, %v9511_v18  ;;  %8008 = vmatprep.mubr.msk.f32.mxu1 %vm216_vm1, %v9233_v43  ;;  %8034 = vmatprep.mubr.msk.f32.mxu0 %vm216_vm1, %v9402_v45  ;;  %v6901_v9 = vld [vmem:[%s8203_s30 + $0x149] sm:$0xff] }
 0x162   : >> { %v1977_v41 = vpop.f32.mrf.mxu1  ;;  %v2209_v0 = vpop.f32.mrf.mxu0  ;;  %v6936_v27 = vld [vmem:[%s8203_s30 + $0x14a] sm:$0xff] }
 0x163   : >> { %v9662_v26 = vadd.f32 %v7693_v35, %v2001_v1  ;;  %v2000_v30 = vadd.f32 %v1977_v41, %v9528_v36  ;;  %v6902_v35 = vld [vmem:[%s8203_s30 + $0x151] sm:$0xff] }
 0x164   : >> { %v7698_v29 = vpop.f32.mrf.mxu1  ;;  %v7724_v50 = vpop.f32.mrf.mxu0  ;;  %8009 = vmatmul.mubr.msk.f32.vlgmr.msra.gmra.mxu1 %vm216_vm1, %v9251_v24  ;;  %8035 = vmatmul.mubr.msk.f32.vlgmr.msra.gmra.mxu0 %vm216_vm1, %v9420_v42  ;;  %v6937_v1 = vld [vmem:[%s8203_s30 + $0x152] sm:$0xff] }
 0x165   : >> { %v9669_v18 = vadd.f32 %v2209_v0, %v2000_v30  ;;  %v2451_v43 = vadd.f32 %v7698_v29, %v9539_v2  ;;  %8059 = vmatpush3.msk.msra.mxu1 %vm265_vm0, %v9521_v60  ;;  %8085 = vmatpush3.msk.msra.mxu0 %vm265_vm0, %v9526_v23 }
 0x166   : >> { %v2371_v45 = vpop.f32.mrf.mxu1  ;;  %v2603_v36 = vpop.f32.mrf.mxu0  ;;  %8011 = vmatprep.mubr.msk.f32.mxu1 %vm216_vm1, %v9257_v11  ;;  %8037 = vmatprep.mubr.msk.f32.mxu0 %vm216_vm1, %v9426_v59 }
 0x167   : >> { %v9680_v24 = vadd.f32 %v7724_v50, %v2451_v43  ;;  %v2450_v42 = vadd.f32 %v2371_v45, %v9550_v10  ;;  %v6903_v43 = vld [vmem:[%s8203_s30 + $0x159] sm:$0xff] }
 0x168   : >> { %v7701_v44 = vpop.f32.mrf.mxu1  ;;  %v7727_v2 = vpop.f32.mrf.mxu0  ;;  %8012 = vmatmul.mubr.msk.f32.gmra.mxu1 %vm216_vm1, %v9277_v28  ;;  %8038 = vmatmul.mubr.msk.f32.gmra.mxu0 %vm216_vm1, %v9446_v20  ;;  %v6938_v45 = vld [vmem:[%s8203_s30 + $0x15a] sm:$0xff] }
 0x169   : >> { %v9687_v60 = vadd.f32 %v2603_v36, %v2450_v42  ;;  %v2453_v11 = vadd.f32 %v7701_v44, %v9557_v61  ;;  %8014 = vmatprep.mubr.msk.f32.mxu1 %vm216_vm1, %v9283_v39  ;;  %8040 = vmatprep.mubr.msk.f32.mxu0 %vm216_vm1, %v9452_v37  ;;  %v6899_v61 = vld [vmem:[%s8203_s30 + $0x139] sm:$0xff]  ;;  %v6904_v42 = vld [vmem:[%s8203_s30 + $0x161] sm:$0xff] }
 0x16a   : >> { %v2381_v59 = vpop.f32.mrf.mxu1  ;;  %v2613_v23 = vpop.f32.mrf.mxu0  ;;  %v6939_v44 = vld [vmem:[%s8203_s30 + $0x162] sm:$0xff] }
 0x16b   : >> { %v9694_v28 = vadd.f32 %v7727_v2, %v2453_v11  ;;  %v2452_v20 = vadd.f32 %v2381_v59, %v9564_v34  ;;  %v6934_v34 = vld [vmem:[%s8203_s30 + $0x13a] sm:$0xff] }
 0x16c   : >> { %v7704_v10 = vpop.f32.mrf.mxu1  ;;  %v7730_v54 = vpop.f32.mrf.mxu0  ;;  %8015 = vmatmul.mubr.msk.f32.gmra.mxu1 %vm216_vm1, %v9303_v40  ;;  %8041 = vmatmul.mubr.msk.f32.gmra.mxu0 %vm216_vm1, %v9472_v52  ;;  %v6900_v40 = vld [vmem:[%s8203_s30 + $0x141] sm:$0xff] }
 0x16d   : >> { %v9701_v39 = vadd.f32 %v2613_v23, %v2452_v20  ;;  %v2455_v37 = vadd.f32 %v7704_v10, %v9577_v5  ;;  %8017 = vmatprep.mubr.msk.f32.mxu1 %vm216_vm1, %v9309_v17  ;;  %8043 = vmatprep.mubr.msk.f32.mxu0 %vm216_vm1, %v9478_v4  ;;  %v6905_v10 = vld [vmem:[%s8203_s30 + $0x169] sm:$0xff] }
 0x16e   : >> { %v2391_v57 = vpop.f32.mrf.mxu1  ;;  %v2623_v12 = vpop.f32.mrf.mxu0 }
 0x16f   : >> { %v9712_v52 = vadd.f32 %v7730_v54, %v2455_v37  ;;  %v2454_v5 = vadd.f32 %v2391_v57, %v9582_v13  ;;  %v6940_v54 = vld [vmem:[%s8203_s30 + $0x16a] sm:$0xff] }
 0x170   : >> { %v7707_v32 = vpop.f32.mrf.mxu1  ;;  %v7733_v25 = vpop.f32.mrf.mxu0  ;;  %8018 = vmatmul.mubr.msk.f32.gmra.mxu1 %vm216_vm1, %v6899_v61  ;;  %8044 = vmatmul.mubr.msk.f32.gmra.mxu0 %vm216_vm1, %v6934_v34  ;;  %v6906_v61 = vld [vmem:[%s8203_s30 + $0x171] sm:$0xff] }
 0x171   : >> { %v9717_v17 = vadd.f32 %v2623_v12, %v2454_v5  ;;  %v2457_v4 = vadd.f32 %v7707_v32, %v9596_v63  ;;  %8020 = vmatprep.mubr.msk.f32.mxu1 %vm216_vm1, %v6900_v40  ;;  %8046 = vmatprep.mubr.msk.f32.mxu0 %vm216_vm1, %v6935_v7  ;;  %v6941_v34 = vld [vmem:[%s8203_s30 + $0x172] sm:$0xff] }
 0x172   : >> { %v2401_v16 = vpop.f32.mrf.mxu1  ;;  %v2633_v13 = vpop.f32.mrf.mxu0  ;;  %v6907_v32 = vld [vmem:[%s8203_s30 + $0x179] sm:$0xf] }
 0x173   : >> { %v9726_v41 = vadd.f32 %v7733_v25, %v2457_v4  ;;  %v2456_v0 = vadd.f32 %v2401_v16, %v9602_v58  ;;  %v6942_v25 = vld [vmem:[%s8203_s30 + $0x17a] sm:$0xf] }
 0x174   : >> { %v7710_v30 = vpop.f32.mrf.mxu1  ;;  %v7736_v63 = vpop.f32.mrf.mxu0  ;;  %8021 = vmatmul.mubr.msk.f32.gmra.mxu1 %vm216_vm1, %v6901_v9  ;;  %8047 = vmatmul.mubr.msk.f32.gmra.mxu0 %vm216_vm1, %v6936_v27 }
 0x175   : >> { %v9731_v29 = vadd.f32 %v2633_v13, %v2456_v0  ;;  %v2459_v50 = vadd.f32 %v7710_v30, %v9616_v38  ;;  %8023 = vmatprep.mubr.msk.f32.mxu1 %vm216_vm1, %v6902_v35  ;;  %8049 = vmatprep.mubr.msk.f32.mxu0 %vm216_vm1, %v6937_v1 }
 0x176   : >> { %v2411_v36 = vpop.f32.mrf.mxu1  ;;  %v2643_v58 = vpop.f32.mrf.mxu0 }
 0x177   : >> { %v9740_v2 = vadd.f32 %v7736_v63, %v2459_v50  ;;  %v2458_v11 = vadd.f32 %v2411_v36, %v9622_v22 }
 0x178   : >> { %v7713_v59 = vpop.f32.mrf.mxu1  ;;  %v7739_v38 = vpop.f32.mrf.mxu0  ;;  %8024 = vmatmul.mubr.msk.f32.gmra.mxu1 %vm216_vm1, %v6903_v43  ;;  %8050 = vmatmul.mubr.msk.f32.gmra.mxu0 %vm216_vm1, %v6938_v45 }
 0x179   : >> { %v9745_v23 = vadd.f32 %v2643_v58, %v2458_v11  ;;  %v2461_v20 = vadd.f32 %v7713_v59, %v9636_v56  ;;  %8026 = vmatprep.mubr.msk.f32.mxu1 %vm216_vm1, %v6904_v42  ;;  %8052 = vmatprep.mubr.msk.f32.mxu0 %vm216_vm1, %v6939_v44  ;;  %v7005_v11 = vld [vmem:[%s8203_s30 + $0x144] sm:$0xff] }
 0x17a   : >> { %v2421_v37 = vpop.f32.mrf.mxu1  ;;  %v2653_v22 = vpop.f32.mrf.mxu0 }
 0x17b   : >> { %v9754_v57 = vadd.f32 %v7739_v38, %v2461_v20  ;;  %v2460_v12 = vadd.f32 %v2421_v37, %v9642_v31  ;;  %v6971_v20 = vld [vmem:[%s8203_s30 + $0x14b] sm:$0xff]  ;;  %v6972_v37 = vld [vmem:[%s8203_s30 + $0x153] sm:$0xff] }
 0x17c   : >> { %v7716_v40 = vpop.f32.mrf.mxu1  ;;  %v7742_v7 = vpop.f32.mrf.mxu0  ;;  %8027 = vmatmul.mubr.msk.f32.gmra.mxu1 %vm216_vm1, %v6905_v10  ;;  %8053 = vmatmul.mubr.msk.f32.gmra.mxu0 %vm216_vm1, %v6940_v54  ;;  %v7006_v10 = vld [vmem:[%s8203_s30 + $0x14c] sm:$0xff] }
 0x17d   : >> { %v9759_v56 = vadd.f32 %v2653_v22, %v2460_v12  ;;  %v2463_v5 = vadd.f32 %v7716_v40, %v9650_v53  ;;  %8029 = vmatprep.mubr.msk.f32.mxu1 %vm216_vm1, %v6906_v61  ;;  %8055 = vmatprep.mubr.msk.f32.mxu0 %vm216_vm1, %v6941_v34  ;;  %v7007_v22 = vld [vmem:[%s8203_s30 + $0x154] sm:$0xff] }
 0x17e   : >> { %v2431_v4 = vpop.f32.mrf.mxu1  ;;  %v2663_v9 = vpop.f32.mrf.mxu0 }
 0x17f   : >> { %v9766_v27 = vadd.f32 %v7742_v7, %v2463_v5  ;;  %v2462_v31 = vadd.f32 %v2431_v4, %v9655_v19  ;;  %v6973_v5 = vld [vmem:[%s8203_s30 + $0x15b] sm:$0xff]  ;;  %v6974_v4 = vld [vmem:[%s8203_s30 + $0x163] sm:$0xff] }
 0x180   : >> { %v7719_v16 = vpop.f32.mrf.mxu1  ;;  %v7745_v13 = vpop.f32.mrf.mxu0  ;;  %8030 = vmatmul.mubr.msk.f32.gmra.mxu1 %vm216_vm1, %v6907_v32  ;;  %8056 = vmatmul.mubr.msk.f32.gmra.mxu0 %vm216_vm1, %v6942_v25  ;;  %v7008_v32 = vld [vmem:[%s8203_s30 + $0x15c] sm:$0xff] }
 0x181   : >> { %v9771_v35 = vadd.f32 %v2663_v9, %v2462_v31  ;;  %v2465_v53 = vadd.f32 %v7719_v16, %v9662_v26  ;;  %8060 = vmatprep.mubr.msk.f32.mxu1 %vm216_vm1, %v9405_v62  ;;  %8086 = vmatprep.mubr.msk.f32.mxu0 %vm216_vm1, %v9574_v48  ;;  %v7009_v9 = vld [vmem:[%s8203_s30 + $0x164] sm:$0xff] }
 0x182   : >> { %v2441_v1 = vpop.f32.mrf.mxu1  ;;  %v2673_v0 = vpop.f32.mrf.mxu0 }
 0x183   : >> { %v9778_v30 = vadd.f32 %v7745_v13, %v2465_v53  ;;  %v2464_v19 = vadd.f32 %v2441_v1, %v9669_v18 }
 0x184   : >> { %v7750_v63 = vpop.f32.mrf.mxu1  ;;  %v7776_v50 = vpop.f32.mrf.mxu0  ;;  %8061 = vmatmul.mubr.msk.f32.vlgmr.msra.gmra.mxu1 %vm216_vm1, %v9423_v51  ;;  %8087 = vmatmul.mubr.msk.f32.vlgmr.msra.gmra.mxu0 %vm216_vm1, %v9589_v3 }
 0x185   : >> { %v9785_v26 = vadd.f32 %v2673_v0, %v2464_v19  ;;  %v2915_v62 = vadd.f32 %v7750_v63, %v9680_v24  ;;  %8063 = vmatprep.mubr.msk.f32.mxu1 %vm216_vm1, %v9429_v6  ;;  %8089 = vmatprep.mubr.msk.f32.mxu0 %vm216_vm1, %v9593_v33  ;;  %v6975_v0 = vld [vmem:[%s8203_s30 + $0x16b] sm:$0xff] }
 0x186   : >> { %v2835_v48 = vpop.f32.mrf.mxu1  ;;  %v3067_v18 = vpop.f32.mrf.mxu0  ;;  %v7010_v19 = vld [vmem:[%s8203_s30 + $0x16c] sm:$0xff] }
 0x187   : >> { %v9792_v43 = vadd.f32 %v7776_v50, %v2915_v62  ;;  %v2914_v45 = vadd.f32 %v2835_v48, %v9687_v60  ;;  %v6976_v50 = vld [vmem:[%s8203_s30 + $0x173] sm:$0xff] }
 0x188   : >> { %v7753_v51 = vpop.f32.mrf.mxu1  ;;  %v7779_v36 = vpop.f32.mrf.mxu0  ;;  %8064 = vmatmul.mubr.msk.f32.gmra.mxu1 %vm216_vm1, %v9449_v46  ;;  %8090 = vmatmul.mubr.msk.f32.gmra.mxu0 %vm216_vm1, %v9609_v21  ;;  %v7011_v62 = vld [vmem:[%s8203_s30 + $0x174] sm:$0xff] }
 0x189   : >> { %v9799_v3 = vadd.f32 %v3067_v18, %v2914_v45  ;;  %v2917_v6 = vadd.f32 %v7753_v51, %v9694_v28  ;;  %8066 = vmatprep.mubr.msk.f32.mxu1 %vm216_vm1, %v9455_v14  ;;  %8092 = vmatprep.mubr.msk.f32.mxu0 %vm216_vm1, %v9613_v49  ;;  %v6969_v28 = vld [vmem:[%s8203_s30 + $0x13b] sm:$0xff] }
 0x18a   : >> { %v2845_v33 = vpop.f32.mrf.mxu1  ;;  %v3077_v24 = vpop.f32.mrf.mxu0 }
 0x18b   : >> { %v9806_v46 = vadd.f32 %v7779_v36, %v2917_v6  ;;  %v2916_v21 = vadd.f32 %v2845_v33, %v9701_v39  ;;  %v7004_v39 = vld [vmem:[%s8203_s30 + $0x13c] sm:$0xff] }
 0x18c   : >> { %v7756_v60 = vpop.f32.mrf.mxu1  ;;  %v7782_v58 = vpop.f32.mrf.mxu0  ;;  %8067 = vmatmul.mubr.msk.f32.gmra.mxu1 %vm216_vm1, %v9475_v47  ;;  %8093 = vmatmul.mubr.msk.f32.gmra.mxu0 %vm216_vm1, %v9629_v15  ;;  %v6970_v47 = vld [vmem:[%s8203_s30 + $0x143] sm:$0xff]  ;;  %v6977_v6 = vld [vmem:[%s8203_s30 + $0x17b] sm:$0xf] }
 0x18d   : >> { %v9813_v14 = vadd.f32 %v3077_v24, %v2916_v21  ;;  %v2919_v49 = vadd.f32 %v7756_v60, %v9712_v52  ;;  %8069 = vmatprep.mubr.msk.f32.mxu1 %vm216_vm1, %v9481_v8  ;;  %8095 = vmatprep.mubr.msk.f32.mxu0 %vm216_vm1, %v9633_v55  ;;  %v7012_v33 = vld [vmem:[%s8203_s30 + $0x17c] sm:$0xf] }
 0x18e   : >> { %v2855_v42 = vpop.f32.mrf.mxu1  ;;  %v3087_v44 = vpop.f32.mrf.mxu0 }
 0x18f   : >> { %v9824_v15 = vadd.f32 %v7782_v58, %v2919_v49  ;;  %v2918_v52 = vadd.f32 %v2855_v42, %v9717_v17 }
 0x190   : >> { %v7759_v59 = vpop.f32.mrf.mxu1  ;;  %v7785_v38 = vpop.f32.mrf.mxu0  ;;  %8070 = vmatmul.mubr.msk.f32.gmra.mxu1 %vm216_vm1, %v6969_v28  ;;  %8096 = vmatmul.mubr.msk.f32.gmra.mxu0 %vm216_vm1, %v7004_v39 }
 0x191   : >> { %v9829_v8 = vadd.f32 %v3087_v44, %v2918_v52  ;;  %v2921_v55 = vadd.f32 %v7759_v59, %v9726_v41  ;;  %8072 = vmatprep.mubr.msk.f32.mxu1 %vm216_vm1, %v6970_v47  ;;  %8098 = vmatprep.mubr.msk.f32.mxu0 %vm216_vm1, %v7005_v11 }
 0x192   : >> { %v2865_v54 = vpop.f32.mrf.mxu1  ;;  %v3097_v17 = vpop.f32.mrf.mxu0 }
 0x193   : >> { %v9838_v61 = vadd.f32 %v7785_v38, %v2921_v55  ;;  %v2920_v34 = vadd.f32 %v2865_v54, %v9731_v29 }
 0x194   : >> { %v7762_v12 = vpop.f32.mrf.mxu1  ;;  %v7788_v41 = vpop.f32.mrf.mxu0  ;;  %8073 = vmatmul.mubr.msk.f32.gmra.mxu1 %vm216_vm1, %v6971_v20  ;;  %8099 = vmatmul.mubr.msk.f32.gmra.mxu0 %vm216_vm1, %v7006_v10 }
 0x195   : >> { %v9843_v40 = vadd.f32 %v3097_v17, %v2920_v34  ;;  %v2923_v7 = vadd.f32 %v7762_v12, %v9740_v2  ;;  %8075 = vmatprep.mubr.msk.f32.mxu1 %vm216_vm1, %v6972_v37  ;;  %8101 = vmatprep.mubr.msk.f32.mxu0 %vm216_vm1, %v7007_v22 }
 0x196   : >> { %v2875_v25 = vpop.f32.mrf.mxu1  ;;  %v3107_v29 = vpop.f32.mrf.mxu0 }
 0x197   : >> { %v9852_v31 = vadd.f32 %v7788_v41, %v2923_v7  ;;  %v2922_v16 = vadd.f32 %v2875_v25, %v9745_v23 }
 0x198   : >> { %v7765_v13 = vpop.f32.mrf.mxu1  ;;  %v7791_v2 = vpop.f32.mrf.mxu0  ;;  %8076 = vmatmul.mubr.msk.f32.gmra.mxu1 %vm216_vm1, %v6973_v5  ;;  %8102 = vmatmul.mubr.msk.f32.gmra.mxu0 %vm216_vm1, %v7008_v32 }
 0x199   : >> { %v9857_v53 = vadd.f32 %v3107_v29, %v2922_v16  ;;  %v2925_v1 = vadd.f32 %v7765_v13, %v9754_v57  ;;  %8078 = vmatprep.mubr.msk.f32.mxu1 %vm216_vm1, %v6974_v4  ;;  %8104 = vmatprep.mubr.msk.f32.mxu0 %vm216_vm1, %v7009_v9 }
 0x19a   : >> { %v2885_v63 = vpop.f32.mrf.mxu1  ;;  %v3117_v23 = vpop.f32.mrf.mxu0 }
 0x19b   : >> { %v9866_v48 = vadd.f32 %v7791_v2, %v2925_v1  ;;  %v2924_v18 = vadd.f32 %v2885_v63, %v9759_v56 }
 0x19c   : >> { %v7768_v45 = vpop.f32.mrf.mxu1  ;;  %v7794_v51 = vpop.f32.mrf.mxu0  ;;  %8079 = vmatmul.mubr.msk.f32.gmra.mxu1 %vm216_vm1, %v6975_v0  ;;  %8105 = vmatmul.mubr.msk.f32.gmra.mxu0 %vm216_vm1, %v7010_v19 }
 0x19d   : >> { %v9871_v57 = vadd.f32 %v3117_v23, %v2924_v18  ;;  %v2927_v36 = vadd.f32 %v7768_v45, %v9766_v27  ;;  %8081 = vmatprep.mubr.msk.f32.mxu1 %vm216_vm1, %v6976_v50  ;;  %8107 = vmatprep.mubr.msk.f32.mxu0 %vm216_vm1, %v7011_v62 }
 0x19e   : >> { %v2895_v24 = vpop.f32.mrf.mxu1  ;;  %v3127_v21 = vpop.f32.mrf.mxu0 }
 0x19f   : >> { %v9878_v60 = vadd.f32 %v7794_v51, %v2927_v36  ;;  %v2926_v56 = vadd.f32 %v2895_v24, %v9771_v35 }
 0x1a0   : >> { %v7771_v58 = vpop.f32.mrf.mxu1  ;;  %v7797_v49 = vpop.f32.mrf.mxu0  ;;  %8082 = vmatmul.mubr.msk.f32.gmra.mxu1 %vm216_vm1, %v6977_v6  ;;  %8108 = vmatmul.mubr.msk.f32.gmra.mxu0 %vm216_vm1, %v7012_v33 }
 0x1a1   : >> { %v3158_v28 = vadd.f32 %v3127_v21, %v2926_v56  ;;  %v2929_v27 = vadd.f32 %v7771_v58, %v9778_v30 }
 0x1a2   : >> { %v2905_v39 = vpop.f32.mrf.mxu1  ;;  %v3137_v42 = vpop.f32.mrf.mxu0 }
 0x1a3   : >> { %v3161_v44 = vadd.f32 %v7797_v49, %v2929_v27  ;;  %v2928_v47 = vadd.f32 %v2905_v39, %v9785_v26 }
 0x1a4   : >> { %v7802_v11 = vpop.f32.mrf.mxu1  ;;  %v7828_v52 = vpop.f32.mrf.mxu0 }
 0x1a5   : >> { %v3160_v59 = vadd.f32 %v3137_v42, %v2928_v47  ;;  %v3379_v38 = vadd.f32 %v7802_v11, %v9792_v43 }
 0x1a6   : >> { %v3299_v35 = vpop.f32.mrf.mxu1  ;;  %v3531_v55 = vpop.f32.mrf.mxu0 }
 0x1a7   : >> { %v3611_v20 = vadd.f32 %v7828_v52, %v3379_v38  ;;  %v3378_v10 = vadd.f32 %v3299_v35, %v9799_v3 }
 0x1a8   : >> { %v7805_v54 = vpop.f32.mrf.mxu1  ;;  %v7831_v17 = vpop.f32.mrf.mxu0 }
 0x1a9   : >> { %v3610_v37 = vadd.f32 %v3531_v55, %v3378_v10  ;;  %v3381_v30 = vadd.f32 %v7805_v54, %v9806_v46 }
 0x1aa   : >> { %v3309_v22 = vpop.f32.mrf.mxu1  ;;  %v3541_v34 = vpop.f32.mrf.mxu0 }
 0x1ab   : >> { %v3613_v12 = vadd.f32 %v7831_v17, %v3381_v30  ;;  %v3380_v26 = vadd.f32 %v3309_v22, %v9813_v14 }
 0x1ac   : >> { %v7808_v41 = vpop.f32.mrf.mxu1  ;;  %v7834_v7 = vpop.f32.mrf.mxu0 }
 0x1ad   : >> { %v3612_v5 = vadd.f32 %v3541_v34, %v3380_v26  ;;  %v3383_v43 = vadd.f32 %v7808_v41, %v9824_v15 }
 0x1ae   : >> { %v3319_v32 = vpop.f32.mrf.mxu1  ;;  %v3551_v25 = vpop.f32.mrf.mxu0 }
 0x1af   : >> { %v3615_v29 = vadd.f32 %v7834_v7, %v3383_v43  ;;  %v3382_v3 = vadd.f32 %v3319_v32, %v9829_v8 }
 0x1b0   : >> { %v7811_v4 = vpop.f32.mrf.mxu1  ;;  %v7837_v9 = vpop.f32.mrf.mxu0 }
 0x1b1   : >> { %v3614_v16 = vadd.f32 %v3551_v25, %v3382_v3  ;;  %v3385_v46 = vadd.f32 %v7811_v4, %v9838_v61 }
 0x1b2   : >> { %v3329_v13 = vpop.f32.mrf.mxu1  ;;  %v3561_v2 = vpop.f32.mrf.mxu0 }
 0x1b3   : >> { %v3617_v1 = vadd.f32 %v7837_v9, %v3385_v46  ;;  %v3384_v14 = vadd.f32 %v3329_v13, %v9843_v40 }
 0x1b4   : >> { %v7814_v0 = vpop.f32.mrf.mxu1  ;;  %v7840_v19 = vpop.f32.mrf.mxu0 }
 0x1b5   : >> { %v3616_v63 = vadd.f32 %v3561_v2, %v3384_v14  ;;  %v3387_v15 = vadd.f32 %v7814_v0, %v9852_v31 }
 0x1b6   : >> { %v3339_v23 = vpop.f32.mrf.mxu1  ;;  %v3571_v50 = vpop.f32.mrf.mxu0 }
 0x1b7   : >> { %v3619_v62 = vadd.f32 %v7840_v19, %v3387_v15  ;;  %v3386_v8 = vadd.f32 %v3339_v23, %v9857_v53 }
 0x1b8   : >> { %v7817_v18 = vpop.f32.mrf.mxu1  ;;  %v7843_v45 = vpop.f32.mrf.mxu0 }
 0x1b9   : >> { %v3618_v51 = vadd.f32 %v3571_v50, %v3386_v8  ;;  %v3389_v61 = vadd.f32 %v7817_v18, %v9866_v48 }
 0x1ba   : >> { %v3349_v36 = vpop.f32.mrf.mxu1  ;;  %v3581_v6 = vpop.f32.mrf.mxu0 }
 0x1bb   : >> { %v3621_v33 = vadd.f32 %v7843_v45, %v3389_v61  ;;  %v3388_v40 = vadd.f32 %v3349_v36, %v9871_v57 }
 0x1bc   : >> { %v7820_v24 = vpop.f32.mrf.mxu1  ;;  %v7846_v21 = vpop.f32.mrf.mxu0 }
 0x1bd   : >> { %v3620_v56 = vadd.f32 %v3581_v6, %v3388_v40  ;;  %v3391_v31 = vadd.f32 %v7820_v24, %v9878_v60 }
 0x1be   : >> { %v3359_v58 = vpop.f32.mrf.mxu1  ;;  %v3591_v49 = vpop.f32.mrf.mxu0 }
 0x1bf   : >> { %v3623_v27 = vadd.f32 %v7846_v21, %v3391_v31  ;;  %v3390_v39 = vadd.f32 %v3359_v58, %v3158_v28 }
 0x1c0   : >> { %v7823_v53 = vpop.f32.mrf.mxu1  ;;  %v7849_v42 = vpop.f32.mrf.mxu0 }
 0x1c1   : >> { %v3622_v47 = vadd.f32 %v3591_v49, %v3390_v39  ;;  %v3393_v11 = vadd.f32 %v7823_v53, %v3161_v44 }
 0x1c2   : >> { %v3369_v52 = vpop.f32.mrf.mxu1  ;;  %v3601_v48 = vpop.f32.mrf.mxu0 }
 0x1c3   : >> { %v3625_v38 = vadd.f32 %v7849_v42, %v3393_v11  ;;  %v3392_v35 = vadd.f32 %v3369_v52, %v3160_v59 }
 0x1c4   : >> { %v7854_v55 = vpop.f32.mrf.mxu1  ;;  %v7880_v10 = vpop.f32.mrf.mxu0 }
 0x1c5   : >> { %v3624_v57 = vadd.f32 %v3601_v48, %v3392_v35  ;;  %v3843_v54 = vadd.f32 %v7854_v55, %v3611_v20 }
 0x1c6   : >> { %v3763_v17 = vpop.f32.mrf.mxu1  ;;  %v3995_v30 = vpop.f32.mrf.mxu0 }
 0x1c7   : >> { %v4075_v22 = vadd.f32 %v7880_v10, %v3843_v54  ;;  %v3842_v60 = vadd.f32 %v3763_v17, %v3610_v37 }
 0x1c8   : >> { %v7857_v34 = vpop.f32.mrf.mxu1  ;;  %v7883_v26 = vpop.f32.mrf.mxu0 }
 0x1c9   : >> { %v4074_v41 = vadd.f32 %v3995_v30, %v3842_v60  ;;  %v3845_v28 = vadd.f32 %v7857_v34, %v3613_v12 }
 0x1ca   : >> { %v3773_v7 = vpop.f32.mrf.mxu1  ;;  %v4005_v43 = vpop.f32.mrf.mxu0 }
 0x1cb   : >> { %v4077_v32 = vadd.f32 %v7883_v26, %v3845_v28  ;;  %v3844_v44 = vadd.f32 %v3773_v7, %v3612_v5 }
 0x1cc   : >> { %v7860_v25 = vpop.f32.mrf.mxu1  ;;  %v7886_v3 = vpop.f32.mrf.mxu0 }
 0x1cd   : >> { %v4076_v4 = vadd.f32 %v4005_v43, %v3844_v44  ;;  %v3847_v59 = vadd.f32 %v7860_v25, %v3615_v29 }
 0x1ce   : >> { %v3783_v9 = vpop.f32.mrf.mxu1  ;;  %v4015_v46 = vpop.f32.mrf.mxu0 }
 0x1cf   : >> { %v4079_v13 = vadd.f32 %v7886_v3, %v3847_v59  ;;  %v3846_v20 = vadd.f32 %v3783_v9, %v3614_v16 }
 0x1d0   : >> { %v7863_v2 = vpop.f32.mrf.mxu1  ;;  %v7889_v14 = vpop.f32.mrf.mxu0 }
 0x1d1   : >> { %v4078_v0 = vadd.f32 %v4015_v46, %v3846_v20  ;;  %v3849_v37 = vadd.f32 %v7863_v2, %v3617_v1 }
 0x1d2   : >> { %v3793_v19 = vpop.f32.mrf.mxu1  ;;  %v4025_v15 = vpop.f32.mrf.mxu0 }
 0x1d3   : >> { %v4081_v23 = vadd.f32 %v7889_v14, %v3849_v37  ;;  %v3848_v12 = vadd.f32 %v3793_v19, %v3616_v63 }
 0x1d4   : >> { %v7866_v50 = vpop.f32.mrf.mxu1  ;;  %v7892_v8 = vpop.f32.mrf.mxu0 }
 0x1d5   : >> { %v4080_v18 = vadd.f32 %v4025_v15, %v3848_v12  ;;  %v3851_v5 = vadd.f32 %v7866_v50, %v3619_v62 }
 0x1d6   : >> { %v3803_v45 = vpop.f32.mrf.mxu1  ;;  %v4035_v61 = vpop.f32.mrf.mxu0 }
 0x1d7   : >> { %v4083_v36 = vadd.f32 %v7892_v8, %v3851_v5  ;;  %v3850_v29 = vadd.f32 %v3803_v45, %v3618_v51 }
 0x1d8   : >> { %v7869_v6 = vpop.f32.mrf.mxu1  ;;  %v7895_v40 = vpop.f32.mrf.mxu0 }
 0x1d9   : >> { %v4082_v24 = vadd.f32 %v4035_v61, %v3850_v29  ;;  %v3853_v16 = vadd.f32 %v7869_v6, %v3621_v33 }
 0x1da   : >> { %v3813_v21 = vpop.f32.mrf.mxu1  ;;  %v4045_v31 = vpop.f32.mrf.mxu0 }
 0x1db   : >> { %v4085_v58 = vadd.f32 %v7895_v40, %v3853_v16  ;;  %v3852_v1 = vadd.f32 %v3813_v21, %v3620_v56 }
 0x1dc   : >> { %v7872_v49 = vpop.f32.mrf.mxu1  ;;  %v7898_v39 = vpop.f32.mrf.mxu0 }
 0x1dd   : >> { %v4084_v53 = vadd.f32 %v4045_v31, %v3852_v1  ;;  %v3855_v63 = vadd.f32 %v7872_v49, %v3623_v27 }
 0x1de   : >> { %v3823_v42 = vpop.f32.mrf.mxu1  ;;  %v4055_v11 = vpop.f32.mrf.mxu0 }
 0x1df   : >> { %v4087_v52 = vadd.f32 %v7898_v39, %v3855_v63  ;;  %v3854_v62 = vadd.f32 %v3823_v42, %v3622_v47 }
 0x1e0   : >> { %v7875_v48 = vpop.f32.mrf.mxu1  ;;  %v7901_v35 = vpop.f32.mrf.mxu0 }
 0x1e1   : >> { %v4086_v55 = vadd.f32 %v4055_v11, %v3854_v62  ;;  %v3857_v51 = vadd.f32 %v7875_v48, %v3625_v38 }
 0x1e2   : >> { %v3833_v10 = vpop.f32.mrf.mxu1  ;;  %v4065_v54 = vpop.f32.mrf.mxu0 }
 0x1e3   : >> { %v4089_v17 = vadd.f32 %v7901_v35, %v3857_v51  ;;  %v3856_v33 = vadd.f32 %v3833_v10, %v3624_v57 }
 0x1e4   : >> { %v7906_v30 = vpop.f32.mrf.mxu1  ;;  %v7932_v60 = vpop.f32.mrf.mxu0 }
 0x1e5   : >> { %v4088_v34 = vadd.f32 %v4065_v54, %v3856_v33  ;;  %v4307_v56 = vadd.f32 %v7906_v30, %v4075_v22 }
 0x1e6   : >> { %v4227_v26 = vpop.f32.mrf.mxu1  ;;  %v4459_v28 = vpop.f32.mrf.mxu0 }
 0x1e7   : >> { %v9898_v7 = vadd.f32 %v7932_v60, %v4307_v56  ;;  %v4306_v27 = vadd.f32 %v4227_v26, %v4074_v41 }
 0x1e8   : >> { %v7909_v43 = vpop.f32.mrf.mxu1  ;;  %v7935_v44 = vpop.f32.mrf.mxu0 }
 0x1e9   : >> { %v9900_v47 = vadd.f32 %v4459_v28, %v4306_v27  ;;  %v4309_v25 = vadd.f32 %v7909_v43, %v4077_v32 }
 0x1ea   : >> { %v4237_v3 = vpop.f32.mrf.mxu1  ;;  %v4469_v38 = vpop.f32.mrf.mxu0 }
 0x1eb   : >> { %v9902_v59 = vadd.f32 %v7935_v44, %v4309_v25  ;;  %v4308_v9 = vadd.f32 %v4237_v3, %v4076_v4 }
 0x1ec   : >> { %v7912_v57 = vpop.f32.mrf.mxu1  ;;  %v7938_v46 = vpop.f32.mrf.mxu0 }
 0x1ed   : >> { %v9904_v20 = vadd.f32 %v4469_v38, %v4308_v9  ;;  %v4311_v22 = vadd.f32 %v7912_v57, %v4079_v13 }
 0x1ee   : >> { %v4247_v2 = vpop.f32.mrf.mxu1  ;;  %v4479_v14 = vpop.f32.mrf.mxu0 }
 0x1ef   : >> { %v9906_v37 = vadd.f32 %v7938_v46, %v4311_v22  ;;  %v4310_v41 = vadd.f32 %v4247_v2, %v4078_v0 }
 0x1f0   : >> { %v7915_v19 = vpop.f32.mrf.mxu1  ;;  %v7941_v15 = vpop.f32.mrf.mxu0 }
 0x1f1   : >> { %v9908_v12 = vadd.f32 %v4479_v14, %v4310_v41  ;;  %v4313_v32 = vadd.f32 %v7915_v19, %v4081_v23 }
 0x1f2   : >> { %v4257_v50 = vpop.f32.mrf.mxu1  ;;  %v4489_v8 = vpop.f32.mrf.mxu0 }
 0x1f3   : >> { %v9910_v5 = vadd.f32 %v7941_v15, %v4313_v32  ;;  %v4312_v4 = vadd.f32 %v4257_v50, %v4080_v18 }
 0x1f4   : >> { %v7918_v45 = vpop.f32.mrf.mxu1  ;;  %v7944_v61 = vpop.f32.mrf.mxu0 }
 0x1f5   : >> { %v9912_v29 = vadd.f32 %v4489_v8, %v4312_v4  ;;  %v4315_v13 = vadd.f32 %v7918_v45, %v4083_v36 }
 0x1f6   : >> { %v4267_v6 = vpop.f32.mrf.mxu1  ;;  %v4499_v40 = vpop.f32.mrf.mxu0 }
 0x1f7   : >> { %v9914_v16 = vadd.f32 %v7944_v61, %v4315_v13  ;;  %v4314_v0 = vadd.f32 %v4267_v6, %v4082_v24 }
 0x1f8   : >> { %v7921_v21 = vpop.f32.mrf.mxu1  ;;  %v7947_v31 = vpop.f32.mrf.mxu0 }
 0x1f9   : >> { %v9916_v1 = vadd.f32 %v4499_v40, %v4314_v0  ;;  %v4317_v23 = vadd.f32 %v7921_v21, %v4085_v58 }
 0x1fa   : >> { %v4277_v49 = vpop.f32.mrf.mxu1  ;;  %v4509_v39 = vpop.f32.mrf.mxu0 }
 0x1fb   : >> { %v9918_v63 = vadd.f32 %v7947_v31, %v4317_v23  ;;  %v4316_v18 = vadd.f32 %v4277_v49, %v4084_v53 }
 0x1fc   : >> { %v7924_v42 = vpop.f32.mrf.mxu1  ;;  %v7950_v11 = vpop.f32.mrf.mxu0 }
 0x1fd   : >> { %v9920_v62 = vadd.f32 %v4509_v39, %v4316_v18  ;;  %v4319_v36 = vadd.f32 %v7924_v42, %v4087_v52 }
 0x1fe   : >> { %v4287_v48 = vpop.f32.mrf.mxu1  ;;  %v4519_v35 = vpop.f32.mrf.mxu0 }
 0x1ff   : >> { %v9922_v51 = vadd.f32 %v7950_v11, %v4319_v36  ;;  %v4318_v24 = vadd.f32 %v4287_v48, %v4086_v55 }
 0x200   : >> { %v7927_v10 = vpop.f32.mrf.mxu1  ;;  %v7953_v54 = vpop.f32.mrf.mxu0 }
 0x201   : >> { %v9924_v33 = vadd.f32 %v4519_v35, %v4318_v24  ;;  %v4321_v58 = vadd.f32 %v7927_v10, %v4089_v17 }
 0x202   : >> { %v4297_v30 = vpop.f32.mrf.mxu1  ;;  %v4529_v60 = vpop.f32.mrf.mxu0 }
 0x203   : >> { %10123 = vst [vmem:[#allocation3_spill] sm:$0xff] %v9924_v33  ;;  %v9926_v56 = vadd.f32 %v7953_v54, %v4321_v58  ;;  %v4320_v53 = vadd.f32 %v4297_v30, %v4088_v34 }
 0x204   : >> { %v7958_v26 = vpop.f32.mrf.mxu1  ;;  %v7984_v28 = vpop.f32.mrf.mxu0 }
 0x205   : >> { %10124 = vst [vmem:[#allocation4_spill] sm:$0xff] %v9926_v56  ;;  %v9928_v27 = vadd.f32 %v4529_v60, %v4320_v53  ;;  %v4771_v56 = vadd.f32 %v7958_v26, %v9898_v7 }
 0x206   : >> { %v4691_v52 = vpop.f32.mrf.mxu1  ;;  %v4923_v43 = vpop.f32.mrf.mxu0 }
 0x207   : >> { %10125 = vst [vmem:[#allocation5_spill] sm:$0xff] %v9928_v27  ;;  %v4770_v33 = vadd.f32 %v4691_v52, %v9900_v47 }
 0x208   : >> { %v7961_v44 = vpop.f32.mrf.mxu1  ;;  %v9930_v25 = vpop.f32.mrf.mxu0 }
 0x20a   : >> { %v4701_v55 = vpop.f32.mrf.mxu1  ;;  %v9932_v3 = vpop.f32.mrf.mxu0 }
 0x20b   : >> { %v4772_v7 = vadd.f32 %v4701_v55, %v9904_v20 }
 0x20c   : >> { %v7964_v38 = vpop.f32.mrf.mxu1  ;;  %v9934_v9 = vpop.f32.mrf.mxu0 }
 0x20d   : >> { %v4775_v52 = vadd.f32 %v7964_v38, %v9906_v37 }
 0x20e   : >> { %v4711_v17 = vpop.f32.mrf.mxu1  ;;  %v9936_v57 = vpop.f32.mrf.mxu0 }
 0x210   : >> { %v9938_v46 = vpop.f32.mrf.mxu1  ;;  %v9940_v34 = vpop.f32.mrf.mxu0 }
 0x212   : >> { %v9942_v22 = vpop.f32.mrf.mxu1  ;;  %v9944_v2 = vpop.f32.mrf.mxu0 }
 0x214   : >> { %v9946_v14 = vpop.f32.mrf.mxu1  ;;  %v9948_v41 = vpop.f32.mrf.mxu0 }
 0x216   : >> { %v9950_v19 = vpop.f32.mrf.mxu1  ;;  %v9952_v15 = vpop.f32.mrf.mxu0 }
 0x218   : >> { %v9954_v32 = vpop.f32.mrf.mxu1  ;;  %v9956_v50 = vpop.f32.mrf.mxu0 }
 0x21a   : >> { %v9958_v8 = vpop.f32.mrf.mxu1  ;;  %v9960_v4 = vpop.f32.mrf.mxu0 }
 0x21b   : >> { %10126 = vst [vmem:[#allocation6_spill] sm:$0xff] %v9960_v4 }
 0x21c   : >> { %v9962_v45 = vpop.f32.mrf.mxu1  ;;  %v9964_v61 = vpop.f32.mrf.mxu0 }
 0x21d   : >> { %10127 = vst [vmem:[#allocation7_spill] sm:$0xff] %v9964_v61 }
 0x21e   : >> { %v9966_v13 = vpop.f32.mrf.mxu1  ;;  %v9968_v6 = vpop.f32.mrf.mxu0 }
 0x21f   : >> { %10128 = vst [vmem:[#allocation8_spill] sm:$0xff] %v9966_v13  ;;  %10129 = vst [vmem:[#allocation9_spill] sm:$0xff] %v9968_v6 }
 0x220   : >> { %v9970_v40 = vpop.f32.mrf.mxu1  ;;  %v9972_v0 = vpop.f32.mrf.mxu0 }
 0x221   : >> { %10130 = vst [vmem:[#allocation10_spill] sm:$0xff] %v9970_v40  ;;  %10131 = vst [vmem:[#allocation11_spill] sm:$0xff] %v9972_v0 }
 0x222   : >> { %v9974_v21 = vpop.f32.mrf.mxu1  ;;  %v9976_v31 = vpop.f32.mrf.mxu0 }
 0x223   : >> { %10132 = vst [vmem:[#allocation12_spill] sm:$0xff] %v9974_v21  ;;  %10133 = vst [vmem:[#allocation13_spill] sm:$0xff] %v9976_v31 }
 0x224   : >> { %v8010_v23 = vpop.f32.mrf.mxu1  ;;  %v8036_v49 = vpop.f32.mrf.mxu0 }
 0x226   : >> { %v5155_v39 = vpop.f32.mrf.mxu1  ;;  %v5387_v18 = vpop.f32.mrf.mxu0 }
 0x228   : >> { %v8013_v42 = vpop.f32.mrf.mxu1  ;;  %v8039_v11 = vpop.f32.mrf.mxu0 }
 0x22a   : >> { %v5165_v36 = vpop.f32.mrf.mxu1  ;;  %v5397_v48 = vpop.f32.mrf.mxu0 }
 0x22c   : >> { %v8016_v35 = vpop.f32.mrf.mxu1  ;;  %v9978_v24 = vpop.f32.mrf.mxu0 }
 0x22e   : >> { %v5175_v10 = vpop.f32.mrf.mxu1  ;;  %v9980_v54 = vpop.f32.mrf.mxu0 }
 0x230   : >> { %v9982_v58 = vpop.f32.mrf.mxu1  ;;  %v9984_v30 = vpop.f32.mrf.mxu0 }
 0x232   : >> { %v9986_v60 = vpop.f32.mrf.mxu1  ;;  %v9988_v53 = vpop.f32.mrf.mxu0 }
 0x233   : >> { %10134 = vst [vmem:[#allocation14_spill] sm:$0xff] %v9988_v53 }
 0x234   : >> { %v9990_v31 = vpop.f32.mrf.mxu1  ;;  %v9992_v0 = vpop.f32.mrf.mxu0 }
 0x235   : >> { %10135 = vst [vmem:[#allocation15_spill] sm:$0xff] %v9992_v0  ;;  %v5003_v0 = vadd.f32 %v7984_v28, %v4771_v56  ;;  %v4774_v56 = vadd.f32 %v4711_v17, %v9908_v12  ;;  %v4776_v17 = vadd.f32 %v9942_v22, %v9912_v29 }
 0x236   : >> { %v9994_v21 = vpop.f32.mrf.mxu1  ;;  %v9996_v27 = vpop.f32.mrf.mxu0 }
 0x237   : >> { %10136 = vst [vmem:[#allocation16_spill] sm:$0xff] %v9994_v21  ;;  %10137 = vst [vmem:[#allocation17_spill] sm:$0xff] %v9996_v27  ;;  %v4773_v21 = vadd.f32 %v7961_v44, %v9902_v59  ;;  %v5235_v26 = vadd.f32 %v8010_v23, %v5003_v0  ;;  %v4777_v44 = vadd.f32 %v9938_v46, %v9910_v5 }
 0x238   : >> { %v9998_v6 = vpop.f32.mrf.mxu1  ;;  %v10000_v40 = vpop.f32.mrf.mxu0  ;;  %v5006_v12 = vadd.f32 %v9936_v57, %v4774_v56  ;;  %v5008_v22 = vadd.f32 %v9944_v2, %v4776_v17  ;;  %v4780_v56 = vadd.f32 %v9958_v8, %v9920_v62 }
 0x239   : >> { %10138 = vst [vmem:[#allocation18_spill] sm:$0xff] %v9998_v6  ;;  %10139 = vst [vmem:[#allocation19_spill] sm:$0xff] %v10000_v40  ;;  %v5002_v40 = vadd.f32 %v4923_v43, %v4770_v33  ;;  %v5005_v47 = vadd.f32 %v9930_v25, %v4773_v21  ;;  %v5004_v33 = vadd.f32 %v9932_v3, %v4772_v7 }
 0x23a   : >> { %v10003_v61 = vpop.f32.mrf.mxu1  ;;  %v10005_v13 = vpop.f32.mrf.mxu0  ;;  %v5467_v43 = vadd.f32 %v8036_v49, %v5235_v26  ;;  %v5007_v25 = vadd.f32 %v9934_v9, %v4775_v52  ;;  %v5009_v5 = vadd.f32 %v9940_v34, %v4777_v44  ;;  %v4779_v9 = vadd.f32 %v9946_v14, %v9914_v16 }
 0x23b   : >> { %10140 = vst [vmem:[#allocation20_spill] sm:$0xff] %v10003_v61  ;;  %10141 = vst [vmem:[#allocation21_spill] sm:$0xff] %v10005_v13  ;;  %v5237_v20 = vadd.f32 %v8013_v42, %v5005_v47  ;;  %v5236_v37 = vadd.f32 %v5165_v36, %v5004_v33 }
 0x23c   : >> { %v10008_v4 = vpop.f32.mrf.mxu1  ;;  %v10010_v53 = vpop.f32.mrf.mxu0  ;;  %v5239_v49 = vadd.f32 %v8016_v35, %v5007_v25  ;;  %v5241_v26 = vadd.f32 %v9982_v58, %v5009_v5  ;;  %v10151_v5 = vld [vmem:[#allocation4_spill] sm:$0xff] }
 0x23d   : >> { %10142 = vst [vmem:[#allocation22_spill] sm:$0xff] %v10010_v53  ;;  %v5234_v53 = vadd.f32 %v5155_v39, %v5002_v40  ;;  %v5469_v23 = vadd.f32 %v8039_v11, %v5237_v20  ;;  %v5468_v36 = vadd.f32 %v5397_v48, %v5236_v37  ;;  %v4778_v11 = vadd.f32 %v9950_v19, %v9916_v1  ;;  %v10146_v37 = vld [vmem:[#allocation3_spill] sm:$0xff] }
 0x23e   : >> { %v10013_v27 = vpop.f32.mrf.mxu1  ;;  %v10015_v6 = vpop.f32.mrf.mxu0  ;;  %v5471_v34 = vadd.f32 %v9978_v24, %v5239_v49  ;;  %v5011_v48 = vadd.f32 %v9948_v41, %v4779_v9  ;;  %v5240_v1 = vadd.f32 %v9986_v60, %v5008_v22  ;;  %v4783_v20 = vadd.f32 %v9962_v45, %v9922_v51  ;;  %v10144_v62 = vld [vmem:[#allocation16_spill] sm:$0xff]  ;;  %v10152_v9 = vld [vmem:[#allocation10_spill] sm:$0xff] }
 0x23f   : >> { %v5466_v21 = vadd.f32 %v5387_v18, %v5234_v53  ;;  %v5238_v53 = vadd.f32 %v5175_v10, %v5006_v12  ;;  %v4781_v10 = vadd.f32 %v9954_v32, %v9918_v63  ;;  %v5010_v58 = vadd.f32 %v9952_v15, %v4778_v11 }
 0x240   : >> { %v10018_v61 = vpop.f32.mrf.mxu1  ;;  %v10020_v13 = vpop.f32.mrf.mxu0  ;;  %v5243_v63 = vadd.f32 %v9990_v31, %v5011_v48  ;;  %v10145_v31 = vld [vmem:[#allocation6_spill] sm:$0xff] }
 0x241   : >> { %v5470_v52 = vadd.f32 %v9980_v54, %v5238_v53  ;;  %v5013_v60 = vadd.f32 %v9956_v50, %v4781_v10  ;;  %v5242_v8 = vadd.f32 %v10144_v62, %v5010_v58  ;;  %v10149_v51 = vld [vmem:[#allocation18_spill] sm:$0xff]  ;;  %v10153_v53 = vld [vmem:[#allocation17_spill] sm:$0xff] }
 0x242   : >> { %v10025_v59 = vpop.f32.mrf.mxu1  ;;  %v10027_v28 = vpop.f32.mrf.mxu0 }
 0x243   : >> { %v5245_v45 = vadd.f32 %v10149_v51, %v5013_v60  ;;  %v10161_v60 = vld [vmem:[#allocation13_spill] sm:$0xff] }
 0x244   : >> { %v8062_v55 = vpop.f32.mrf.mxu1  ;;  %v8088_v0 = vpop.f32.mrf.mxu0 }
 0x245   : >> { %v5699_v38 = vadd.f32 %v8062_v55, %v5467_v43  ;;  %v5473_v43 = vadd.f32 %v9984_v30, %v5241_v26  ;;  %v10143_v55 = vld [vmem:[#allocation14_spill] sm:$0xff]  ;;  %v10156_v26 = vld [vmem:[#allocation5_spill] sm:$0xff] }
 0x246   : >> { %v5619_v40 = vpop.f32.mrf.mxu1  ;;  %v5851_v3 = vpop.f32.mrf.mxu0 }
 0x247   : >> { %v5931_v39 = vadd.f32 %v8088_v0, %v5699_v38  ;;  %v5698_v42 = vadd.f32 %v5619_v40, %v5466_v21  ;;  %v5472_v0 = vadd.f32 %v10143_v55, %v5240_v1  ;;  %v5012_v21 = vadd.f32 %v10145_v31, %v4780_v56  ;;  %v10147_v38 = vld [vmem:[#allocation8_spill] sm:$0xff]  ;;  %v10148_v40 = vld [vmem:[#allocation15_spill] sm:$0xff] }
 0x248   : >> { %v8065_v46 = vpop.f32.mrf.mxu1  ;;  %v8091_v18 = vpop.f32.mrf.mxu0  ;;  %v4782_v12 = vadd.f32 %v10147_v38, %v10146_v37 }
 0x249   : >> { %5948 = vst.msk [vmem:[#allocation2 + $0x8] sm:$0xff] %vm5946_vm2, %v5931_v39  ;;  %v5930_v57 = vadd.f32 %v5851_v3, %v5698_v42  ;;  %v5701_v29 = vadd.f32 %v8065_v46, %v5469_v23  ;;  %v5475_v3 = vadd.f32 %v10148_v40, %v5243_v63  ;;  %v10150_v39 = vld [vmem:[#allocation7_spill] sm:$0xff]  ;;  %v4785_v46 = vadd.f32 %v10152_v9, %v10151_v5 }
 0x24a   : >> { %v5629_v35 = vpop.f32.mrf.mxu1  ;;  %v5861_v7 = vpop.f32.mrf.mxu0  ;;  %v5015_v42 = vadd.f32 %v10150_v39, %v4783_v20  ;;  %v7031_v9 = vld [vmem:[%s10115_s2] ss:$0 sm:$0xff] }
 0x24b   : >> { %5947 = vst.msk [vmem:[#allocation2] sm:$0xff] %vm5946_vm2, %v5930_v57  ;;  %v5933_v16 = vadd.f32 %v8091_v18, %v5701_v29  ;;  %v5700_v14 = vadd.f32 %v5629_v35, %v5468_v36  ;;  %v5474_v57 = vadd.f32 %v10153_v53, %v5242_v8  ;;  %v10154_v29 = vld [vmem:[#allocation20_spill] sm:$0xff] }
 0x24c   : >> { %v8068_v47 = vpop.f32.mrf.mxu1  ;;  %v8094_v2 = vpop.f32.mrf.mxu0  ;;  %v5244_v22 = vadd.f32 %v10154_v29, %v5012_v21 }
 0x24d   : >> { %5950 = vst.msk [vmem:[#allocation2 + $0x18] sm:$0xff] %vm5946_vm2, %v5933_v16  ;;  %v5932_v19 = vadd.f32 %v5861_v7, %v5700_v14  ;;  %v5703_v24 = vadd.f32 %v8068_v47, %v5471_v34  ;;  %v10155_v7 = vld [vmem:[#allocation9_spill] sm:$0xff]  ;;  %v10157_v16 = vld [vmem:[#allocation12_spill] sm:$0xff]  ;;  %v10158_v47 = vld [vmem:[#allocation19_spill] sm:$0xff] }
 0x24e   : >> { %v5639_v33 = vpop.f32.mrf.mxu1  ;;  %v5871_v41 = vpop.f32.mrf.mxu0  ;;  %v5014_v34 = vadd.f32 %v10155_v7, %v4782_v12  ;;  %v4784_v14 = vadd.f32 %v10157_v16, %v10156_v26 }
 0x24f   : >> { %5949 = vst.msk [vmem:[#allocation2 + $0x10] sm:$0xff] %vm5946_vm2, %v5932_v19  ;;  %v5935_v32 = vadd.f32 %v8094_v2, %v5703_v24  ;;  %v5702_v54 = vadd.f32 %v5639_v33, %v5470_v52  ;;  %v5477_v2 = vadd.f32 %v10158_v47, %v5245_v45  ;;  %v5247_v52 = vadd.f32 %v10008_v4, %v5015_v42  ;;  %v10159_v24 = vld [vmem:[#allocation11_spill] sm:$0xff] }
 0x250   : >> { %v8071_v44 = vpop.f32.mrf.mxu1  ;;  %v8097_v15 = vpop.f32.mrf.mxu0  ;;  %v5017_v58 = vadd.f32 %v10159_v24, %v4785_v46  ;;  %v5246_v63 = vadd.f32 %v10013_v27, %v5014_v34  ;;  %v5016_v20 = vadd.f32 %v10161_v60, %v4784_v14 }
 0x251   : >> { %5952 = vst.msk [vmem:[#allocation2 + $0x28] sm:$0xff] %vm5946_vm2, %v5935_v32  ;;  %v5934_v30 = vadd.f32 %v5871_v41, %v5702_v54  ;;  %v5705_v25 = vadd.f32 %v8071_v44, %v5473_v43  ;;  %v10160_v41 = vld [vmem:[#allocation21_spill] sm:$0xff] }
 0x252   : >> { %v5649_v17 = vpop.f32.mrf.mxu1  ;;  %v5881_v50 = vpop.f32.mrf.mxu0  ;;  %v5476_v43 = vadd.f32 %v10160_v41, %v5244_v22  ;;  %v5478_v27 = vadd.f32 %v10015_v6, %v5246_v63  ;;  %v5248_v31 = vadd.f32 %v10025_v59, %v5016_v20  ;;  %v5964_v40 = vld [vmem:[#allocation2] ss:$2 sm:$0xff] }
 0x253   : >> { %5951 = vst.msk [vmem:[#allocation2 + $0x20] sm:$0xff] %vm5946_vm2, %v5934_v30  ;;  %v5937_v23 = vadd.f32 %v8097_v15, %v5705_v25  ;;  %v5704_v49 = vadd.f32 %v5649_v17, %v5472_v0  ;;  %v10162_v15 = vld [vmem:[#allocation22_spill] sm:$0xff]  ;;  %v5249_v0 = vadd.f32 %v10018_v61, %v5017_v58 }
 0x254   : >> { %v8074_v18 = vpop.f32.mrf.mxu1  ;;  %v8100_v36 = vpop.f32.mrf.mxu0  ;;  %v5479_v55 = vadd.f32 %v10162_v15, %v5247_v52  ;;  %v5480_v6 = vadd.f32 %v10027_v28, %v5248_v31 }
 0x255   : >> { %5954 = vst.msk [vmem:[#allocation2 + $0x38] sm:$0xff] %vm5946_vm2, %v5937_v23  ;;  %v5936_v11 = vadd.f32 %v5881_v50, %v5704_v49  ;;  %v5707_v35 = vadd.f32 %v8074_v18, %v5475_v3  ;;  %v5481_v17 = vadd.f32 %v10020_v13, %v5249_v0  ;;  %v5972_v3 = vld [vmem:[#allocation2 + $0x1] ss:$2 sm:$0xff] }
 0x256   : >> { %v5659_v48 = vpop.f32.mrf.mxu1  ;;  %v5891_v10 = vpop.f32.mrf.mxu0  ;;  %v5995_v13 = vmax.f32 %v5964_v40, %v5972_v3  ;;  %v5966_v28 = vld [vmem:[#allocation2 + $0x10] ss:$2 sm:$0xff] }
 0x257   : >> { %5953 = vst.msk [vmem:[#allocation2 + $0x30] sm:$0xff] %vm5946_vm2, %v5936_v11  ;;  %v5939_v1 = vadd.f32 %v8100_v36, %v5707_v35  ;;  %v5706_v19 = vadd.f32 %v5659_v48, %v5474_v57  ;;  %v5974_v36 = vld [vmem:[#allocation2 + $0x11] ss:$2 sm:$0xff] }
 0x258   : >> { %v8077_v56 = vpop.f32.mrf.mxu1  ;;  %v8103_v33 = vpop.f32.mrf.mxu0  ;;  %v5996_v35 = vmax.f32 %v5966_v28, %v5974_v36 }
 0x259   : >> { %5956 = vst.msk [vmem:[#allocation2 + $0x48] sm:$0xff] %vm5946_vm2, %v5939_v1  ;;  %v5938_v32 = vadd.f32 %v5891_v10, %v5706_v19  ;;  %v5709_v54 = vadd.f32 %v8077_v56, %v5477_v2 }
 0x25a   : >> { %v5669_v44 = vpop.f32.mrf.mxu1  ;;  %v5901_v4 = vpop.f32.mrf.mxu0  ;;  %v5968_v26 = vld [vmem:[#allocation2 + $0x20] ss:$2 sm:$0xff]  ;;  %v5976_v16 = vld [vmem:[#allocation2 + $0x21] ss:$2 sm:$0xff] }
 0x25b   : >> { %5955 = vst.msk [vmem:[#allocation2 + $0x40] sm:$0xff] %vm5946_vm2, %v5938_v32  ;;  %v5941_v62 = vadd.f32 %v8103_v33, %v5709_v54  ;;  %v5708_v8 = vadd.f32 %v5669_v44, %v5476_v43  ;;  %v5997_v2 = vmax.f32 %v5968_v26, %v5976_v16 }
 0x25c   : >> { %v8080_v30 = vpop.f32.mrf.mxu1  ;;  %v8106_v25 = vpop.f32.mrf.mxu0 }
 0x25d   : >> { %5958 = vst.msk [vmem:[#allocation2 + $0x58] sm:$0xff] %vm5946_vm2, %v5941_v62  ;;  %v5940_v21 = vadd.f32 %v5901_v4, %v5708_v8  ;;  %v5711_v37 = vadd.f32 %v8080_v30, %v5479_v55 }
 0x25e   : >> { %v5679_v38 = vpop.f32.mrf.mxu1  ;;  %v5911_v12 = vpop.f32.mrf.mxu0  ;;  %v5970_v19 = vld [vmem:[#allocation2 + $0x30] ss:$2 sm:$0x3f]  ;;  %v5978_v24 = vld [vmem:[#allocation2 + $0x31] ss:$2 sm:$0x3f] }
 0x25f   : >> { %5957 = vst.msk [vmem:[#allocation2 + $0x50] sm:$0xff] %vm5946_vm2, %v5940_v21  ;;  %v5943_v61 = vadd.f32 %v8106_v25, %v5711_v37  ;;  %v5710_v50 = vadd.f32 %v5679_v38, %v5478_v27  ;;  %v5998_v43 = vmax.f32 %v5970_v19, %v5978_v24 }
 0x260   : >> { %v8083_v51 = vpop.f32.mrf.mxu1  ;;  %v8109_v45 = vpop.f32.mrf.mxu0 }
 0x261   : >> { %5960 = vst.msk [vmem:[#allocation2 + $0x68] sm:$0xff] %vm5946_vm2, %v5943_v61  ;;  %v5942_v59 = vadd.f32 %v5911_v12, %v5710_v50  ;;  %v5713_v23 = vadd.f32 %v8083_v51, %v5481_v17 }
 0x262   : >> { %v5980_v49 = vld [vmem:[#allocation2 + $0x40] ss:$2 sm:$0xff]  ;;  %v5988_v39 = vld [vmem:[#allocation2 + $0x41] ss:$2 sm:$0xff]  ;;  %v5689_v42 = vpop.f32.mrf.mxu1  ;;  %v5921_v53 = vpop.f32.mrf.mxu0 }
 0x263   : >> { %v5999_v5 = vmax.f32 %v5980_v49, %v5988_v39  ;;  %5959 = vst.msk [vmem:[#allocation2 + $0x60] sm:$0xff] %vm5946_vm2, %v5942_v59  ;;  %v5945_v46 = vadd.f32 %v8109_v45, %v5713_v23  ;;  %v5712_v18 = vadd.f32 %v5689_v42, %v5480_v6 }
 0x265   : >> { %v6003_v57 = vmax.f32 %v5995_v13, %v5999_v5  ;;  %5963 = vst.msk [vmem:[#allocation2 + $0x78] sm:$0xf] %vm5962_vm3, %v5945_v46  ;;  %v5944_v29 = vadd.f32 %v5921_v53, %v5712_v18 }
 0x266   : >> { %v5982_v22 = vld [vmem:[#allocation2 + $0x50] ss:$2 sm:$0xff]  ;;  %v5990_v11 = vld [vmem:[#allocation2 + $0x51] ss:$2 sm:$0xff] }
 0x267   : >> { %v6014_v7 = vadd.f32 %v7031_v9, %v6003_v57  ;;  %v6000_v34 = vmax.f32 %v5982_v22, %v5990_v11  ;;  %5961 = vst.msk [vmem:[#allocation2 + $0x70] sm:$0xff] %vm5946_vm2, %v5944_v29 }
 0x269   : >> { %v6018_v14 = vmax.f32 %v6014_v7, 0.0  ;;  %v6004_v48 = vmax.f32 %v5996_v35, %v6000_v34 }
 0x26a   : >> { %v5984_v10 = vld [vmem:[#allocation2 + $0x60] ss:$2 sm:$0xff]  ;;  %v5992_v47 = vld [vmem:[#allocation2 + $0x61] ss:$2 sm:$0xff] }
 0x26b   : >> { %6024 = vst.msk [vmem:[%s6023_s6] sm:$0xff] %vm5946_vm2, %v6018_v14  ;;  %v6015_v52 = vadd.f32 %v7031_v9, %v6004_v48  ;;  %v6001_v1 = vmax.f32 %v5984_v10, %v5992_v47 }
 0x26d   : >> { %v6019_v58 = vmax.f32 %v6015_v52, 0.0  ;;  %v6005_v56 = vmax.f32 %v5997_v2, %v6001_v1 }
 0x26e   : >> { %v5986_v33 = vld [vmem:[#allocation2 + $0x70] ss:$2 sm:$0x3f]  ;;  %v5994_v41 = vld [vmem:[#allocation2 + $0x71] ss:$2 sm:$0x3f] }
 0x26f   : >> { %6025 = vst.msk [vmem:[%s6023_s6 + $0x8] sm:$0xff] %vm5946_vm2, %v6019_v58  ;;  %v6016_v63 = vadd.f32 %v7031_v9, %v6005_v56  ;;  %v6002_v32 = vmax.f32 %v5986_v33, %v5994_v41 }
 0x271   : >> { %v6020_v54 = vmax.f32 %v6016_v63, 0.0  ;;  %v6006_v60 = vmax.f32 %v5998_v43, %v6002_v32 }
 0x273   : >> { %6026 = vst.msk [vmem:[%s6023_s6 + $0x10] sm:$0xff] %vm5946_vm2, %v6020_v54  ;;  %v6017_v20 = vadd.f32 %v7031_v9, %v6006_v60  ;;  %175 = sbr.rel (!%p173_p4) target bundleno = 15 (0xf), region = 134 }
 0x275   : >> { %v6021_v44 = vmax.f32 %v6017_v20, 0.0 }
 0x277   : >> { %6028 = vst.msk [vmem:[%s6023_s6 + $0x18] sm:$0x3f] %vm6027_vm4, %v6021_v44 }
 0x278 PF: > { %s13_s12 = sadd.s32 1, %s8139_s12  }
 0x279   : > { %p10_p5 = scmp.ge.s32.totalorder %s13_s12, 4  }
 0x27b   :  { %12 = sbr.rel (!%p10_p5) target bundleno = 1 (0x1), region = 145 }

</bundles_post_ra>
